<compile_context>
chip_gen: v6e
topology: v6e:2x2x1
jax: 0.10.0
libtpu: 0.0.40
codegen_flags: <defaults>
</compile_context>

<pallas_src>
import functools

import numpy as np
import jax
import jax.numpy as jnp
from jax.experimental import pallas as pl
from jax.experimental.pallas import tpu as pltpu

C1, C2, C3 = 16, 32, 64          # conv channel widths of the module


# ----------------------------------------------------------------------------
# Fused forward kernel: one grid step == one batch element
# ----------------------------------------------------------------------------
def _detector_kernel(x_ref, band1_ref, b1_ref, band2_ref, b2_ref, band3_ref, b3_ref,
                     wh_ref, bh_ref, out_ref, xp1, xp2, xp3, *, H, W, nout):
    H2, W2 = H // 2, W // 2
    H4, W4 = H // 4, W // 4
    H8 = H // 8

    # Zero only the two h-padding rows of each staging buffer (w 'same' padding is
    # implicit in the band matrices).  Done every grid step: scratch is per-core.
    for ref, rows in ((xp1, H), (xp2, H2), (xp3, H4)):
        ref[0:1, :] = jnp.zeros((1, ref.shape[1]), ref.dtype)
        ref[rows + 1:rows + 2, :] = jnp.zeros((1, ref.shape[1]), ref.dtype)

    # Input block is already (H, W*3) bf16 with lane index = w*3 + c.
    xp1[1:H + 1, :] = x_ref[0]

    def conv_pool(xp, band_ref, b_ref, Hs, L):
        """3x3 'same' conv + bias + ReLU + 2x2 max pool, fused.

        xp       : (Hs+2, Ws*Cin) bf16  zero-h-padded activations
        band_ref : (6, Ws*Cin, L) bf16  banded weights, index 2*ky + w_parity
        b_ref    : (1, L)         f32   bias tiled over w
        returns (Hs//2, L) f32, L = (Ws//2)*Cout lanes (lane index = wo*Cout + c)
        """
        ev = jnp.zeros((Hs, L), jnp.float32)
        od = jnp.zeros((Hs, L), jnp.float32)
        for ky in range(3):                               # 3 deep-K matmuls per w-parity
            lhs = xp[ky:ky + Hs, :]
            ev = ev + jnp.dot(lhs, band_ref[2 * ky],
                              preferred_element_type=jnp.float32)
            od = od + jnp.dot(lhs, band_ref[2 * ky + 1],
                              preferred_element_type=jnp.float32)
        m = jnp.maximum(ev, od)                           # pool along w (parity max)
        m = m.reshape(Hs // 2, 2 * L)                     # row pairs side by side on lanes
        m = jnp.maximum(m[:, :L], m[:, L:])               # pool along h
        return jnp.maximum(m + b_ref[...], 0.0)           # bias+ReLU (commute with max pool)

    a2 = conv_pool(xp1, band1_ref, b1_ref, H, W2 * C1)    # (H2, W2*16)
    xp2[1:H2 + 1, :] = a2.astype(xp2.dtype)

    a3 = conv_pool(xp2, band2_ref, b2_ref, H2, W4 * C2)   # (H4, W4*32)
    xp3[1:H4 + 1, :] = a3.astype(xp3.dtype)

    # conv3 + bias + ReLU (no max pool; the 2x2 adaptive avg pool is folded into wh)
    y3 = jnp.zeros((H4, W4 * C3), jnp.float32)
    for ky in range(3):
        y3 = y3 + jnp.dot(xp3[ky:ky + H4, :], band3_ref[ky],
                          preferred_element_type=jnp.float32)
    y3 = jnp.maximum(y3 + b3_ref[...], 0.0)               # (H4, W4*64)

    # Single head matmul: column block j carries the (avg-pool-folded) cls|bb weights
    # assuming h8 == j; pick the matching block per row pair and sum.
    big = jnp.dot(y3.astype(wh_ref.dtype), wh_ref[...],
                  preferred_element_type=jnp.float32)      # (H4, H8*nout)
    res = bh_ref[...]                                      # (1, nout) f32 bias
    for j in range(H8):
        blk = big[2 * j:2 * j + 2, j * nout:(j + 1) * nout]
        res = res + blk[0:1, :] + blk[1:2, :]
    out_ref[0] = res


# ----------------------------------------------------------------------------
# Wrapper
# ----------------------------------------------------------------------------
def airplane_detector_forward(x_nchw, kp):
    """x_nchw: (N, 3, H, W) float32; kp: kernel-layout params from prepare_params()."""
    N, C, H, W = x_nchw.shape
    assert C == 3 and H % 8 == 0 and W % 8 == 0, "H and W must be divisible by 8"
    nout = kp["nout"]
    H2, W2, H4, W4, H8 = H // 2, W // 2, H // 4, W // 4, H // 8

    # Dense lane layout for the input: (N, H, W*3) bf16, lane index = w*3 + c.
    x = jnp.transpose(x_nchw, (0, 2, 3, 1)).reshape(N, H, W * 3).astype(jnp.bfloat16)

    # Crude VMEM budget guard (bands scale ~W^2; weights may be double-buffered).
    weight_bytes = sum(int(np.prod(kp[k].shape)) * kp[k].dtype.itemsize
                       for k in ("band1", "b1", "band2", "b2", "band3", "b3", "wh", "bh"))
    est_vmem = 2 * (weight_bytes + H * W * 3 * 2) + (1 << 20)
    assert est_vmem < 48 * 1024 * 1024, "band weights would overflow VMEM at this resolution"
    # TODO(synk): tile H over the grid (or re-tile the bands) for large resolutions
    # instead of asserting; at the 32x32 test size total VMEM use is ~5 MiB.

    kernel = functools.partial(_detector_kernel, H=H, W=W, nout=nout)
    out = pl.pallas_call(
        kernel,
        out_shape=jax.ShapeDtypeStruct((N, 1, nout), jnp.float32),
        grid=(N,),
        in_specs=[
            pl.BlockSpec((1, H, W * 3), lambda n: (n, 0, 0)),
            pl.BlockSpec((6, W * 3, W2 * C1), lambda n: (0, 0, 0)),
            pl.BlockSpec((1, W2 * C1), lambda n: (0, 0)),
            pl.BlockSpec((6, W2 * C1, W4 * C2), lambda n: (0, 0, 0)),
            pl.BlockSpec((1, W4 * C2), lambda n: (0, 0)),
            pl.BlockSpec((3, W4 * C2, W4 * C3), lambda n: (0, 0, 0)),
            pl.BlockSpec((1, W4 * C3), lambda n: (0, 0)),
            pl.BlockSpec((W4 * C3, H8 * nout), lambda n: (0, 0)),
            pl.BlockSpec((1, nout), lambda n: (0, 0)),
        ],
        out_specs=pl.BlockSpec((1, 1, nout), lambda n: (n, 0, 0)),
        scratch_shapes=[
            pltpu.VMEM((H + 2, W * 3), jnp.bfloat16),       # h-padded stage-1 input
            pltpu.VMEM((H2 + 2, W2 * C1), jnp.bfloat16),    # h-padded stage-2 input
            pltpu.VMEM((H4 + 2, W4 * C2), jnp.bfloat16),    # h-padded stage-3 input
        ],
        compiler_params=pltpu.CompilerParams(dimension_semantics=("parallel",)),
    )(x, kp["band1"], kp["b1"], kp["band2"], kp["b2"], kp["band3"], kp["b3"],
      kp["wh"], kp["bh"])

    out = out.reshape(N, nout)
    nc = kp["num_classes"]
    return out[:, :nc], out[:, nc:nc + 4]


# ----------------------------------------------------------------------------
# Parameters: PyTorch layouts -> kernel (band / folded-head) layouts
# ----------------------------------------------------------------------------
def init_params(key, width, height, num_classes):
    """Deterministic synthetic parameters in the PyTorch layouts of AirplaneDetector."""
    ks = jax.random.split(key, 10)

    def conv(kw, kb, cin, cout):
        w = jax.random.normal(kw, (cout, cin, 3, 3), jnp.float32) / jnp.sqrt(cin * 9.0)
        b = jax.random.normal(kb, (cout,), jnp.float32) * 0.01
        return w, b

    feat = C3 * (height // 8) * (width // 8)

    def lin(kw, kb, out_f):
        w = jax.random.normal(kw, (out_f, feat), jnp.float32) / jnp.sqrt(float(feat))
        b = jax.random.normal(kb, (out_f,), jnp.float32) * 0.01
        return w, b

    w1, b1 = conv(ks[0], ks[1], 3, C1)
    w2, b2 = conv(ks[2], ks[3], C1, C2)
    w3, b3 = conv(ks[4], ks[5], C2, C3)
    wcls, bcls = lin(ks[6], ks[7], num_classes)
    wbb, bbb = lin(ks[8], ks[9], 4)
    return dict(w1=w1, b1=b1, w2=w2, b2=b2, w3=w3, b3=b3,
                w_cls=wcls, b_cls=bcls, w_bb=wbb, b_bb=bbb)


def _band_weights(wconv, W_in, fuse_pool):
    """Fold the 3x3 w-taps (and, if fuse_pool, the even/odd w columns of a 2x2 max pool)
    of a conv into block-banded matmul weights (K = W_in*Cin)."""
    wconv = np.asarray(wconv, np.float32)
    Cout, Cin = wconv.shape[0], wconv.shape[1]
    if fuse_pool:
        Wo = W_in // 2
        bands = np.zeros((6, W_in * Cin, Wo * Cout), np.float32)
        for ky in range(3):
            for par in range(2):
                for wo in range(Wo):
                    w_out = 2 * wo + par
                    for kx in range(3):
                        win = w_out + kx - 1
                        if 0 <= win < W_in:
                            bands[2 * ky + par,
                                  win * Cin:(win + 1) * Cin,
                                  wo * Cout:(wo + 1) * Cout] = wconv[:, :, ky, kx].T
    else:
        bands = np.zeros((3, W_in * Cin, W_in * Cout), np.float32)
        for ky in range(3):
            for w_out in range(W_in):
                for kx in range(3):
                    win = w_out + kx - 1
                    if 0 <= win < W_in:
                        bands[ky,
                              win * Cin:(win + 1) * Cin,
                              w_out * Cout:(w_out + 1) * Cout] = wconv[:, :, ky, kx].T
    return jnp.asarray(bands, jnp.bfloat16)


def prepare_params(p, width, height, num_classes):
    H, W = height, width
    W2, W4, H8, W8 = W // 2, W // 4, H // 8, W // 8
    n_heads = num_classes + 4
    nout = ((n_heads + 127) // 128) * 128           # lane-dense, exactly 128 for small heads

    # Head: fold 2x2 adaptive avg pool + NCHW flatten permutation + (cls|bb) concat into
    # one (W4*C3, H8*nout) matrix; column block j == "head weights assuming h8 == j".
    wcat = np.concatenate([np.asarray(p["w_cls"]), np.asarray(p["w_bb"])], axis=0)
    wcat = wcat.reshape(n_heads, C3, H8, W8).astype(np.float32)
    wh = np.zeros((W4 * C3, H8 * nout), np.float32)
    for w4 in range(W4):
        for j in range(H8):
            wh[w4 * C3:(w4 + 1) * C3, j * nout:j * nout + n_heads] = \
                0.25 * wcat[:, :, j, w4 // 2].T
    bh = np.zeros((1, nout), np.float32)
    bh[0, :n_heads] = np.concatenate([np.asarray(p["b_cls"]), np.asarray(p["b_bb"])])

    return dict(
        band1=_band_weights(p["w1"], W, True),
        b1=jnp.asarray(np.tile(np.asarray(p["b1"], np.float32), W2)[None, :]),
        band2=_band_weights(p["w2"], W2, True),
        b2=jnp.asarray(np.tile(np.asarray(p["b2"], np.float32), W4)[None, :]),
        band3=_band_weights(p["w3"], W4, False),
        b3=jnp.asarray(np.tile(np.asarray(p["b3"], np.float32), W4)[None, :]),
        wh=jnp.asarray(wh, jnp.bfloat16),
        bh=jnp.asarray(bh),
        num_classes=num_classes, nout=nout)


# ----------------------------------------------------------------------------
# Pure-JAX reference (f32) of the PyTorch forward, for a tolerance check
# ----------------------------------------------------------------------------
def reference_forward(x, p):
    def conv(z, w, b):
        y = jax.lax.conv_general_dilated(z, w, window_strides=(1, 1), padding="SAME",
                                         dimension_numbers=("NCHW", "OIHW", "NCHW"))
        return jax.nn.relu(y + b[None, :, None, None])

    def pool(z, op, init):
        return jax.lax.reduce_window(z, init, op, (1, 1, 2, 2), (1, 1, 2, 2), "VALID")

    y = pool(conv(x, p["w1"], p["b1"]), jax.lax.max, -jnp.inf)
    y = pool(conv(y, p["w2"], p["b2"]), jax.lax.max, -jnp.inf)
    y = pool(conv(y, p["w3"], p["b3"]), jax.lax.add, 0.0) * 0.25   # exact adaptive avg pool
    f = y.reshape(y.shape[0], -1)
    return f @ p["w_cls"].T + p["b_cls"], f @ p["w_bb"].T + p["b_bb"]


if __name__ == "__main__":
    width = height = 32          # small test size consistent with the module (divisible by 8)
    num_classes = 2
    batch = 2

    k_x, k_p = jax.random.split(jax.random.PRNGKey(0))
    raw = init_params(k_p, width, height, num_classes)
    params = prepare_params(raw, width, height, num_classes)
    x = jax.random.normal(k_x, (batch, 3, height, width), jnp.float32)

    cls_out, bb_out = airplane_detector_forward(x, params)
    jax.block_until_ready((cls_out, bb_out))

    assert cls_out.shape == (batch, num_classes), cls_out.shape
    assert bb_out.shape == (batch, 4), bb_out.shape
    assert bool(jnp.all(jnp.isfinite(cls_out))) and bool(jnp.all(jnp.isfinite(bb_out)))

    cls_ref, bb_ref = reference_forward(x, raw)
    err = max(float(jnp.max(jnp.abs(cls_out - cls_ref))),
              float(jnp.max(jnp.abs(bb_out - bb_ref))))
    assert err < 0.15, f"kernel/reference mismatch beyond bf16 tolerance: {err}"
    print("KERNEL_OK")
</pallas_src>

<mosaic_0001>
module attributes {stable_mosaic.version = 11 : i64} {
  func.func @_detector_kernel(%arg0: i32, %arg1: memref<1x32x96xbf16, #tpu.memory_space<vmem>>, %arg2: memref<6x96x256xbf16, #tpu.memory_space<vmem>>, %arg3: memref<1x256xf32, #tpu.memory_space<vmem>>, %arg4: memref<6x256x256xbf16, #tpu.memory_space<vmem>>, %arg5: memref<1x256xf32, #tpu.memory_space<vmem>>, %arg6: memref<3x256x512xbf16, #tpu.memory_space<vmem>>, %arg7: memref<1x512xf32, #tpu.memory_space<vmem>>, %arg8: memref<512x512xbf16, #tpu.memory_space<vmem>>, %arg9: memref<1x128xf32, #tpu.memory_space<vmem>>, %arg10: memref<1x1x128xf32, #tpu.memory_space<vmem>>, %arg11: memref<34x96xbf16, #tpu.memory_space<vmem>>, %arg12: memref<18x256xbf16, #tpu.memory_space<vmem>>, %arg13: memref<10x256xbf16, #tpu.memory_space<vmem>>) attributes {dimension_semantics = [#tpu.dimension_semantics<parallel>], iteration_bounds = array<i64: 2>, scalar_prefetch = 0 : i64, scratch_operands = 3 : i64, tpu.core_type = #tpu.core_type<tc>, window_params = [{transform_indices = @transform_0, window_bounds = array<i64: 1, 32, 96>}, {pipeline_mode = #tpu.pipeline_mode<synchronous>, transform_indices = @transform_1, window_bounds = array<i64: 6, 96, 256>}, {pipeline_mode = #tpu.pipeline_mode<synchronous>, transform_indices = @transform_2, window_bounds = array<i64: 1, 256>}, {pipeline_mode = #tpu.pipeline_mode<synchronous>, transform_indices = @transform_3, window_bounds = array<i64: 6, 256, 256>}, {pipeline_mode = #tpu.pipeline_mode<synchronous>, transform_indices = @transform_4, window_bounds = array<i64: 1, 256>}, {pipeline_mode = #tpu.pipeline_mode<synchronous>, transform_indices = @transform_5, window_bounds = array<i64: 3, 256, 512>}, {pipeline_mode = #tpu.pipeline_mode<synchronous>, transform_indices = @transform_6, window_bounds = array<i64: 1, 512>}, {pipeline_mode = #tpu.pipeline_mode<synchronous>, transform_indices = @transform_7, window_bounds = array<i64: 512, 512>}, {pipeline_mode = #tpu.pipeline_mode<synchronous>, transform_indices = @transform_8, window_bounds = array<i64: 1, 128>}, {transform_indices = @transform_9, window_bounds = array<i64: 1, 1, 128>}]} {
    %cst = arith.constant 0.000000e+00 : bf16
    %0 = vector.broadcast %cst : bf16 to vector<1x96xbf16>
    %c0 = arith.constant 0 : index
    %c0_0 = arith.constant 0 : index
    %1 = vector.load %arg11[%c0, %c0_0] : memref<34x96xbf16, #tpu.memory_space<vmem>>, vector<1x96xbf16>
    tpu.vector_store %arg11[%c0, %c0_0], %0 {strides = array<i32>} : memref<34x96xbf16, #tpu.memory_space<vmem>>, vector<1x96xbf16>,
    %cst_1 = arith.constant 0.000000e+00 : bf16
    %2 = vector.broadcast %cst_1 : bf16 to vector<1x96xbf16>
    %c33 = arith.constant 33 : index
    %c0_2 = arith.constant 0 : index
    %3 = vector.load %arg11[%c33, %c0_2] : memref<34x96xbf16, #tpu.memory_space<vmem>>, vector<1x96xbf16>
    tpu.vector_store %arg11[%c33, %c0_2], %2 {strides = array<i32>} : memref<34x96xbf16, #tpu.memory_space<vmem>>, vector<1x96xbf16>,
    %cst_3 = arith.constant 0.000000e+00 : bf16
    %4 = vector.broadcast %cst_3 : bf16 to vector<1x256xbf16>
    %c0_4 = arith.constant 0 : index
    %c0_5 = arith.constant 0 : index
    %5 = vector.load %arg12[%c0_4, %c0_5] : memref<18x256xbf16, #tpu.memory_space<vmem>>, vector<1x256xbf16>
    tpu.vector_store %arg12[%c0_4, %c0_5], %4 {strides = array<i32>} : memref<18x256xbf16, #tpu.memory_space<vmem>>, vector<1x256xbf16>,
    %cst_6 = arith.constant 0.000000e+00 : bf16
    %6 = vector.broadcast %cst_6 : bf16 to vector<1x256xbf16>
    %c17 = arith.constant 17 : index
    %c0_7 = arith.constant 0 : index
    %7 = vector.load %arg12[%c17, %c0_7] : memref<18x256xbf16, #tpu.memory_space<vmem>>, vector<1x256xbf16>
    tpu.vector_store %arg12[%c17, %c0_7], %6 {strides = array<i32>} : memref<18x256xbf16, #tpu.memory_space<vmem>>, vector<1x256xbf16>,
    %cst_8 = arith.constant 0.000000e+00 : bf16
    %8 = vector.broadcast %cst_8 : bf16 to vector<1x256xbf16>
    %c0_9 = arith.constant 0 : index
    %c0_10 = arith.constant 0 : index
    %9 = vector.load %arg13[%c0_9, %c0_10] : memref<10x256xbf16, #tpu.memory_space<vmem>>, vector<1x256xbf16>
    tpu.vector_store %arg13[%c0_9, %c0_10], %8 {strides = array<i32>} : memref<10x256xbf16, #tpu.memory_space<vmem>>, vector<1x256xbf16>,
    %cst_11 = arith.constant 0.000000e+00 : bf16
    %10 = vector.broadcast %cst_11 : bf16 to vector<1x256xbf16>
    %c9 = arith.constant 9 : index
    %c0_12 = arith.constant 0 : index
    %11 = vector.load %arg13[%c9, %c0_12] : memref<10x256xbf16, #tpu.memory_space<vmem>>, vector<1x256xbf16>
    tpu.vector_store %arg13[%c9, %c0_12], %10 {strides = array<i32>} : memref<10x256xbf16, #tpu.memory_space<vmem>>, vector<1x256xbf16>,
    %c0_13 = arith.constant 0 : index
    %c0_14 = arith.constant 0 : index
    %c0_15 = arith.constant 0 : index
    %12 = vector.load %arg1[%c0_13, %c0_14, %c0_15] : memref<1x32x96xbf16, #tpu.memory_space<vmem>>, vector<1x32x96xbf16>
    %13 = vector.shape_cast %12 : vector<1x32x96xbf16> to vector<32x96xbf16>
    %c1 = arith.constant 1 : index
    %c0_16 = arith.constant 0 : index
    %14 = vector.load %arg11[%c1, %c0_16] : memref<34x96xbf16, #tpu.memory_space<vmem>>, vector<32x96xbf16>
    tpu.vector_store %arg11[%c1, %c0_16], %13 {strides = array<i32>} : memref<34x96xbf16, #tpu.memory_space<vmem>>, vector<32x96xbf16>,
    %cst_17 = arith.constant 0.000000e+00 : f32
    %15 = vector.broadcast %cst_17 : f32 to vector<32x256xf32>
    %cst_18 = arith.constant 0.000000e+00 : f32
    %16 = vector.broadcast %cst_18 : f32 to vector<32x256xf32>
    %c0_19 = arith.constant 0 : index
    %c0_20 = arith.constant 0 : index
    %17 = vector.load %arg11[%c0_19, %c0_20] : memref<34x96xbf16, #tpu.memory_space<vmem>>, vector<32x96xbf16>
    %c0_21 = arith.constant 0 : index
    %c0_22 = arith.constant 0 : index
    %c0_23 = arith.constant 0 : index
    %18 = vector.load %arg2[%c0_21, %c0_22, %c0_23] : memref<6x96x256xbf16, #tpu.memory_space<vmem>>, vector<1x96x256xbf16>
    %19 = vector.shape_cast %18 : vector<1x96x256xbf16> to vector<96x256xbf16>
    %cst_24 = arith.constant dense<0.000000e+00> : vector<32x256xf32>
    %20 = tpu.matmul %17, %19, %cst_24 {dimension_numbers = #tpu.dot_dimension_numbers<[1], [0], [0], [1], [0, 0, 1, 1], [], []>} : vector<32x96xbf16>, vector<96x256xbf16>, vector<32x256xf32> -> vector<32x256xf32>
    %21 = arith.addf %15, %20 : vector<32x256xf32>
    %c1_25 = arith.constant 1 : index
    %c0_26 = arith.constant 0 : index
    %c0_27 = arith.constant 0 : index
    %22 = vector.load %arg2[%c1_25, %c0_26, %c0_27] : memref<6x96x256xbf16, #tpu.memory_space<vmem>>, vector<1x96x256xbf16>
    %23 = vector.shape_cast %22 : vector<1x96x256xbf16> to vector<96x256xbf16>
    %cst_28 = arith.constant dense<0.000000e+00> : vector<32x256xf32>
    %24 = tpu.matmul %17, %23, %cst_28 {dimension_numbers = #tpu.dot_dimension_numbers<[1], [0], [0], [1], [0, 0, 1, 1], [], []>} : vector<32x96xbf16>, vector<96x256xbf16>, vector<32x256xf32> -> vector<32x256xf32>
    %25 = arith.addf %16, %24 : vector<32x256xf32>
    %c1_29 = arith.constant 1 : index
    %c0_30 = arith.constant 0 : index
    %26 = vector.load %arg11[%c1_29, %c0_30] : memref<34x96xbf16, #tpu.memory_space<vmem>>, vector<32x96xbf16>
    %c2 = arith.constant 2 : index
    %c0_31 = arith.constant 0 : index
    %c0_32 = arith.constant 0 : index
    %27 = vector.load %arg2[%c2, %c0_31, %c0_32] : memref<6x96x256xbf16, #tpu.memory_space<vmem>>, vector<1x96x256xbf16>
    %28 = vector.shape_cast %27 : vector<1x96x256xbf16> to vector<96x256xbf16>
    %cst_33 = arith.constant dense<0.000000e+00> : vector<32x256xf32>
    %29 = tpu.matmul %26, %28, %cst_33 {dimension_numbers = #tpu.dot_dimension_numbers<[1], [0], [0], [1], [0, 0, 1, 1], [], []>} : vector<32x96xbf16>, vector<96x256xbf16>, vector<32x256xf32> -> vector<32x256xf32>
    %30 = arith.addf %21, %29 : vector<32x256xf32>
    %c3 = arith.constant 3 : index
    %c0_34 = arith.constant 0 : index
    %c0_35 = arith.constant 0 : index
    %31 = vector.load %arg2[%c3, %c0_34, %c0_35] : memref<6x96x256xbf16, #tpu.memory_space<vmem>>, vector<1x96x256xbf16>
    %32 = vector.shape_cast %31 : vector<1x96x256xbf16> to vector<96x256xbf16>
    %cst_36 = arith.constant dense<0.000000e+00> : vector<32x256xf32>
    %33 = tpu.matmul %26, %32, %cst_36 {dimension_numbers = #tpu.dot_dimension_numbers<[1], [0], [0], [1], [0, 0, 1, 1], [], []>} : vector<32x96xbf16>, vector<96x256xbf16>, vector<32x256xf32> -> vector<32x256xf32>
    %34 = arith.addf %25, %33 : vector<32x256xf32>
    %c2_37 = arith.constant 2 : index
    %c0_38 = arith.constant 0 : index
    %35 = vector.load %arg11[%c2_37, %c0_38] : memref<34x96xbf16, #tpu.memory_space<vmem>>, vector<32x96xbf16>
    %c4 = arith.constant 4 : index
    %c0_39 = arith.constant 0 : index
    %c0_40 = arith.constant 0 : index
    %36 = vector.load %arg2[%c4, %c0_39, %c0_40] : memref<6x96x256xbf16, #tpu.memory_space<vmem>>, vector<1x96x256xbf16>
    %37 = vector.shape_cast %36 : vector<1x96x256xbf16> to vector<96x256xbf16>
    %cst_41 = arith.constant dense<0.000000e+00> : vector<32x256xf32>
    %38 = tpu.matmul %35, %37, %cst_41 {dimension_numbers = #tpu.dot_dimension_numbers<[1], [0], [0], [1], [0, 0, 1, 1], [], []>} : vector<32x96xbf16>, vector<96x256xbf16>, vector<32x256xf32> -> vector<32x256xf32>
    %39 = arith.addf %30, %38 : vector<32x256xf32>
    %c5 = arith.constant 5 : index
    %c0_42 = arith.constant 0 : index
    %c0_43 = arith.constant 0 : index
    %40 = vector.load %arg2[%c5, %c0_42, %c0_43] : memref<6x96x256xbf16, #tpu.memory_space<vmem>>, vector<1x96x256xbf16>
    %41 = vector.shape_cast %40 : vector<1x96x256xbf16> to vector<96x256xbf16>
    %cst_44 = arith.constant dense<0.000000e+00> : vector<32x256xf32>
    %42 = tpu.matmul %35, %41, %cst_44 {dimension_numbers = #tpu.dot_dimension_numbers<[1], [0], [0], [1], [0, 0, 1, 1], [], []>} : vector<32x96xbf16>, vector<96x256xbf16>, vector<32x256xf32> -> vector<32x256xf32>
    %43 = arith.addf %34, %42 : vector<32x256xf32>
    %44 = arith.maximumf %39, %43 : vector<32x256xf32>
    %45 = vector.shape_cast %44 : vector<32x256xf32> to vector<16x512xf32>
    %46 = vector.extract_strided_slice %45 {offsets = [0, 0], sizes = [16, 256], strides = [1, 1]} : vector<16x512xf32> to vector<16x256xf32>
    %47 = vector.extract_strided_slice %45 {offsets = [0, 256], sizes = [16, 256], strides = [1, 1]} : vector<16x512xf32> to vector<16x256xf32>
    %48 = arith.maximumf %46, %47 : vector<16x256xf32>
    %c0_45 = arith.constant 0 : index
    %c0_46 = arith.constant 0 : index
    %49 = vector.load %arg3[%c0_45, %c0_46] : memref<1x256xf32, #tpu.memory_space<vmem>>, vector<1x256xf32>
    %50 = vector.broadcast %49 : vector<1x256xf32> to vector<16x256xf32>
    %51 = arith.addf %48, %50 : vector<16x256xf32>
    %cst_47 = arith.constant 0.000000e+00 : f32
    %52 = vector.broadcast %cst_47 : f32 to vector<16x256xf32>
    %53 = arith.maximumf %51, %52 : vector<16x256xf32>
    %54 = arith.truncf %53 : vector<16x256xf32> to vector<16x256xbf16>
    %c1_48 = arith.constant 1 : index
    %c0_49 = arith.constant 0 : index
    %55 = vector.load %arg12[%c1_48, %c0_49] : memref<18x256xbf16, #tpu.memory_space<vmem>>, vector<16x256xbf16>
    tpu.vector_store %arg12[%c1_48, %c0_49], %54 {strides = array<i32>} : memref<18x256xbf16, #tpu.memory_space<vmem>>, vector<16x256xbf16>,
    %cst_50 = arith.constant 0.000000e+00 : f32
    %56 = vector.broadcast %cst_50 : f32 to vector<16x256xf32>
    %cst_51 = arith.constant 0.000000e+00 : f32
    %57 = vector.broadcast %cst_51 : f32 to vector<16x256xf32>
    %c0_52 = arith.constant 0 : index
    %c0_53 = arith.constant 0 : index
    %58 = vector.load %arg12[%c0_52, %c0_53] : memref<18x256xbf16, #tpu.memory_space<vmem>>, vector<16x256xbf16>
    %c0_54 = arith.constant 0 : index
    %c0_55 = arith.constant 0 : index
    %c0_56 = arith.constant 0 : index
    %59 = vector.load %arg4[%c0_54, %c0_55, %c0_56] : memref<6x256x256xbf16, #tpu.memory_space<vmem>>, vector<1x256x256xbf16>
    %60 = vector.shape_cast %59 : vector<1x256x256xbf16> to vector<256x256xbf16>
    %cst_57 = arith.constant dense<0.000000e+00> : vector<16x256xf32>
    %61 = tpu.matmul %58, %60, %cst_57 {dimension_numbers = #tpu.dot_dimension_numbers<[1], [0], [0], [1], [0, 0, 1, 1], [], []>} : vector<16x256xbf16>, vector<256x256xbf16>, vector<16x256xf32> -> vector<16x256xf32>
    %62 = arith.addf %56, %61 : vector<16x256xf32>
    %c1_58 = arith.constant 1 : index
    %c0_59 = arith.constant 0 : index
    %c0_60 = arith.constant 0 : index
    %63 = vector.load %arg4[%c1_58, %c0_59, %c0_60] : memref<6x256x256xbf16, #tpu.memory_space<vmem>>, vector<1x256x256xbf16>
    %64 = vector.shape_cast %63 : vector<1x256x256xbf16> to vector<256x256xbf16>
    %cst_61 = arith.constant dense<0.000000e+00> : vector<16x256xf32>
    %65 = tpu.matmul %58, %64, %cst_61 {dimension_numbers = #tpu.dot_dimension_numbers<[1], [0], [0], [1], [0, 0, 1, 1], [], []>} : vector<16x256xbf16>, vector<256x256xbf16>, vector<16x256xf32> -> vector<16x256xf32>
    %66 = arith.addf %57, %65 : vector<16x256xf32>
    %c1_62 = arith.constant 1 : index
    %c0_63 = arith.constant 0 : index
    %67 = vector.load %arg12[%c1_62, %c0_63] : memref<18x256xbf16, #tpu.memory_space<vmem>>, vector<16x256xbf16>
    %c2_64 = arith.constant 2 : index
    %c0_65 = arith.constant 0 : index
    %c0_66 = arith.constant 0 : index
    %68 = vector.load %arg4[%c2_64, %c0_65, %c0_66] : memref<6x256x256xbf16, #tpu.memory_space<vmem>>, vector<1x256x256xbf16>
    %69 = vector.shape_cast %68 : vector<1x256x256xbf16> to vector<256x256xbf16>
    %cst_67 = arith.constant dense<0.000000e+00> : vector<16x256xf32>
    %70 = tpu.matmul %67, %69, %cst_67 {dimension_numbers = #tpu.dot_dimension_numbers<[1], [0], [0], [1], [0, 0, 1, 1], [], []>} : vector<16x256xbf16>, vector<256x256xbf16>, vector<16x256xf32> -> vector<16x256xf32>
    %71 = arith.addf %62, %70 : vector<16x256xf32>
    %c3_68 = arith.constant 3 : index
    %c0_69 = arith.constant 0 : index
    %c0_70 = arith.constant 0 : index
    %72 = vector.load %arg4[%c3_68, %c0_69, %c0_70] : memref<6x256x256xbf16, #tpu.memory_space<vmem>>, vector<1x256x256xbf16>
    %73 = vector.shape_cast %72 : vector<1x256x256xbf16> to vector<256x256xbf16>
    %cst_71 = arith.constant dense<0.000000e+00> : vector<16x256xf32>
    %74 = tpu.matmul %67, %73, %cst_71 {dimension_numbers = #tpu.dot_dimension_numbers<[1], [0], [0], [1], [0, 0, 1, 1], [], []>} : vector<16x256xbf16>, vector<256x256xbf16>, vector<16x256xf32> -> vector<16x256xf32>
    %75 = arith.addf %66, %74 : vector<16x256xf32>
    %c2_72 = arith.constant 2 : index
    %c0_73 = arith.constant 0 : index
    %76 = vector.load %arg12[%c2_72, %c0_73] : memref<18x256xbf16, #tpu.memory_space<vmem>>, vector<16x256xbf16>
    %c4_74 = arith.constant 4 : index
    %c0_75 = arith.constant 0 : index
    %c0_76 = arith.constant 0 : index
    %77 = vector.load %arg4[%c4_74, %c0_75, %c0_76] : memref<6x256x256xbf16, #tpu.memory_space<vmem>>, vector<1x256x256xbf16>
    %78 = vector.shape_cast %77 : vector<1x256x256xbf16> to vector<256x256xbf16>
    %cst_77 = arith.constant dense<0.000000e+00> : vector<16x256xf32>
    %79 = tpu.matmul %76, %78, %cst_77 {dimension_numbers = #tpu.dot_dimension_numbers<[1], [0], [0], [1], [0, 0, 1, 1], [], []>} : vector<16x256xbf16>, vector<256x256xbf16>, vector<16x256xf32> -> vector<16x256xf32>
    %80 = arith.addf %71, %79 : vector<16x256xf32>
    %c5_78 = arith.constant 5 : index
    %c0_79 = arith.constant 0 : index
    %c0_80 = arith.constant 0 : index
    %81 = vector.load %arg4[%c5_78, %c0_79, %c0_80] : memref<6x256x256xbf16, #tpu.memory_space<vmem>>, vector<1x256x256xbf16>
    %82 = vector.shape_cast %81 : vector<1x256x256xbf16> to vector<256x256xbf16>
    %cst_81 = arith.constant dense<0.000000e+00> : vector<16x256xf32>
    %83 = tpu.matmul %76, %82, %cst_81 {dimension_numbers = #tpu.dot_dimension_numbers<[1], [0], [0], [1], [0, 0, 1, 1], [], []>} : vector<16x256xbf16>, vector<256x256xbf16>, vector<16x256xf32> -> vector<16x256xf32>
    %84 = arith.addf %75, %83 : vector<16x256xf32>
    %85 = arith.maximumf %80, %84 : vector<16x256xf32>
    %86 = vector.shape_cast %85 : vector<16x256xf32> to vector<8x512xf32>
    %87 = vector.extract_strided_slice %86 {offsets = [0, 0], sizes = [8, 256], strides = [1, 1]} : vector<8x512xf32> to vector<8x256xf32>
    %88 = vector.extract_strided_slice %86 {offsets = [0, 256], sizes = [8, 256], strides = [1, 1]} : vector<8x512xf32> to vector<8x256xf32>
    %89 = arith.maximumf %87, %88 : vector<8x256xf32>
    %c0_82 = arith.constant 0 : index
    %c0_83 = arith.constant 0 : index
    %90 = vector.load %arg5[%c0_82, %c0_83] : memref<1x256xf32, #tpu.memory_space<vmem>>, vector<1x256xf32>
    %91 = vector.broadcast %90 : vector<1x256xf32> to vector<8x256xf32>
    %92 = arith.addf %89, %91 : vector<8x256xf32>
    %cst_84 = arith.constant 0.000000e+00 : f32
    %93 = vector.broadcast %cst_84 : f32 to vector<8x256xf32>
    %94 = arith.maximumf %92, %93 : vector<8x256xf32>
    %95 = arith.truncf %94 : vector<8x256xf32> to vector<8x256xbf16>
    %c1_85 = arith.constant 1 : index
    %c0_86 = arith.constant 0 : index
    %96 = vector.load %arg13[%c1_85, %c0_86] : memref<10x256xbf16, #tpu.memory_space<vmem>>, vector<8x256xbf16>
    tpu.vector_store %arg13[%c1_85, %c0_86], %95 {strides = array<i32>} : memref<10x256xbf16, #tpu.memory_space<vmem>>, vector<8x256xbf16>,
    %cst_87 = arith.constant 0.000000e+00 : f32
    %97 = vector.broadcast %cst_87 : f32 to vector<8x512xf32>
    %c0_88 = arith.constant 0 : index
    %c0_89 = arith.constant 0 : index
    %98 = vector.load %arg13[%c0_88, %c0_89] : memref<10x256xbf16, #tpu.memory_space<vmem>>, vector<8x256xbf16>
    %c0_90 = arith.constant 0 : index
    %c0_91 = arith.constant 0 : index
    %c0_92 = arith.constant 0 : index
    %99 = vector.load %arg6[%c0_90, %c0_91, %c0_92] : memref<3x256x512xbf16, #tpu.memory_space<vmem>>, vector<1x256x512xbf16>
    %100 = vector.shape_cast %99 : vector<1x256x512xbf16> to vector<256x512xbf16>
    %cst_93 = arith.constant dense<0.000000e+00> : vector<8x512xf32>
    %101 = tpu.matmul %98, %100, %cst_93 {dimension_numbers = #tpu.dot_dimension_numbers<[1], [0], [0], [1], [0, 0, 1, 1], [], []>} : vector<8x256xbf16>, vector<256x512xbf16>, vector<8x512xf32> -> vector<8x512xf32>
    %102 = arith.addf %97, %101 : vector<8x512xf32>
    %c1_94 = arith.constant 1 : index
    %c0_95 = arith.constant 0 : index
    %103 = vector.load %arg13[%c1_94, %c0_95] : memref<10x256xbf16, #tpu.memory_space<vmem>>, vector<8x256xbf16>
    %c1_96 = arith.constant 1 : index
    %c0_97 = arith.constant 0 : index
    %c0_98 = arith.constant 0 : index
    %104 = vector.load %arg6[%c1_96, %c0_97, %c0_98] : memref<3x256x512xbf16, #tpu.memory_space<vmem>>, vector<1x256x512xbf16>
    %105 = vector.shape_cast %104 : vector<1x256x512xbf16> to vector<256x512xbf16>
    %cst_99 = arith.constant dense<0.000000e+00> : vector<8x512xf32>
    %106 = tpu.matmul %103, %105, %cst_99 {dimension_numbers = #tpu.dot_dimension_numbers<[1], [0], [0], [1], [0, 0, 1, 1], [], []>} : vector<8x256xbf16>, vector<256x512xbf16>, vector<8x512xf32> -> vector<8x512xf32>
    %107 = arith.addf %102, %106 : vector<8x512xf32>
    %c2_100 = arith.constant 2 : index
    %c0_101 = arith.constant 0 : index
    %108 = vector.load %arg13[%c2_100, %c0_101] : memref<10x256xbf16, #tpu.memory_space<vmem>>, vector<8x256xbf16>
    %c2_102 = arith.constant 2 : index
    %c0_103 = arith.constant 0 : index
    %c0_104 = arith.constant 0 : index
    %109 = vector.load %arg6[%c2_102, %c0_103, %c0_104] : memref<3x256x512xbf16, #tpu.memory_space<vmem>>, vector<1x256x512xbf16>
    %110 = vector.shape_cast %109 : vector<1x256x512xbf16> to vector<256x512xbf16>
    %cst_105 = arith.constant dense<0.000000e+00> : vector<8x512xf32>
    %111 = tpu.matmul %108, %110, %cst_105 {dimension_numbers = #tpu.dot_dimension_numbers<[1], [0], [0], [1], [0, 0, 1, 1], [], []>} : vector<8x256xbf16>, vector<256x512xbf16>, vector<8x512xf32> -> vector<8x512xf32>
    %112 = arith.addf %107, %111 : vector<8x512xf32>
    %c0_106 = arith.constant 0 : index
    %c0_107 = arith.constant 0 : index
    %113 = vector.load %arg7[%c0_106, %c0_107] : memref<1x512xf32, #tpu.memory_space<vmem>>, vector<1x512xf32>
    %114 = vector.broadcast %113 : vector<1x512xf32> to vector<8x512xf32>
    %115 = arith.addf %112, %114 : vector<8x512xf32>
    %cst_108 = arith.constant 0.000000e+00 : f32
    %116 = vector.broadcast %cst_108 : f32 to vector<8x512xf32>
    %117 = arith.maximumf %115, %116 : vector<8x512xf32>
    %118 = arith.truncf %117 : vector<8x512xf32> to vector<8x512xbf16>
    %c0_109 = arith.constant 0 : index
    %c0_110 = arith.constant 0 : index
    %119 = vector.load %arg8[%c0_109, %c0_110] : memref<512x512xbf16, #tpu.memory_space<vmem>>, vector<512x512xbf16>
    %cst_111 = arith.constant dense<0.000000e+00> : vector<8x512xf32>
    %120 = tpu.matmul %118, %119, %cst_111 {dimension_numbers = #tpu.dot_dimension_numbers<[1], [0], [0], [1], [0, 0, 1, 1], [], []>} : vector<8x512xbf16>, vector<512x512xbf16>, vector<8x512xf32> -> vector<8x512xf32>
    %c0_112 = arith.constant 0 : index
    %c0_113 = arith.constant 0 : index
    %121 = vector.load %arg9[%c0_112, %c0_113] : memref<1x128xf32, #tpu.memory_space<vmem>>, vector<1x128xf32>
    %122 = vector.extract_strided_slice %120 {offsets = [0, 0], sizes = [2, 128], strides = [1, 1]} : vector<8x512xf32> to vector<2x128xf32>
    %123 = vector.extract_strided_slice %122 {offsets = [0, 0], sizes = [1, 128], strides = [1, 1]} : vector<2x128xf32> to vector<1x128xf32>
    %124 = arith.addf %121, %123 : vector<1x128xf32>
    %125 = vector.extract_strided_slice %122 {offsets = [1, 0], sizes = [1, 128], strides = [1, 1]} : vector<2x128xf32> to vector<1x128xf32>
    %126 = arith.addf %124, %125 : vector<1x128xf32>
    %127 = vector.extract_strided_slice %120 {offsets = [2, 128], sizes = [2, 128], strides = [1, 1]} : vector<8x512xf32> to vector<2x128xf32>
    %128 = vector.extract_strided_slice %127 {offsets = [0, 0], sizes = [1, 128], strides = [1, 1]} : vector<2x128xf32> to vector<1x128xf32>
    %129 = arith.addf %126, %128 : vector<1x128xf32>
    %130 = vector.extract_strided_slice %127 {offsets = [1, 0], sizes = [1, 128], strides = [1, 1]} : vector<2x128xf32> to vector<1x128xf32>
    %131 = arith.addf %129, %130 : vector<1x128xf32>
    %132 = vector.extract_strided_slice %120 {offsets = [4, 256], sizes = [2, 128], strides = [1, 1]} : vector<8x512xf32> to vector<2x128xf32>
    %133 = vector.extract_strided_slice %132 {offsets = [0, 0], sizes = [1, 128], strides = [1, 1]} : vector<2x128xf32> to vector<1x128xf32>
    %134 = arith.addf %131, %133 : vector<1x128xf32>
    %135 = vector.extract_strided_slice %132 {offsets = [1, 0], sizes = [1, 128], strides = [1, 1]} : vector<2x128xf32> to vector<1x128xf32>
    %136 = arith.addf %134, %135 : vector<1x128xf32>
    %137 = vector.extract_strided_slice %120 {offsets = [6, 384], sizes = [2, 128], strides = [1, 1]} : vector<8x512xf32> to vector<2x128xf32>
    %138 = vector.extract_strided_slice %137 {offsets = [0, 0], sizes = [1, 128], strides = [1, 1]} : vector<2x128xf32> to vector<1x128xf32>
    %139 = arith.addf %136, %138 : vector<1x128xf32>
    %140 = vector.extract_strided_slice %137 {offsets = [1, 0], sizes = [1, 128], strides = [1, 1]} : vector<2x128xf32> to vector<1x128xf32>
    %141 = arith.addf %139, %140 : vector<1x128xf32>
    %c0_114 = arith.constant 0 : index
    %c0_115 = arith.constant 0 : index
    %c0_116 = arith.constant 0 : index
    %142 = vector.load %arg10[%c0_114, %c0_115, %c0_116] : memref<1x1x128xf32, #tpu.memory_space<vmem>>, vector<1x1x128xf32>
    %143 = vector.shape_cast %142 : vector<1x1x128xf32> to vector<1x128xf32>
    %144 = vector.shape_cast %141 : vector<1x128xf32> to vector<1x1x128xf32>
    tpu.vector_store %arg10[%c0_114, %c0_115, %c0_116], %144 {strides = array<i32>} : memref<1x1x128xf32, #tpu.memory_space<vmem>>, vector<1x1x128xf32>,
    return
  }
  func.func @transform_0(%arg0: i32) -> (i32, i32, i32) {
    %c0_i32 = arith.constant 0 : i32
    %c0_i32_0 = arith.constant 0 : i32
    %c0_i32_1 = arith.constant 0 : i32
    return %arg0, %c0_i32, %c0_i32_0 : i32, i32, i32
  }
  func.func @transform_1(%arg0: i32) -> (i32, i32, i32) {
    %c0_i32 = arith.constant 0 : i32
    %c0_i32_0 = arith.constant 0 : i32
    %c0_i32_1 = arith.constant 0 : i32
    %c0_i32_2 = arith.constant 0 : i32
    return %c0_i32, %c0_i32_0, %c0_i32_1 : i32, i32, i32
  }
  func.func @transform_2(%arg0: i32) -> (i32, i32) {
    %c0_i32 = arith.constant 0 : i32
    %c0_i32_0 = arith.constant 0 : i32
    %c0_i32_1 = arith.constant 0 : i32
    return %c0_i32, %c0_i32_0 : i32, i32
  }
  func.func @transform_3(%arg0: i32) -> (i32, i32, i32) {
    %c0_i32 = arith.constant 0 : i32
    %c0_i32_0 = arith.constant 0 : i32
    %c0_i32_1 = arith.constant 0 : i32
    %c0_i32_2 = arith.constant 0 : i32
    return %c0_i32, %c0_i32_0, %c0_i32_1 : i32, i32, i32
  }
  func.func @transform_4(%arg0: i32) -> (i32, i32) {
    %c0_i32 = arith.constant 0 : i32
    %c0_i32_0 = arith.constant 0 : i32
    %c0_i32_1 = arith.constant 0 : i32
    return %c0_i32, %c0_i32_0 : i32, i32
  }
  func.func @transform_5(%arg0: i32) -> (i32, i32, i32) {
    %c0_i32 = arith.constant 0 : i32
    %c0_i32_0 = arith.constant 0 : i32
    %c0_i32_1 = arith.constant 0 : i32
    %c0_i32_2 = arith.constant 0 : i32
    return %c0_i32, %c0_i32_0, %c0_i32_1 : i32, i32, i32
  }
  func.func @transform_6(%arg0: i32) -> (i32, i32) {
    %c0_i32 = arith.constant 0 : i32
    %c0_i32_0 = arith.constant 0 : i32
    %c0_i32_1 = arith.constant 0 : i32
    return %c0_i32, %c0_i32_0 : i32, i32
  }
  func.func @transform_7(%arg0: i32) -> (i32, i32) {
    %c0_i32 = arith.constant 0 : i32
    %c0_i32_0 = arith.constant 0 : i32
    %c0_i32_1 = arith.constant 0 : i32
    return %c0_i32, %c0_i32_0 : i32, i32
  }
  func.func @transform_8(%arg0: i32) -> (i32, i32) {
    %c0_i32 = arith.constant 0 : i32
    %c0_i32_0 = arith.constant 0 : i32
    %c0_i32_1 = arith.constant 0 : i32
    return %c0_i32, %c0_i32_0 : i32, i32
  }
  func.func @transform_9(%arg0: i32) -> (i32, i32, i32) {
    %c0_i32 = arith.constant 0 : i32
    %c0_i32_0 = arith.constant 0 : i32
    %c0_i32_1 = arith.constant 0 : i32
    return %arg0, %c0_i32, %c0_i32_0 : i32, i32, i32
  }
}

</mosaic_0001>

<bundles_post_ra>
// kernel: tpu_custom_call.1
= control target key start
LH: loop header
LB: loop body
LE: loop exit
PB: predicated region body
PF: predicated region fallthrough
CT: control target
= control target key end

     0   :  { %s8339_s0 = inlined_call_operand.hbm [shape: bf16[2,32,96], index: 0, kind: input, shape index: {}]   ;;  %s8340_s1 = inlined_call_operand.hbm [shape: bf16[6,96,256], index: 1, kind: input, shape index: {}]   ;;  %s8341_s2 = inlined_call_operand.vmem [shape: f32[1,256], index: 2, kind: input, shape index: {}]   ;;  %s8342_s3 = inlined_call_operand.hbm [shape: bf16[6,256,256], index: 3, kind: input, shape index: {}]   ;;  %s8343_s4 = inlined_call_operand.hbm [shape: f32[1,256], index: 4, kind: input, shape index: {}]   ;;  %s8344_s5 = inlined_call_operand.hbm [shape: bf16[3,256,512], index: 5, kind: input, shape index: {}]   ;;  %s8345_s6 = inlined_call_operand.vmem [shape: f32[1,512], index: 6, kind: input, shape index: {}]   ;;  %s8346_s7 = inlined_call_operand.hbm [shape: bf16[512,512], index: 7, kind: input, shape index: {}]   ;;  %s8347_s8 = inlined_call_operand.vmem [shape: f32[1,128], index: 8, kind: input, shape index: {}]   ;;  %s8348_s9 = inlined_call_operand.hbm [shape: f32[2,1,128], index: 9, kind: output, shape index: {}]  }
   0x1   :  { %8353 = sst [smem:[#allocation22_spill]] %s8340_s1 }
   0x2   :  { %8354 = sst [smem:[#allocation23_spill]] %s8342_s3 }
   0x3   :  { %8355 = sst [smem:[#allocation24_spill]] %s8343_s4 }
   0x4   :  { %14 = vsyncpa [#allocation6], 0 }
   0x5   :  { %16 = vsyncpa [#allocation6 + $0x1], 0 }
   0x6   :  { %17 = vsyncpa [#allocation9], 0 }
   0x7   :  { %18 = vsyncpa [#allocation12], 0 }
   0x8   :  { %19 = vsyncpa [#allocation15], 0 }
   0x9   :  { %20 = vsyncpa [#allocation7], 0 }
   0xa   :  { %22 = vsyncpa [#allocation7 + $0x1], 0  ;;  %s7813_s30 = smov 0   ;;  %s7815_s10 = smov 0  }
   0xb   :  { %s7817_s11 = smov 0   ;;  %s7819_s12 = smov 0  }
   0xc LB: > { %s7747_s13 = smov [#allocation8]   ;;  %s7834_s15 = sadd.s32 4294967295, %s7745_s12   ;;  %s7745_s12 = sphi %s7819_s12, %s8391_s12   ;;  %s7741_s11 = sphi %s7817_s11, %s8390_s11   ;;  %s7737_s10 = sphi %s7815_s10, %s8389_s10   ;;  %s7733_s30 = sphi %s7813_s30, %s8388_s30  }
   0xd   : > { %s265_s14 = sshll.u32 %s7747_s13, 4  ;;  %p5882_p0 = scmp.ge.s32.totalorder %s7745_s12, 1  ;;  %s266_s14 = int_to_ptr.vmem [resolvable:$true] %s265_s14 }
   0xe   : > { %p8349_p1 = scmp.eq.s32.totalorder %s7834_s15, 0  ;;  %p253_p2 = scmp.lt.s32.totalorder %s7745_s12, 3 }
   0xf   : > { %s7748_s17 = smov [#allocation11]   ;;  %s7749_s20 = smov [#allocation10]  }
  0x10   : > { %p7839_p3 = pnand %p5882_p0, %p253_p2  ;;  %s295_s18 = sshll.u32 %s7748_s17, 4  ;;  %s296_s18 = int_to_ptr.vmem [resolvable:$true] %s295_s18 }
  0x11   : > { %s281_s21 = sshll.u32 %s7749_s20, 4  ;;  %s7522_s23 = scalar_lea.vmem %s266_s14, 9216  ;;  %s7852_s21 = int_to_ptr.vmem [resolvable:$true] %s281_s21 }
  0x12   : > { %s8356_s16 = scalar_select %p7839_p3, 1, 0 }
  0x13   : > { %p6545_p5 = pneg %p7839_p3  ;;  %p7523_p8 = scmp.ne.s32.totalorder %s266_s14, %s7522_s23 }
  0x14   : > { %p7530_p11 = scmp.lt.s32.totalorder %s266_s14, %s266_s14  ;;  %p7531_p12 = scmp.lt.s32.totalorder %s7522_s23, %s7522_s23 }
  0x15   : > { %p7848_p6 = pnand %p6545_p5, %p8349_p1 }
  0x16   : > { %p7532_p13 = por %p7531_p12, %p7530_p11 }
  0x17   : > { %p7856_p7 = pneg %p7848_p6 }
  0x19   : > { %p7525_p9 = pnand %p7523_p8, %p7856_p7 }
  0x1b   : > { %p7526_p10 = pneg %p7525_p9 }
  0x1d   : > { %p7533_p0 = pnand %p7532_p13, %p7526_p10 }
  0x1f   : > { %7536 = shalt.err (!%p7533_p0)
}
  0x20   : > { %s7750_s24 = smov 128   ;;  %s7751_s25 = smov 8  }
  0x21   : > { %s8359_s1 = sld [smem:[#allocation22_spill]]  ;;  %s7548_s28 = scalar_lea.vmem %s296_s18, 32 }
  0x22   : > { %p7549_p2 = scmp.ne.s32.totalorder %s296_s18, %s7548_s28  ;;  %p7556_p9 = scmp.lt.s32.totalorder %s296_s18, %s296_s18 }
  0x23   : > { %p7557_p4 = scmp.lt.s32.totalorder %s7548_s28, %s7548_s28 }
  0x24   : > { %p7551_p5 = pnand %p7549_p2, %p7856_p7 }
  0x25   : > { %p7558_p1 = por %p7557_p4, %p7556_p9 }
  0x26   : > { %p7552_p8 = pneg %p7551_p5 }
  0x27   : > { %6548 = dma.hbm_to_vmem [thread:$0]  (!%p7848_p6), %s8359_s1, 9216, %s266_s14, [#allocation9], %s7750_s24, %s7750_s24, %s7751_s25  }
  0x28   : > { %p7559_p11 = pnand %p7558_p1, %p7552_p8 }
  0x2a   : > { %7562 = shalt.err (!%p7559_p11)
}
  0x2b   : > { %s8360_s4 = sld [smem:[#allocation24_spill]]  ;;  %s7574_s14 = scalar_lea.vmem %s7852_s21, 24576 }
  0x2c   : > { %p7575_p10 = scmp.ne.s32.totalorder %s7852_s21, %s7574_s14  ;;  %p7582_p0 = scmp.lt.s32.totalorder %s7852_s21, %s7852_s21 }
  0x2d   : > { %p7583_p4 = scmp.lt.s32.totalorder %s7574_s14, %s7574_s14 }
  0x2e   : > { %p7577_p12 = pnand %p7575_p10, %p7856_p7 }
  0x2f   : > { %p7584_p1 = por %p7583_p4, %p7582_p0 }
  0x30   : > { %p7578_p13 = pneg %p7577_p12 }
  0x31   : > { %6554 = dma.hbm_to_vmem [thread:$0]  (!%p7848_p6), %s8360_s4, 32, %s296_s18, [#allocation12]  }
  0x32   : > { %p7585_p2 = pnand %p7584_p1, %p7578_p13 }
  0x34   : > { %7588 = shalt.err (!%p7585_p2)
}
  0x35   : > { %s8361_s3 = sld [smem:[#allocation23_spill]]  ;;  %s7752_s18 = smov [#allocation13]  }
  0x36   : > { %s305_s23 = sshll.u32 %s7752_s18, 4  ;;  %s306_s23 = int_to_ptr.vmem [resolvable:$true] %s305_s23 }
  0x37   : > { %s7600_s26 = scalar_lea.vmem %s306_s23, 24576  ;;  %p7608_p11 = scmp.lt.s32.totalorder %s306_s23, %s306_s23 }
  0x38   : > { %p7601_p5 = scmp.ne.s32.totalorder %s306_s23, %s7600_s26  ;;  %p7609_p10 = scmp.lt.s32.totalorder %s7600_s26, %s7600_s26 }
  0x3a   : > { %p7603_p8 = pnand %p7601_p5, %p7856_p7  ;;  %p7610_p12 = por %p7609_p10, %p7608_p11 }
  0x3b   : > { %6551 = dma.hbm_to_vmem [thread:$0]  (!%p7848_p6), %s8361_s3, 24576, %s7852_s21, [#allocation9], %s7750_s24, %s7750_s24, %s7751_s25  }
  0x3c   : > { %p7604_p9 = pneg %p7603_p8 }
  0x3e   : > { %p7611_p13 = pnand %p7610_p12, %p7604_p9 }
  0x40   : > { %7614 = shalt.err (!%p7611_p13)
}
  0x41   : > { %s7753_s27 = smov 256   ;;  %s7754_s28 = smov 16  }
  0x42   : > { %6557 = dma.hbm_to_vmem [thread:$0]  (!%p7848_p6), %s8344_s5, 24576, %s306_s23, [#allocation12], %s7753_s27, %s7753_s27, %s7754_s28  }
  0x43   : > { %s7755_s24 = smov [#allocation14]  }
  0x44   : > { %s321_s25 = sshll.u32 %s7755_s24, 4  ;;  %s322_s25 = int_to_ptr.vmem [resolvable:$true] %s321_s25 }
  0x45   : > { %s7626_s13 = scalar_lea.vmem %s322_s25, 16384  ;;  %p7634_p2 = scmp.lt.s32.totalorder %s322_s25, %s322_s25 }
  0x46   : > { %p7627_p0 = scmp.ne.s32.totalorder %s322_s25, %s7626_s13  ;;  %p7635_p5 = scmp.lt.s32.totalorder %s7626_s13, %s7626_s13 }
  0x48   : > { %p7629_p4 = pnand %p7627_p0, %p7856_p7  ;;  %p7636_p8 = por %p7635_p5, %p7634_p2 }
  0x4a   : > { %p7630_p1 = pneg %p7629_p4 }
  0x4c   : > { %p7637_p9 = pnand %p7636_p8, %p7630_p1 }
  0x4e   : > { %7640 = shalt.err (!%p7637_p9)
}
  0x4f   : > { %6560 = dma.hbm_to_vmem [thread:$0]  (!%p7848_p6), %s8346_s7, 16384, %s322_s25, [#allocation15], %s7753_s27, %s7753_s27, %s7754_s28  }
  0x50   : > { %s5881_s22 = sadd.s32 4294967294, %s7745_s12   ;;  %s7902_s19 = sadd.s32 1, %s7745_s12  }
  0x51   : > { %s35_s20 = sadd.s32 1, %s7741_s11  ;;  %s32_s18 = ssub.s32 %s7745_s12, %s7902_s19 }
  0x52   : > { %p42_p7 = scmp.ne.s32.totalorder %s7741_s11, %s7737_s10  ;;  %p33_p11 = scmp.eq.s32.totalorder %s32_s18, 0 }
  0x53   : > { %p43_p10 = scmp.eq.s32.totalorder %s7745_s12, 0  ;;  %p48_p12 = scmp.ne.s32.totalorder %s7737_s10, %s7733_s30 }
  0x54   : > { %p240_p13 = scmp.eq.s32.totalorder %s7834_s15, 1  ;;  %p8362_p4 = scmp.eq.s32.totalorder %s7834_s15, 0 }
  0x55   : > { %s7914_s23 = scalar_select %p33_p11, %s7741_s11, %s35_s20  }
  0x56   : > { %p44_p0 = por %p43_p10, %p42_p7  ;;  %p7918_p1 = por %p8362_p4, %p48_p12 }
  0x57   : > { %p7922_p6 = por %p240_p13, %p42_p7  ;;  %p246_p2 = scmp.eq.s32.totalorder %s5881_s22, 1 }
  0x58   : > { %s8363_s26 = scalar_select %p7918_p1, 1, 0 }
  0x59   : > { %s8364_s27 = scalar_select %p7922_p6, 1, 0 }
  0x5a   : > { %p6574_p5 = scmp.lt.s32.totalorder %s7745_s12, 2  ;;  %s338_s28 = sand.u32 1, %s7741_s11  }
  0x5b   : > { %p7928_p8 = por %p246_p2, %p48_p12  ;;  %s5889_s21 = sshll.u32 %s338_s28, 4 }
  0x5c   : > { %s6517_s24 = sshll.u32 %s7745_s12, 8  ;;  %s342_s17 = scalar_lea.vmem [#allocation5], %s5889_s21 }
  0x5d   : > { %s8365_s29 = scalar_select %p7928_p8, 1, 0 }
  0x5e   : > { %s7936_s14 = scalar_lea.hbm %s8339_s0, %s6517_s24  ;;  %s349_s20 = sshll.u32 %s342_s17, 4  ;;  %s7942_s20 = int_to_ptr.vmem [resolvable:$true] %s349_s20 }
  0x5f   : > { %p7938_p9 = pnand %p6574_p5, %p44_p0  ;;  %s7944_s18 = scalar_lea.sflag [#allocation6], %s338_s28 }
  0x60   : > { %s7641_s1 = scalar_lea.hbm %s7936_s14, 256  ;;  %s7646_s21 = scalar_lea.hbm %s8339_s0, 512 }
  0x61   : > { %p7642_p7 = scmp.ne.s32.totalorder %s7936_s14, %s7641_s1  ;;  %p7643_p11 = pneg %p7938_p9 }
  0x62   : > { %p7647_p13 = scmp.lt.s32.totalorder %s7936_s14, %s8339_s0  ;;  %p7648_p0 = scmp.lt.s32.totalorder %s7646_s21, %s7641_s1 }
  0x63   : > { %p7644_p10 = pnand %p7643_p11, %p7642_p7 }
  0x64   : > { %p7649_p4 = por %p7648_p0, %p7647_p13 }
  0x65   : > { %p7645_p12 = pneg %p7644_p10 }
  0x67   : > { %p7650_p2 = pnand %p7649_p4, %p7645_p12 }
  0x69   : > { %7653 = shalt.err (!%p7650_p2)
}
  0x6a   : > { %s7654_s28 = scalar_lea.vmem %s7942_s20, 256  ;;  %s7756_s3 = smov [#allocation5]  }
  0x6b   : > { %p7655_p5 = scmp.ne.s32.totalorder %s7942_s20, %s7654_s28  ;;  %s7659_s4 = sshll.u32 %s7756_s3, 4  ;;  %s7660_s4 = int_to_ptr.vmem [resolvable:$false] %s7659_s4 }
  0x6c   : > { %s7661_s24 = scalar_lea.vmem %s7660_s4, 512  ;;  %p7662_p10 = scmp.lt.s32.totalorder %s7942_s20, %s7660_s4 }
  0x6d   : > { %p7657_p8 = pnand %p7655_p5, %p7643_p11  ;;  %p7663_p6 = scmp.lt.s32.totalorder %s7661_s24, %s7654_s28 }
  0x6f   : > { %p7658_p7 = pneg %p7657_p8  ;;  %p7664_p1 = por %p7663_p6, %p7662_p10 }
  0x71   : > { %p7665_p3 = pnand %p7664_p1, %p7658_p7 }
  0x73   : > { %7668 = shalt.err (!%p7665_p3)
}
  0x74   : > { %s7757_s1 = smov 64   ;;  %s7758_s25 = smov 4  }
  0x75   : > { %6564 = dma.hbm_to_vmem [thread:$0]  (!%p7938_p9), %s7936_s14, 256, %s7942_s20, %s7944_s18, %s7757_s1, %s7757_s1, %s7758_s25  }
  0x76   : > { %p8367_p11 = scmp.ne.s32.totalorder %s8356_s16, 0 }
  0x77   : > { %s7968_s3 = sand.u32 (!%p8367_p11), 1, %s7737_s10   ;;  %p8368_p3 = scmp.ne.s32.totalorder (!%p8367_p11), %s8363_s26, 0 }
  0x78   : > { %361 = sbr.rel (%p8367_p11) target bundleno = 1470 (0x5be), region = 56  ;;  %s5893_s4 = sshll.u32 (!%p8367_p11), %s7968_s3, 4 }
  0x79   : > { %s364_s21 = scalar_lea.sflag (!%p8367_p11), [#allocation6], %s7968_s3  ;;  %s7972_s13 = scalar_lea.vmem (!%p8367_p11), [#allocation5], %s5893_s4 }
  0x7d   : > { %7712 = dma.done.wait (%p8368_p3), %s364_s21, 256  }
  0x7e   : > { %7714 = vsyncadd (%p8368_p3), %s364_s21, 4294967040  ;;  %p8369_p1 = scmp.eq.s32.totalorder %s7834_s15, 0 }
  0x80   : > { %7716 = dma.done.wait (%p8369_p1), [#allocation9], 33792   ;;  %p8370_p6 = pmov %p8369_p1 }
  0x81   : > { %p8371_p8 = pmov %p8369_p1 }
  0x82   : > { %7718 = vsyncadd (%p8370_p6), [#allocation9], 4294933504 }
  0x83   : > { %7720 = dma.done.wait (%p8371_p8), [#allocation12], 24608   ;;  %p8372_p9 = pmov %p8369_p1 }
  0x84   : > { %p8373_p12 = pmov %p8369_p1 }
  0x85   : > { %7722 = vsyncadd (%p8372_p9), [#allocation12], 4294942688 }
  0x86   : > { %7724 = dma.done.wait (%p8373_p12), [#allocation15], 16384   ;;  %p8374_p13 = pmov %p8369_p1 }
  0x87   : > { %v7759_v0 = vmov 0   ;;  %v6627_v1 = vld [vmem:[#allocation8 + $0x114] ss:$8 sps:$4 sm:$0xff]   ;;  %v6631_v3 = vld [vmem:[#allocation8 + $0x110] ss:$8 sps:$4 sm:$0xff]   ;;  %vm422_vm0 = vcmask 778240  }
  0x88   : > { %7726 = vsyncadd (%p8374_p13), [#allocation15], 4294950912  ;;  %806 = vmatprep.mubr.bf16.mxu1 %v7759_v0  ;;  %689 = vmatprep.mubr.bf16.mxu0 %v7759_v0  ;;  %v6629_v2 = vld [vmem:[#allocation8 + $0x54] ss:$8 sps:$4 sm:$0xff]   ;;  %v6632_v4 = vld [vmem:[#allocation8 + $0x50] ss:$8 sps:$4 sm:$0xff]  }
  0x89   : > { %661 = vmatprep.subr.bf16.mxu0 %v6627_v1  ;;  %778 = vmatprep.subr.bf16.mxu1 %v6629_v2  ;;  %v6633_v5 = vld [vmem:[#allocation8 + $0x104] ss:$8 sps:$4 sm:$0xff]   ;;  %v6637_v7 = vld [vmem:[#allocation8 + $0x100] ss:$8 sps:$4 sm:$0xff]   ;;  %v6639_v9 = vld [vmem:[#allocation8 + $0xf4] ss:$8 sps:$4 sm:$0xff]  }
  0x8a   : > { %662 = vmatpush1.bf16.msra.mxu0 %v6631_v3  ;;  %779 = vmatpush1.bf16.msra.mxu1 %v6632_v4  ;;  %v6635_v6 = vld [vmem:[#allocation8 + $0x44] ss:$8 sps:$4 sm:$0xff]   ;;  %v6638_v8 = vld [vmem:[#allocation8 + $0x40] ss:$8 sps:$4 sm:$0xff]   ;;  %vm423_vm1 = vsmask.f32 256 }
  0x8b   : > { %663 = vmatprep.subr.bf16.mxu0 %v6633_v5  ;;  %780 = vmatprep.subr.bf16.mxu1 %v6635_v6  ;;  %v6641_v10 = vld [vmem:[#allocation8 + $0x34] ss:$8 sps:$4 sm:$0xff]   ;;  %v6643_v11 = vld [vmem:[#allocation8 + $0xf0] ss:$8 sps:$4 sm:$0xff]   ;;  %v6645_v13 = vld [vmem:[#allocation8 + $0xe4] ss:$8 sps:$4 sm:$0xff]  }
  0x8c   : > { %v6644_v12 = vld [vmem:[#allocation8 + $0x30] ss:$8 sps:$4 sm:$0xff]   ;;  %v6647_v14 = vld [vmem:[#allocation8 + $0x24] ss:$8 sps:$4 sm:$0xff]   ;;  %vm7994_vm2 = vmand %vm422_vm0, %vm423_vm1  ;;  %vm428_vm3 = vsmask.f32 7938 }
  0x8d   : > { %v6649_v16 = vld [vmem:[#allocation8 + $0xe0] ss:$8 sps:$4 sm:$0xff]   ;;  %v6651_v18 = vld [vmem:[#allocation8 + $0xd4] ss:$8 sps:$4 sm:$0xff]   ;;  %vm459_vm4 = vsmask.f32 4368  ;;  %vm429_vm8 = vmand %vm422_vm0, %vm428_vm3 }
  0x8e   : > { %664 = vmatpush1.bf16.msra.mxu0 %v6637_v7  ;;  %781 = vmatpush1.bf16.msra.mxu1 %v6638_v8  ;;  %v6650_v17 = vld [vmem:[#allocation8 + $0x20] ss:$8 sps:$4 sm:$0xff]   ;;  %v6653_v19 = vld [vmem:[#allocation8 + $0x14] ss:$8 sps:$4 sm:$0xff]   ;;  %v6655_v20 = vld [vmem:[#allocation8 + $0xd0] ss:$8 sps:$4 sm:$0xff]  }
  0x8f   : > { %665 = vmatprep.subr.bf16.mxu0 %v6639_v9  ;;  %782 = vmatprep.subr.bf16.mxu1 %v6641_v10  ;;  %vm501_vm5 = vcmask 781312   ;;  %v6656_v21 = vld [vmem:[#allocation8 + $0x10] ss:$8 sps:$4 sm:$0xff]   ;;  %v6657_v22 = vld [vmem:[#allocation8 + $0xc4] ss:$8 sps:$4 sm:$0xff]   ;;  %vm8006_vm6 = vmor %vm423_vm1, %vm459_vm4  ;;  %vm650_vm9 = vcmask 785408  }
  0x90   : > { %v6659_v23 = vld [vmem:[#allocation8 + $0x4] ss:$8 sps:$4 sm:$0xff]   ;;  %v455_v25 = vld [vmem:[%s7972_s13] sm:$0xf]  ;;  %v457_v28 = vld [vmem:[%s7972_s13 + $0x8] sm:$0xf] }
  0x91   : > { %v425_v24 = vld [vmem:[#allocation2] sm:$0x1]  ;;  %v458_v29 = vld [vmem:[%s7972_s13 + $0xc] sm:$0xf]  ;;  %v462_v30 = vshrl.u32 %v455_v25, 16  ;;  %v465_v31 = vshll.u32 %v455_v25, 16  ;;  %vm502_vm7 = vmand %vm501_vm5, %vm428_vm3 }
  0x92   : > { %666 = vmatpush1.bf16.msra.mxu0 %v6643_v11  ;;  %783 = vmatpush1.bf16.msra.mxu1 %v6644_v12  ;;  %v456_v26 = vld [vmem:[%s7972_s13 + $0x4] sm:$0xf]  ;;  %v426_v27 = vsel %vm7994_vm2, 0, %v425_v24  ;;  %v479_v34 = vshrl.u32 %v457_v28, 16  ;;  %v6661_v35 = vld [vmem:[#allocation8 + $0xc0] ss:$8 sps:$4 sm:$0xff]  }
  0x93   : > { %667 = vmatprep.subr.bf16.mxu0 %v6645_v13  ;;  %784 = vmatprep.subr.bf16.mxu1 %v6647_v14  ;;  %427 = vst [vmem:[#allocation2] sm:$0x1] %v426_v27  ;;  %v470_v32 = vshrl.u32 %v456_v26, 16  ;;  %v473_v33 = vshll.u32 %v456_v26, 16  ;;  %v464_v36 = vrot.slane %v462_v30, 7  ;;  %v482_v37 = vshll.u32 %v457_v28, 16 }
  0x94   : > { %v488_v38 = vshrl.u32 %v458_v29, 16  ;;  %v491_v39 = vshll.u32 %v458_v29, 16  ;;  %v6662_v40 = vld [vmem:[#allocation8] ss:$8 sps:$4 sm:$0xff]   ;;  %v481_v42 = vrot.slane %v479_v34, 7  ;;  %vm1083_vm11 = vcmask 1046528  }
  0x95   : > { %v472_v41 = vrot.slane %v470_v32, 7  ;;  %v467_v44 = vor.u32 %v465_v31, %v464_v36  ;;  %v468_v45 = vrot.slane %v464_v36, 4  ;;  %v6667_v47 = vld [vmem:[#allocation8 + $0x174] ss:$8 sps:$4 sm:$0xff]   ;;  %v6668_v1 = vld [vmem:[#allocation8 + $0xb0] ss:$8 sps:$4 sm:$0xff]  }
  0x96   : > { %668 = vmatpush1.bf16.msra.mxu0 %v6649_v16  ;;  %785 = vmatpush1.bf16.msra.mxu1 %v6650_v17  ;;  %v490_v46 = vrot.slane %v488_v38, 7  ;;  %v6670_v48 = vld [vmem:[#allocation8 + $0xb4] ss:$8 sps:$4 sm:$0xff]   ;;  %v484_v51 = vor.u32 %v482_v37, %v481_v42  ;;  %v486_v52 = vrot.slane %v481_v42, 4  ;;  %v6677_v5 = vld [vmem:[#allocation8 + $0xa4] ss:$8 sps:$4 sm:$0xff]  }
  0x97   : > { %669 = vmatprep.subr.bf16.mxu0 %v6651_v18  ;;  %786 = vmatprep.subr.bf16.mxu1 %v6653_v19  ;;  %v475_v49 = vor.u32 %v473_v33, %v472_v41  ;;  %v477_v50 = vrot.slane %v472_v41, 4  ;;  %v430_v59 = vld [vmem:[#allocation2 + $0x10] sm:$0x1]  ;;  %v6675_v9 = vld [vmem:[#allocation8 + $0xa0] ss:$8 sps:$4 sm:$0xff]   ;;  %vm433_vm12 = vcmask 1040384  }
  0x98   : > { %v493_v53 = vor.u32 %v491_v39, %v490_v46  ;;  %v431_v60 = vsel %vm429_vm8, 0, %v430_v59  ;;  %v495_v2 = vrot.slane %v490_v46, 4  ;;  %v6683_v13 = vld [vmem:[#allocation8 + $0x94] ss:$8 sps:$4 sm:$0xff]   ;;  %vm569_vm10 = vsmask.f32 7424  ;;  %vm434_vm15 = vmand %vm433_vm12, %vm423_vm1 }
  0x99   : > { %v476_v54 = vsel %vm8006_vm6, %v468_v45, %v475_v49  ;;  %v485_v55 = vsel %vm8006_vm6, %v477_v50, %v484_v51  ;;  %432 = vst [vmem:[#allocation2 + $0x10] sm:$0x1] %v431_v60  ;;  %v6665_v14 = vld [vmem:[#allocation8 + $0x170] ss:$8 sps:$4 sm:$0xff]   ;;  %v6674_v17 = vld [vmem:[#allocation8 + $0x164] ss:$8 sps:$4 sm:$0xff]   ;;  %vm442_vm1 = vmand %vm433_vm12, %vm428_vm3 }
  0x9a   : > { %670 = vmatpush1.bf16.msra.mxu0 %v6655_v20  ;;  %787 = vmatpush1.bf16.msra.mxu1 %v6656_v21  ;;  %v494_v56 = vsel %vm8006_vm6, %v486_v52, %v493_v53  ;;  %v503_v57 = vld [vmem:[#allocation2] sm:$0xf]  ;;  %507 = vst.msk [vmem:[#allocation2 + $0x4] sm:$0xf] %vm501_vm5, %v476_v54  ;;  %508 = vst.msk [vmem:[#allocation2 + $0x8] sm:$0xf] %vm501_vm5, %v485_v55 }
  0x9b   : > { %671 = vmatprep.subr.bf16.mxu0 %v6657_v22  ;;  %788 = vmatprep.subr.bf16.mxu1 %v6659_v23  ;;  %v504_v58 = vsel %vm502_vm7, %v467_v44, %v503_v57  ;;  %509 = vst.msk [vmem:[#allocation2 + $0xc] sm:$0xf] %vm501_vm5, %v494_v56  ;;  %v6681_v18 = vld [vmem:[#allocation8 + $0x90] ss:$8 sps:$4 sm:$0xff]   ;;  %v6672_v20 = vld [vmem:[#allocation8 + $0x160] ss:$8 sps:$4 sm:$0xff]  }
  0x9c   : > { %505 = vst [vmem:[#allocation2] sm:$0xf] %v504_v58  ;;  %v6690_v21 = vld [vmem:[#allocation8 + $0x84] ss:$8 sps:$4 sm:$0xff]   ;;  %v6680_v15 = vld [vmem:[#allocation8 + $0x154] ss:$8 sps:$4 sm:$0xff]  }
  0x9d   : > { %v6688_v23 = vld [vmem:[#allocation8 + $0x80] ss:$8 sps:$4 sm:$0xff]   ;;  %v6696_v25 = vld [vmem:[#allocation8 + $0x74] ss:$8 sps:$4 sm:$0xff]   ;;  %v6678_v28 = vld [vmem:[#allocation8 + $0x150] ss:$8 sps:$4 sm:$0xff]  }
  0x9e   : > { %672 = vmatpush1.bf16.msra.mxu0 %v6661_v35  ;;  %789 = vmatpush1.bf16.msra.mxu1 %v6662_v40  ;;  %v6687_v30 = vld [vmem:[#allocation8 + $0x144] ss:$8 sps:$4 sm:$0xff]   ;;  %v6694_v31 = vld [vmem:[#allocation8 + $0x70] ss:$8 sps:$4 sm:$0xff]   ;;  %v6685_v34 = vld [vmem:[#allocation8 + $0x140] ss:$8 sps:$4 sm:$0xff]  }
  0x9f   : > { %904 = vmatprep.subr.bf16.mxu0 %v6667_v47  ;;  %1017 = vmatprep.subr.bf16.mxu1 %v6670_v48  ;;  %v6702_v33 = vld [vmem:[#allocation8 + $0x64] ss:$8 sps:$4 sm:$0xff]   ;;  %v6693_v35 = vld [vmem:[#allocation8 + $0x134] ss:$8 sps:$4 sm:$0xff]   ;;  %v6700_v36 = vld [vmem:[#allocation8 + $0x60] ss:$8 sps:$4 sm:$0xff]  }
  0xa0   : > { %v510_v6 = vld [vmem:[#allocation2 + $0x10] sm:$0x1]  ;;  %v6691_v37 = vld [vmem:[#allocation8 + $0x130] ss:$8 sps:$4 sm:$0xff]   ;;  %v6699_v39 = vld [vmem:[#allocation8 + $0x124] ss:$8 sps:$4 sm:$0xff]  }
  0xa1   : > { %v8023_v61 = vld [vmem:[#allocation2 + $0x4] sm:$0xf]  ;;  %v511_v10 = vsel %vm7994_vm2, %v495_v2, %v510_v6  ;;  %v6708_v38 = vld [vmem:[#allocation8 + $0x234] ss:$8 sps:$4 sm:$0xff]   ;;  %v6706_v40 = vld [vmem:[#allocation8 + $0x230] ss:$8 sps:$4 sm:$0xff]  }
  0xa2   : > { %v8025_v62 = vld [vmem:[#allocation2 + $0x8] sm:$0xff]   ;;  %512 = vst [vmem:[#allocation2 + $0x10] sm:$0x1] %v511_v10  ;;  %v6697_v42 = vld [vmem:[#allocation8 + $0x120] ss:$8 sps:$4 sm:$0xff]   ;;  %vm435_vm13 = vcmask 1044484  }
  0xa3   : > { %v513_v63 = vld [vmem:[#allocation2] sm:$0xf]  ;;  %v578_v4 = vshll.u32 %v8025_v62, 16  ;;  %v582_v22 = vshrl.u32 %v8025_v62, 16  ;;  %v6705_v44 = vld [vmem:[#allocation8 + $0x1d4] ss:$8 sps:$4 sm:$0xff]  }
  0xa4   : > { %v8028_v3 = vcombine.low %v513_v63, %v8023_v61  ;;  %v6714_v41 = vld [vmem:[#allocation8 + $0x224] ss:$8 sps:$4 sm:$0xff]   ;;  %v6712_v45 = vld [vmem:[#allocation8 + $0x220] ss:$8 sps:$4 sm:$0xff]   ;;  %v6720_v46 = vld [vmem:[#allocation8 + $0x214] ss:$8 sps:$4 sm:$0xff]  }
  0xa5   : > { %v580_v12 = vrot.slane %v578_v4, 1  ;;  %v6703_v47 = vld [vmem:[#allocation8 + $0x1d0] ss:$8 sps:$4 sm:$0xff]   ;;  %v6711_v48 = vld [vmem:[#allocation8 + $0x1c4] ss:$8 sps:$4 sm:$0xff]   ;;  %vm1596_vm8 = vcmask 1043456  }
  0xa6   : > { %5928 = vmatmul.mubr.msk.bf16.vlgmr.msra.gmra.mxu1 %vm650_vm9, %v8028_v3  ;;  %v571_v7 = vshrl.u32 %v8028_v3, 16  ;;  %v573_v8 = vshll.u32 %v8028_v3, 16  ;;  %v6718_v49 = vld [vmem:[#allocation8 + $0x210] ss:$8 sps:$4 sm:$0xff]   ;;  %v6726_v50 = vld [vmem:[#allocation8 + $0x204] ss:$8 sps:$4 sm:$0xff]   ;;  %vm8182_vm12 = vmand %vm1596_vm8, %vm428_vm3 }
  0xa7   : > { %1018 = vmatpush1.bf16.msra.mxu1 %v6668_v1  ;;  %816 = vmatprep.mubr.bf16.mxu1 %v7759_v0  ;;  %v584_v26 = vor.u32 %v582_v22, %v580_v12  ;;  %v6709_v51 = vld [vmem:[#allocation8 + $0x1c0] ss:$8 sps:$4 sm:$0xff]   ;;  %v6717_v52 = vld [vmem:[#allocation8 + $0x1b4] ss:$8 sps:$4 sm:$0xff]   ;;  %v1066_v54 = vld [vmem:[#allocation2] sm:$0xe] }
  0xa8   : > { %v575_v11 = vrot.slane %v573_v8, 1  ;;  %1019 = vmatprep.subr.bf16.mxu1 %v6677_v5  ;;  %v6724_v53 = vld [vmem:[#allocation8 + $0x200] ss:$8 sps:$4 sm:$0xff]   ;;  %v6732_v55 = vld [vmem:[#allocation8 + $0x1f4] ss:$8 sps:$4 sm:$0xff]   ;;  %v5958_v60 = vcombine.low %v1066_v54, %v8023_v61  ;;  %v1085_v5 = vrot.slane %v8025_v62, 1 }
  0xa9   : > { %v8045_v24 = vld [vmem:[#allocation2 + $0x10] ss:$0 sps:$4 sm:$0x11]   ;;  %v6715_v56 = vld [vmem:[#allocation8 + $0x1b0] ss:$8 sps:$4 sm:$0xff]   ;;  %s6514_s17 = sshll.u32 %s7834_s15, 4 }
  0xaa   : > { %v576_v16 = vor.u32 %v575_v11, %v571_v7  ;;  %v586_v27 = vshll.u32 %v8045_v24, 16  ;;  %v6723_v57 = vld [vmem:[#allocation8 + $0x1a4] ss:$8 sps:$4 sm:$0xff]   ;;  %v6730_v58 = vld [vmem:[#allocation8 + $0x1f0] ss:$8 sps:$4 sm:$0xff]   ;;  %v1087_v8 = vrot.slane %v8045_v24, 1  ;;  %s5765_s4 = scalar_lea.hbm %s8348_s9, %s6514_s17 }
  0xab   : > { %1020 = vmatpush1.bf16.msra.mxu1 %v6675_v9  ;;  %v6738_v59 = vld [vmem:[#allocation8 + $0x1e4] ss:$8 sps:$4 sm:$0xff]   ;;  %v6721_v63 = vld [vmem:[#allocation8 + $0x1a0] ss:$8 sps:$4 sm:$0xff]   ;;  %v6729_v1 = vld [vmem:[#allocation8 + $0x194] ss:$8 sps:$4 sm:$0xff]  }
  0xac   : > { %v8039_v19 = vsel %vm569_vm10, %v576_v16, %v580_v12  ;;  %1021 = vmatprep.subr.bf16.mxu1 %v6683_v13  ;;  %v588_v29 = vrot.slane %v586_v27, 1  ;;  %v6736_v2 = vld [vmem:[#allocation8 + $0x1e0] ss:$8 sps:$4 sm:$0xff]   ;;  %v6727_v4 = vld [vmem:[#allocation8 + $0x190] ss:$8 sps:$4 sm:$0xff]   ;;  %s420_s28 = scalar_lea.vmem [#allocation16], %s7968_s3 }
  0xad   : > { %5914 = vmatmul.mubr.msk.bf16.vlgmr.msra.gmra.mxu0 %vm650_vm9, %v8039_v19  ;;  %v6735_v6 = vld [vmem:[#allocation8 + $0x184] ss:$8 sps:$4 sm:$0xff]   ;;  %v6733_v61 = vld [vmem:[#allocation8 + $0x180] ss:$8 sps:$4 sm:$0xff]   ;;  %v6741_v9 = vld [vmem:[#allocation10 + $0x74] ss:$8 sps:$4 sm:$0xff]  }
  0xae   : > { %905 = vmatpush1.bf16.msra.mxu0 %v6665_v14  ;;  %699 = vmatprep.mubr.bf16.mxu0 %v7759_v0  ;;  %v589_v32 = vsel %vm569_vm10, %v584_v26, %v588_v29  ;;  %v6739_v10 = vld [vmem:[#allocation10 + $0x70] ss:$8 sps:$4 sm:$0xff]   ;;  %v6744_v11 = vld [vmem:[#allocation10 + $0x64] ss:$8 sps:$4 sm:$0xff]   ;;  %v6742_v12 = vld [vmem:[#allocation10 + $0x60] ss:$8 sps:$4 sm:$0xff]  }
  0xaf   : > { %906 = vmatprep.subr.bf16.mxu0 %v6674_v17  ;;  %1022 = vmatpush1.bf16.msra.mxu1 %v6681_v18  ;;  %v6750_v13 = vld [vmem:[#allocation10 + $0x54] ss:$8 sps:$4 sm:$0xff]   ;;  %v6745_v14 = vld [vmem:[#allocation10 + $0x270] ss:$8 sps:$4 sm:$0xff]   ;;  %v6754_v18 = vld [vmem:[#allocation10 + $0x40] ss:$8 sps:$4 sm:$0xff]  }
  0xb0   : > { %5929 = vmatmul.mubr.msk.bf16.gmra.mxu1 %vm650_vm9, %v8025_v62  ;;  %1023 = vmatprep.subr.bf16.mxu1 %v6690_v21  ;;  %v6747_v16 = vld [vmem:[#allocation10 + $0x274] ss:$8 sps:$4 sm:$0xff]   ;;  %v6748_v17 = vld [vmem:[#allocation10 + $0x50] ss:$8 sps:$4 sm:$0xff]   ;;  %v6751_v21 = vld [vmem:[#allocation10 + $0x260] ss:$8 sps:$4 sm:$0xff]  }
  0xb1   : > { %1045 = vmatprep.mubr.bf16.mxu1 %v7759_v0  ;;  %v6759_v22 = vld [vmem:[#allocation10 + $0x254] ss:$8 sps:$4 sm:$0xff]   ;;  %v6757_v24 = vld [vmem:[#allocation10 + $0x250] ss:$8 sps:$4 sm:$0xff]   ;;  %v6765_v27 = vld [vmem:[#allocation10 + $0x244] ss:$8 sps:$4 sm:$0xff]  }
  0xb2   : > { %907 = vmatpush1.bf16.msra.mxu0 %v6672_v20  ;;  %v6762_v20 = vld [vmem:[#allocation10 + $0x34] ss:$8 sps:$4 sm:$0xff]   ;;  %v6763_v29 = vld [vmem:[#allocation10 + $0x240] ss:$8 sps:$4 sm:$0xff]   ;;  %vm436_vm14 = vsmask.f32 4352 }
  0xb3   : > { %908 = vmatprep.subr.bf16.mxu0 %v6680_v15  ;;  %1024 = vmatpush1.bf16.msra.mxu1 %v6688_v23  ;;  %v6760_v15 = vld [vmem:[#allocation10 + $0x30] ss:$8 sps:$4 sm:$0xff]   ;;  %v6768_v23 = vld [vmem:[#allocation10 + $0x24] ss:$8 sps:$4 sm:$0xff]   ;;  %v6774_v26 = vld [vmem:[#allocation10 + $0x14] ss:$8 sps:$4 sm:$0xff]  }
  0xb4   : > { %1025 = vmatprep.subr.bf16.mxu1 %v6696_v25  ;;  %v6766_v25 = vld [vmem:[#allocation10 + $0x20] ss:$8 sps:$4 sm:$0xff]   ;;  %vm437_vm0 = vmand %vm435_vm13, %vm436_vm14  ;;  %vm443_vm2 = vsmask.f32 7954  ;;  %v6804_v54 = vld [vmem:[#allocation10 + $0xc4] ss:$8 sps:$4 sm:$0xff]  }
  0xb5   : > { %5915 = vmatmul.mubr.msk.bf16.gmra.mxu0 %vm650_vm9, %v589_v32  ;;  %vm8079_vm4 = vmor %vm437_vm0, %vm434_vm15  ;;  %v6838_v43 = vld [vmem:[#allocation10 + $0x160] ss:$8 sps:$4 sm:$0xff]   ;;  %s5767_s24 = sshll.u32 %s420_s28, 4  ;;  %s5755_s21 = scalar_lea.sflag [#allocation7], %s7968_s3  ;;  %s5768_s24 = int_to_ptr.vmem [resolvable:$true] %s5767_s24 }
  0xb6   : > { %909 = vmatpush1.bf16.msra.mxu0 %v6678_v28  ;;  %932 = vmatprep.mubr.bf16.mxu0 %v7759_v0  ;;  %v6772_v28 = vld [vmem:[#allocation10 + $0x10] ss:$8 sps:$4 sm:$0xff]   ;;  %vm444_vm5 = vmand %vm435_vm13, %vm443_vm2  ;;  %s7669_s13 = scalar_lea.vmem %s5768_s24, 16  ;;  %p8385_p4 = scmp.ne.s32.totalorder %s8364_s27, 0 }
  0xb7   : > { %910 = vmatprep.subr.bf16.mxu0 %v6687_v30  ;;  %1026 = vmatpush1.bf16.msra.mxu1 %v6694_v31  ;;  %v6780_v30 = vld [vmem:[#allocation10 + $0x4] ss:$8 sps:$4 sm:$0xff]   ;;  %v6771_v31 = vld [vmem:[#allocation10 + $0x234] ss:$8 sps:$4 sm:$0xff]   ;;  %vm445_vm7 = vmor %vm444_vm5, %vm442_vm1  ;;  %p7670_p0 = scmp.ne.s32.totalorder %s5768_s24, %s7669_s13  ;;  %s7762_s16 = smov [#allocation16]  }
  0xb8   : > { %1027 = vmatprep.subr.bf16.mxu1 %v6702_v33  ;;  %v6769_v33 = vld [vmem:[#allocation10 + $0x230] ss:$8 sps:$4 sm:$0xff]   ;;  %s7673_s26 = sshll.u32 %s7762_s16, 4  ;;  %s7674_s26 = int_to_ptr.vmem [resolvable:$false] %s7673_s26 }
  0xb9   : > { %p7671_p2 = pnand %p7670_p0, %p8385_p4  ;;  %s7675_s15 = scalar_lea.vmem %s7674_s26, 32 }
  0xba   : > { %911 = vmatpush1.bf16.msra.mxu0 %v6685_v34  ;;  %v6786_v34 = vld [vmem:[#allocation10 + $0xf4] ss:$8 sps:$4 sm:$0xff]   ;;  %p7676_p7 = scmp.lt.s32.totalorder %s5768_s24, %s7674_s26  ;;  %p7677_p10 = scmp.lt.s32.totalorder %s7675_s15, %s7669_s13 }
  0xbb   : > { %912 = vmatprep.subr.bf16.mxu0 %v6693_v35  ;;  %1028 = vmatpush1.bf16.msra.mxu1 %v6700_v36  ;;  %v6777_v35 = vld [vmem:[#allocation10 + $0x224] ss:$8 sps:$4 sm:$0xff]   ;;  %v6784_v36 = vld [vmem:[#allocation10 + $0xf0] ss:$8 sps:$4 sm:$0xff]   ;;  %p7672_p5 = pneg %p7671_p2 }
  0xbc   : > { %1293 = vmatprep.subr.bf16.mxu1 %v6708_v38  ;;  %v6792_v38 = vld [vmem:[#allocation10 + $0xe4] ss:$8 sps:$4 sm:$0xff]   ;;  %p7678_p11 = por %p7677_p10, %p7676_p7 }
  0xbe   : > { %913 = vmatpush1.bf16.msra.mxu0 %v6691_v37  ;;  %5956 = vmatmul.mubr.msk.bf16.vlgmr.msra.gmra.mxu1 %vm650_vm9, %v8028_v3  ;;  %v1084_v3 = vrot.slane %v5958_v60, 1  ;;  %v6775_v37 = vld [vmem:[#allocation10 + $0x220] ss:$8 sps:$4 sm:$0xff]   ;;  %v6810_v60 = vld [vmem:[#allocation10 + $0xb4] ss:$8 sps:$4 sm:$0xff]   ;;  %p7679_p3 = pnand %p7678_p11, %p7672_p5 }
  0xbf   : > { %914 = vmatprep.subr.bf16.mxu0 %v6699_v39  ;;  %1294 = vmatpush1.bf16.msra.mxu1 %v6706_v40  ;;  %v6783_v39 = vld [vmem:[#allocation10 + $0x214] ss:$8 sps:$4 sm:$0xff]   ;;  %v6790_v40 = vld [vmem:[#allocation10 + $0xe0] ss:$8 sps:$4 sm:$0xff]  }
  0xc0   : > { %1055 = vmatprep.mubr.bf16.mxu1 %v7759_v0  ;;  %1295 = vmatprep.subr.bf16.mxu1 %v6714_v41  ;;  %v1086_v7 = vsel %vm1083_vm11, %v1084_v3, %v1085_v5  ;;  %v439_v41 = vld [vmem:[#allocation3 + $0x8] sm:$0x11] }
  0xc1   : > { %v6816_v3 = vld [vmem:[#allocation10 + $0xa4] ss:$8 sps:$4 sm:$0xff]  }
  0xc2   : > { %915 = vmatpush1.bf16.msra.mxu0 %v6697_v42  ;;  %v449_v42 = vld [vmem:[#allocation4 + $0x8] sm:$0x11] }
  0xc3   : > { %1159 = vmatprep.subr.bf16.mxu0 %v6705_v44  ;;  %1296 = vmatpush1.bf16.msra.mxu1 %v6712_v45  ;;  %v446_v44 = vld [vmem:[#allocation3] sm:$0x11]  ;;  %v452_v45 = vld [vmem:[#allocation4] sm:$0x11] }
  0xc4   : > { %1297 = vmatprep.subr.bf16.mxu1 %v6720_v46  ;;  %v6781_v46 = vld [vmem:[#allocation10 + $0x210] ss:$8 sps:$4 sm:$0xff]  }
  0xc5   : > { %5942 = vmatmul.mubr.msk.bf16.vlgmr.msra.gmra.mxu0 %vm650_vm9, %v8039_v19  ;;  %v6753_v19 = vld [vmem:[#allocation10 + $0x264] ss:$8 sps:$4 sm:$0xff]  }
  0xc6   : > { %1160 = vmatpush1.bf16.msra.mxu0 %v6703_v47  ;;  %942 = vmatprep.mubr.bf16.mxu0 %v7759_v0  ;;  %v7125_v47 = vld [vmem:[#allocation13 + $0xe0] ss:$16 sps:$4 sm:$0xff]  }
  0xc7   : > { %1161 = vmatprep.subr.bf16.mxu0 %v6711_v48  ;;  %5957 = vmatmul.mubr.msk.bf16.gmra.mxu1 %vm650_vm9, %v8025_v62  ;;  %v1088_v62 = vsel %vm1083_vm11, %v1085_v5, %v1087_v8  ;;  %v6789_v48 = vld [vmem:[#allocation10 + $0x204] ss:$8 sps:$4 sm:$0xff]   ;;  %v6814_v5 = vld [vmem:[#allocation10 + $0xa0] ss:$8 sps:$4 sm:$0xff]   ;;  %v6820_v8 = vld [vmem:[#allocation10 + $0x90] ss:$8 sps:$4 sm:$0xff]  }
  0xc8   : > { %1298 = vmatpush1.bf16.msra.mxu1 %v6718_v49  ;;  %1321 = vmatprep.mubr.bf16.mxu1 %v7759_v0  ;;  %v6796_v49 = vld [vmem:[#allocation10 + $0xd0] ss:$8 sps:$4 sm:$0xff]  }
  0xc9   : > { %1299 = vmatprep.subr.bf16.mxu1 %v6726_v50  ;;  %v440_v50 = vsel %vm8079_vm4, 0, %v439_v41 }
  0xca   : > { %1162 = vmatpush1.bf16.msra.mxu0 %v6709_v51  ;;  %v450_v51 = vsel %vm8079_vm4, 0, %v449_v42  ;;  %441 = vst [vmem:[#allocation3 + $0x8] sm:$0x11] %v440_v50 }
  0xcb   : > { %1163 = vmatprep.subr.bf16.mxu0 %v6717_v52  ;;  %v6787_v52 = vld [vmem:[#allocation10 + $0x200] ss:$8 sps:$4 sm:$0xff]   ;;  %451 = vst [vmem:[#allocation4 + $0x8] sm:$0x11] %v450_v51 }
  0xcc   : > { %1300 = vmatpush1.bf16.msra.mxu1 %v6724_v53  ;;  %v6798_v53 = vld [vmem:[#allocation10 + $0xd4] ss:$8 sps:$4 sm:$0xff]  }
  0xcd   : > { %5943 = vmatmul.mubr.msk.bf16.gmra.mxu0 %vm650_vm9, %v589_v32  ;;  %1301 = vmatprep.subr.bf16.mxu1 %v6732_v55  ;;  %v6778_v32 = vld [vmem:[#allocation10] ss:$8 sps:$4 sm:$0xff]   ;;  %v447_v55 = vsel %vm445_vm7, 0, %v446_v44 }
  0xce   : > { %1164 = vmatpush1.bf16.msra.mxu0 %v6715_v56  ;;  %1187 = vmatprep.mubr.bf16.mxu0 %v7759_v0  ;;  %v453_v56 = vsel %vm445_vm7, 0, %v452_v45  ;;  %448 = vst [vmem:[#allocation3] sm:$0x11] %v447_v55  ;;  %v1385_v45 = vlaneseq }
  0xcf   : > { %1165 = vmatprep.subr.bf16.mxu0 %v6723_v57  ;;  %v6795_v57 = vld [vmem:[#allocation10 + $0x2f4] ss:$8 sps:$4 sm:$0xff]   ;;  %454 = vst [vmem:[#allocation4] sm:$0x11] %v453_v56  ;;  %v7760_v56 = vmov 1983009808  }
  0xd0   : > { %1302 = vmatpush1.bf16.msra.mxu1 %v6730_v58  ;;  %v6802_v58 = vld [vmem:[#allocation10 + $0xc0] ss:$8 sps:$4 sm:$0xff]   ;;  %v8113_v50 = vshrl.u32 %v1385_v45, 7 }
  0xd1   : > { %1303 = vmatprep.subr.bf16.mxu1 %v6738_v59  ;;  %v6793_v59 = vld [vmem:[#allocation10 + $0x2f0] ss:$8 sps:$4 sm:$0xff]  }
  0xd2   : > { %1166 = vmatpush1.bf16.msra.mxu0 %v6721_v63  ;;  %v6801_v63 = vld [vmem:[#allocation10 + $0x2e4] ss:$8 sps:$4 sm:$0xff]   ;;  %v8124_v55 = vsub.s32 1, %v8113_v50 }
  0xd3   : > { %1167 = vmatprep.subr.bf16.mxu0 %v6729_v1  ;;  %v6808_v1 = vld [vmem:[#allocation10 + $0xb0] ss:$8 sps:$4 sm:$0xff]  }
  0xd4   : > { %1304 = vmatpush1.bf16.msra.mxu1 %v6736_v2  ;;  %v6799_v2 = vld [vmem:[#allocation10 + $0x2e0] ss:$8 sps:$4 sm:$0xff]  }
  0xd5   : > { %2113 = vmatprep.subr.bf16.mxu1 %v6741_v9  ;;  %v6828_v9 = vld [vmem:[#allocation10 + $0x84] ss:$8 sps:$4 sm:$0xff]  }
  0xd6   : > { %1168 = vmatpush1.bf16.msra.mxu0 %v6727_v4  ;;  %v6807_v4 = vld [vmem:[#allocation10 + $0x2d4] ss:$8 sps:$4 sm:$0xff]  }
  0xd7   : > { %1169 = vmatprep.subr.bf16.mxu0 %v6735_v6  ;;  %5985 = vmatmul.mubr.msk.bf16.vlgmr.msra.gmra.mxu1 %vm650_vm9, %v1086_v7  ;;  %v6805_v6 = vld [vmem:[#allocation10 + $0x2d0] ss:$8 sps:$4 sm:$0xff]  }
  0xd8   : > { %1331 = vmatprep.mubr.bf16.mxu1 %v7759_v0  ;;  %2114 = vmatpush1.bf16.msra.mxu1 %v6739_v10  ;;  %v6819_v10 = vld [vmem:[#allocation10 + $0x2b4] ss:$8 sps:$4 sm:$0xff]  }
  0xd9   : > { %2115 = vmatprep.subr.bf16.mxu1 %v6744_v11  ;;  %v6826_v11 = vld [vmem:[#allocation10 + $0x80] ss:$8 sps:$4 sm:$0xff]  }
  0xda   : > { %1170 = vmatpush1.bf16.msra.mxu0 %v6733_v61  ;;  %v6822_v61 = vld [vmem:[#allocation10 + $0x94] ss:$8 sps:$4 sm:$0xff]  }
  0xdb   : > { %1908 = vmatprep.subr.bf16.mxu0 %v6747_v16  ;;  %v6831_v16 = vld [vmem:[#allocation10 + $0x294] ss:$8 sps:$4 sm:$0xff]  }
  0xdc   : > { %2116 = vmatpush1.bf16.msra.mxu1 %v6742_v12  ;;  %v6817_v12 = vld [vmem:[#allocation10 + $0x2b0] ss:$8 sps:$4 sm:$0xff]  }
  0xdd   : > { %5971 = vmatmul.mubr.msk.bf16.vlgmr.msra.gmra.mxu0 %vm650_vm9, %v1086_v7  ;;  %2117 = vmatprep.subr.bf16.mxu1 %v6750_v13  ;;  %v6813_v7 = vld [vmem:[#allocation10 + $0x2c4] ss:$8 sps:$4 sm:$0xff]  }
  0xde   : > { %1197 = vmatprep.mubr.bf16.mxu0 %v7759_v0  ;;  %1909 = vmatpush1.bf16.msra.mxu0 %v6745_v14  ;;  %v6756_v0 = vld [vmem:[#allocation10 + $0x44] ss:$8 sps:$4 sm:$0xff]   ;;  %v6823_v14 = vld [vmem:[#allocation10 + $0x2a0] ss:$8 sps:$4 sm:$0xff]  }
  0xdf   : > { %5986 = vmatmul.mubr.msk.bf16.gmra.mxu1 %vm650_vm9, %v1088_v62  ;;  %1910 = vmatprep.subr.bf16.mxu0 %v6753_v19  ;;  %v6825_v13 = vld [vmem:[#allocation10 + $0x2a4] ss:$8 sps:$4 sm:$0xff]   ;;  %v6835_v19 = vld [vmem:[#allocation10 + $0x280] ss:$8 sps:$4 sm:$0xff]  }
  0xe0   : > { %2118 = vmatpush1.bf16.msra.mxu1 %v6748_v17  ;;  %v6834_v17 = vld [vmem:[#allocation10 + $0x174] ss:$8 sps:$4 sm:$0xff]  }
  0xe1   : > { %2119 = vmatprep.subr.bf16.mxu1 %v6756_v0  ;;  %v6829_v0 = vld [vmem:[#allocation10 + $0x290] ss:$8 sps:$4 sm:$0xff]  }
  0xe2   : > { %1911 = vmatpush1.bf16.msra.mxu0 %v6751_v21 }
  0xe3   : > { %1912 = vmatprep.subr.bf16.mxu0 %v6759_v22 }
  0xe4   : > { %2120 = vmatpush1.bf16.msra.mxu1 %v6754_v18  ;;  %v6837_v18 = vld [vmem:[#allocation10 + $0x284] ss:$8 sps:$4 sm:$0xff]  }
  0xe5   : > { %5972 = vmatmul.mubr.msk.bf16.gmra.mxu0 %vm650_vm9, %v1088_v62  ;;  %2121 = vmatprep.subr.bf16.mxu1 %v6762_v20  ;;  %v6811_v62 = vld [vmem:[#allocation10 + $0x2c0] ss:$8 sps:$4 sm:$0xff]   ;;  %v6845_v20 = vld [vmem:[#allocation10 + $0x374] ss:$8 sps:$4 sm:$0xff]   ;;  %vm1598_vm9 = vcmask 1047556  }
  0xe6   : > { %1913 = vmatpush1.bf16.msra.mxu0 %v6757_v24  ;;  %vm8187_vm13 = vmand %vm1598_vm9, %vm443_vm2 }
  0xe7   : > { %1914 = vmatprep.subr.bf16.mxu0 %v6765_v27  ;;  %vm1600_vm3 = vmor %vm8187_vm13, %vm8182_vm12 }
  0xe8   : > { %2122 = vmatpush1.bf16.msra.mxu1 %v6760_v15 }
  0xe9   : > { %2123 = vmatprep.subr.bf16.mxu1 %v6768_v23 }
  0xea   : > { %1915 = vmatpush1.bf16.msra.mxu0 %v6763_v29 }
  0xeb   : > { %1916 = vmatprep.subr.bf16.mxu0 %v6771_v31 }
  0xec   : > { %2124 = vmatpush1.bf16.msra.mxu1 %v6766_v25 }
  0xed   : > { %2125 = vmatprep.subr.bf16.mxu1 %v6774_v26 }
  0xee   : > { %1917 = vmatpush1.bf16.msra.mxu0 %v6769_v33 }
  0xef   : > { %1918 = vmatprep.subr.bf16.mxu0 %v6777_v35 }
  0xf0   : > { %2126 = vmatpush1.bf16.msra.mxu1 %v6772_v28 }
  0xf1   : > { %2127 = vmatprep.subr.bf16.mxu1 %v6780_v30 }
  0xf2   : > { %1919 = vmatpush1.bf16.msra.mxu0 %v6775_v37 }
  0xf3   : > { %1920 = vmatprep.subr.bf16.mxu0 %v6783_v39 }
  0xf4   : > { %2128 = vmatpush1.bf16.msra.mxu1 %v6778_v32 }
  0xf5   : > { %2129 = vmatprep.subr.bf16.mxu1 %v6786_v34 }
  0xf6   : > { %1921 = vmatpush1.bf16.msra.mxu0 %v6781_v46 }
  0xf7   : > { %1922 = vmatprep.subr.bf16.mxu0 %v6789_v48 }
  0xf8   : > { %2130 = vmatpush2.bf16.msra.mxu1 %v6784_v36 }
  0xf9   : > { %2131 = vmatprep.subr.bf16.mxu1 %v6792_v38 }
  0xfa   : > { %1923 = vmatpush1.bf16.msra.mxu0 %v6787_v52  ;;  %v1470_v52 = vld [vmem:[%s8341_s2] sm:$0x3] }
  0xfb   : > { %1924 = vmatprep.subr.bf16.mxu0 %v6795_v57  ;;  %v1483_v57 = vunpack.c.l.s4 %v7760_v56 }
  0xfc   : > { %2132 = vmatpush2.bf16.msra.mxu1 %v6790_v40 }
  0xfd   : > { %2133 = vmatprep.subr.bf16.mxu1 %v6798_v53 }
  0xfe   : > { %1925 = vmatpush2.bf16.msra.mxu0 %v6793_v59 }
  0xff   : > { %1926 = vmatprep.subr.bf16.mxu0 %v6801_v63 }
 0x100   : > { %2134 = vmatpush2.bf16.msra.mxu1 %v6796_v49 }
 0x101   : > { %2135 = vmatprep.subr.bf16.mxu1 %v6804_v54  ;;  %v8121_v54 = vsub.s32 0, %v8113_v50 }
 0x102   : > { %1927 = vmatpush2.bf16.msra.mxu0 %v6799_v2  ;;  %v1484_v2 = vunpack.c.0.s8 %v1483_v57 }
 0x103   : > { %1928 = vmatprep.subr.bf16.mxu0 %v6807_v4  ;;  %v1475_v63 = vrot.slane %v1470_v52, %v8121_v54  ;;  %v7761_v4 = vmov 1966171168  }
 0x104   : > { %2136 = vmatpush2.bf16.msra.mxu1 %v6802_v58 }
 0x105   : > { %2137 = vmatprep.subr.bf16.mxu1 %v6810_v60 }
 0x106   : > { %1929 = vmatpush2.bf16.msra.mxu0 %v6805_v6 }
 0x107   : > { %1930 = vmatprep.subr.bf16.mxu0 %v6813_v7  ;;  %v8131_v7 = vsub.s32 %v1484_v2, %v8113_v50 }
 0x108   : > { %2138 = vmatpush2.bf16.msra.mxu1 %v6808_v1  ;;  %v1479_v1 = vrot.slane %v1470_v52, %v8124_v55 }
 0x109   : > { %2139 = vmatprep.subr.bf16.mxu1 %v6816_v3 }
 0x10a   : > { %1931 = vmatpush2.bf16.msra.mxu0 %v6811_v62  ;;  %v1481_v62 = vcombine.high %v1475_v63, %v1479_v1 }
 0x10b   : > { %1932 = vmatprep.subr.bf16.mxu0 %v6819_v10 }
 0x10c   : > { %2140 = vmatpush2.bf16.msra.mxu1 %v6814_v5  ;;  %v1383_v5 = vunpack.c.l.s4 %v7761_v4  ;;  %v8137_v52 = vrot.slane %v1481_v62, %v8131_v7 }
 0x10d   : > { %2141 = vmatprep.subr.bf16.mxu1 %v6822_v61  ;;  %v1480_v61 = vcombine.low %v1475_v63, %v1479_v1 }
 0x10e   : > { %1933 = vmatpush2.bf16.msra.mxu0 %v6817_v12 }
 0x10f   : > { %1934 = vmatprep.subr.bf16.mxu0 %v6825_v13  ;;  %v1384_v13 = vunpack.c.0.s8 %v1383_v5  ;;  %v8134_v45 = vrot.slane %v1480_v61, %v8131_v7 }
 0x110   : > { %2142 = vmatpush2.bf16.msra.mxu1 %v6820_v8 }
 0x111   : > { %2143 = vmatprep.subr.bf16.mxu1 %v6828_v9  ;;  %v8146_v63 = vcombine.high %v8134_v45, %v8134_v45 }
 0x112   : > { %1935 = vmatpush2.bf16.msra.mxu0 %v6823_v14 }
 0x113   : > { %1936 = vmatprep.subr.bf16.mxu0 %v6831_v16 }
 0x114   : > { %2144 = vmatpush2.bf16.msra.mxu1 %v6826_v11 }
 0x115   : > { %2552 = vmatprep.subr.bf16.mxu1 %v6834_v17 }
 0x116   : > { %1937 = vmatpush2.bf16.msra.mxu0 %v6829_v0 }
 0x117   : > { %1938 = vmatprep.subr.bf16.mxu0 %v6837_v18 }
 0x11a   : > { %1939 = vmatpush2.bf16.msra.mxu0 %v6835_v19 }
 0x11b   : > { %2349 = vmatprep.subr.bf16.mxu0 %v6845_v20 }
 0x166   : > { %v808_v21 = vpop.f32.mrf.mxu1 }
 0x168   : > { %v810_v15 = vpop.f32.mrf.mxu1 }
 0x16a   : > { %v8091_v22 = vpop.f32.mrf.mxu1 }
 0x16c   : > { %v8093_v25 = vpop.f32.mrf.mxu1 }
 0x16d   : > { %v691_v23 = vpop.f32.mrf.mxu0 }
 0x16e   : > { %v809_v9 = vadd.f32 %v808_v21, %v691_v23 }
 0x16f   : > { %v693_v24 = vpop.f32.mrf.mxu0 }
 0x170   : > { %v8095_v27 = vpop.f32.mrf.mxu1  ;;  %v811_v16 = vadd.f32 %v810_v15, %v693_v24  ;;  %v8142_v15 = vsub.s32 %v1384_v13, %v8113_v50 }
 0x171   : > { %v695_v26 = vpop.f32.mrf.mxu0 }
 0x172   : > { %v8097_v29 = vpop.f32.mrf.mxu1  ;;  %v813_v21 = vadd.f32 %v8091_v22, %v695_v26  ;;  %v8150_v22 = vcombine.high %v8137_v52, %v8137_v52 }
 0x173   : > { %v697_v28 = vpop.f32.mrf.mxu0 }
 0x174   : > { %v8101_v31 = vpop.f32.mrf.mxu1 }
 0x175   : > { %v8099_v30 = vpop.f32.mrf.mxu0 }
 0x176   : > { %v8105_v33 = vpop.f32.mrf.mxu1 }
 0x177   : > { %v8103_v32 = vpop.f32.mrf.mxu0 }
 0x178   : > { %v821_v2 = vadd.f32 %v8097_v29, %v8103_v32 }
 0x179   : > { %v8107_v34 = vpop.f32.mrf.mxu0 }
 0x17b   : > { %v8109_v37 = vpop.f32.mrf.mxu0 }
 0x17e   : > { %v1047_v35 = vpop.f32.mrf.mxu1 }
 0x180   : > { %v1049_v36 = vpop.f32.mrf.mxu1 }
 0x182   : > { %v1051_v38 = vpop.f32.mrf.mxu1 }
 0x184   : > { %v1053_v41 = vpop.f32.mrf.mxu1 }
 0x185   : > { %v934_v39 = vpop.f32.mrf.mxu0 }
 0x186   : > { %v1048_v10 = vadd.f32 %v1047_v35, %v934_v39 }
 0x187   : > { %v936_v40 = vpop.f32.mrf.mxu0  ;;  %v8111_v44 = vpop.f32.mrf.mxu1 }
 0x188   : > { %v1050_v11 = vadd.f32 %v1049_v36, %v936_v40  ;;  %v815_v36 = vadd.f32 %v8093_v25, %v697_v28  ;;  %v819_v25 = vadd.f32 %v8095_v27, %v8099_v30 }
 0x189   : > { %v938_v42 = vpop.f32.mrf.mxu0  ;;  %v1059_v48 = vpop.f32.mrf.mxu1 }
 0x18a   : > { %v1052_v19 = vadd.f32 %v1051_v38, %v938_v42 }
 0x18b   : > { %v940_v46 = vpop.f32.mrf.mxu0  ;;  %v8115_v51 = vpop.f32.mrf.mxu1 }
 0x18c   : > { %v1054_v23 = vadd.f32 %v1053_v41, %v940_v46 }
 0x18d   : > { %v944_v49 = vpop.f32.mrf.mxu0  ;;  %v8126_v58 = vpop.f32.mrf.mxu1 }
 0x18e   : > { %v1058_v4 = vadd.f32 %v8111_v44, %v944_v49  ;;  %v825_v44 = vadd.f32 %v8105_v33, %v8109_v37 }
 0x18f   : > { %v946_v53 = vpop.f32.mrf.mxu0 }
 0x190   : > { %v1060_v5 = vadd.f32 %v1059_v48, %v946_v53 }
 0x191   : > { %v948_v59 = vpop.f32.mrf.mxu0 }
 0x192   : > { %v1062_v30 = vadd.f32 %v8115_v51, %v948_v59 }
 0x193   : > { %v950_v6 = vpop.f32.mrf.mxu0 }
 0x194   : > { %v1064_v48 = vadd.f32 %v8126_v58, %v950_v6 }
 0x197   : > { %v1323_v60 = vpop.f32.mrf.mxu1 }
 0x198   : > { %v1342_v0 = vadd.f32 %v1323_v60, %v1048_v10 }
 0x199   : > { %v1325_v3 = vpop.f32.mrf.mxu1 }
 0x19a   : > { %v1343_v18 = vadd.f32 %v1325_v3, %v1050_v11  ;;  %v823_v3 = vadd.f32 %v8101_v31, %v8107_v34 }
 0x19b   : > { %v1327_v8 = vpop.f32.mrf.mxu1 }
 0x19c   : > { %v1344_v39 = vadd.f32 %v1327_v8, %v1052_v19 }
 0x19d   : > { %v1189_v12 = vpop.f32.mrf.mxu0  ;;  %v1329_v14 = vpop.f32.mrf.mxu1 }
 0x19e   : > { %v1208_v17 = vadd.f32 %v1189_v12, %v809_v9  ;;  %v1345_v60 = vadd.f32 %v1329_v14, %v1054_v23 }
 0x19f   : > { %v1191_v20 = vpop.f32.mrf.mxu0  ;;  %v1333_v56 = vpop.f32.mrf.mxu1 }
 0x1a0   : > { %v1209_v35 = vadd.f32 %v1191_v20, %v811_v16  ;;  %v1350_v40 = vmax.f32 %v1208_v17, %v1342_v0  ;;  %v1346_v11 = vadd.f32 %v1333_v56, %v1058_v4 }
 0x1a1   : > { %v1193_v24 = vpop.f32.mrf.mxu0  ;;  %v1335_v38 = vpop.f32.mrf.mxu1 }
 0x1a2   : > { %v1351_v42 = vmax.f32 %v1209_v35, %v1343_v18  ;;  %v1210_v57 = vadd.f32 %v1193_v24, %v813_v21  ;;  %v1347_v13 = vadd.f32 %v1335_v38, %v1060_v5 }
 0x1a3   : > { %v1195_v1 = vpop.f32.mrf.mxu0  ;;  %v1337_v46 = vpop.f32.mrf.mxu1 }
 0x1a4   : > { %v1366_v26 = vcombine.low %v1350_v40, %v1351_v42  ;;  %v1367_v28 = vcombine.high %v1350_v40, %v1351_v42  ;;  %v1211_v41 = vadd.f32 %v1195_v1, %v815_v36  ;;  %v1352_v9 = vmax.f32 %v1210_v57, %v1344_v39 }
 0x1a5   : > { %v1199_v61 = vpop.f32.mrf.mxu0  ;;  %v1339_v34 = vpop.f32.mrf.mxu1  ;;  %v1348_v16 = vadd.f32 %v1337_v46, %v1062_v30 }
 0x1a6   : > { %v1388_v8 = vrot.slane %v1366_v26, %v8142_v15  ;;  %v1395_v62 = vrot.slane %v1367_v28, %v8142_v15  ;;  %v1353_v27 = vmax.f32 %v1211_v41, %v1345_v60  ;;  %v1212_v10 = vadd.f32 %v1199_v61, %v819_v25 }
 0x1a7   : > { %v1201_v12 = vpop.f32.mrf.mxu0  ;;  %v1349_v21 = vadd.f32 %v1339_v34, %v1064_v48 }
 0x1a8   : > { %v1446_v29 = vrot.slane %v1388_v8, 4  ;;  %v1447_v32 = vrot.slane %v1395_v62, 4  ;;  %v1368_v14 = vcombine.low %v1352_v9, %v1353_v27  ;;  %v1369_v31 = vcombine.high %v1352_v9, %v1353_v27 }
 0x1a9   : > { %v1213_v49 = vadd.f32 %v1201_v12, %v821_v2  ;;  %v1203_v53 = vpop.f32.mrf.mxu0  ;;  %v1354_v18 = vmax.f32 %v1212_v10, %v1346_v11 }
 0x1aa   : > { %v1462_v17 = vmax.f32 %v1388_v8, %v1446_v29  ;;  %v1463_v0 = vmax.f32 %v1395_v62, %v1447_v32  ;;  %v1402_v51 = vrot.slane %v1368_v14, %v8142_v15  ;;  %v1409_v59 = vrot.slane %v1369_v31, %v8142_v15 }
 0x1ab   : > { %v1355_v19 = vmax.f32 %v1213_v49, %v1347_v13  ;;  %v1214_v20 = vadd.f32 %v1203_v53, %v823_v3  ;;  %v1205_v56 = vpop.f32.mrf.mxu0 }
 0x1ac   : > { %v1502_v23 = vadd.f32 %v8134_v45, %v1462_v17  ;;  %v1503_v33 = vadd.f32 %v8146_v63, %v1463_v0  ;;  %v1448_v37 = vrot.slane %v1402_v51, 4  ;;  %v1449_v58 = vrot.slane %v1409_v59, 4 }
 0x1ad   : > { %v1370_v6 = vcombine.low %v1354_v18, %v1355_v19  ;;  %v1371_v35 = vcombine.high %v1354_v18, %v1355_v19  ;;  %v1215_v36 = vadd.f32 %v1205_v56, %v825_v44  ;;  %v1356_v60 = vmax.f32 %v1214_v20, %v1348_v16 }
 0x1ae   : > { %v1510_v24 = vmax.f32 %v1502_v23, 0.0  ;;  %v1511_v39 = vmax.f32 %v1503_v33, 0.0  ;;  %v1464_v38 = vmax.f32 %v1402_v51, %v1448_v37  ;;  %v1465_v40 = vmax.f32 %v1409_v59, %v1449_v58 }
 0x1af   : > { %v1416_v42 = vrot.slane %v1370_v6, %v8142_v15  ;;  %v1423_v57 = vrot.slane %v1371_v35, %v8142_v15  ;;  %v1357_v1 = vmax.f32 %v1215_v36, %v1349_v21 }
 0x1b0   : > { %v1504_v25 = vadd.f32 %v8137_v52, %v1464_v38  ;;  %v1505_v26 = vadd.f32 %v8150_v22, %v1465_v40  ;;  %v1526_v3 = vcombine.low %v1510_v24, %v1511_v39  ;;  %v1605_v24 = vld [vmem:[#allocation3] sm:$0x11] }
 0x1b1   : > { %v1450_v28 = vrot.slane %v1416_v42, 4  ;;  %v1451_v41 = vrot.slane %v1423_v57, 4  ;;  %v1372_v46 = vcombine.low %v1356_v60, %v1357_v1  ;;  %v1373_v2 = vcombine.high %v1356_v60, %v1357_v1 }
 0x1b2   : > { %v1512_v4 = vmax.f32 %v1504_v25, 0.0  ;;  %v1513_v5 = vmax.f32 %v1505_v26, 0.0  ;;  %v1534_v13 = vrot.slane %v1526_v3, %v8131_v7  ;;  %v6832_v25 = vld [vmem:[#allocation10 + $0x170] ss:$8 sps:$4 sm:$0xff]   ;;  %v6840_v26 = vld [vmem:[#allocation10 + $0x164] ss:$8 sps:$4 sm:$0xff]  }
 0x1b3   : > { %v1466_v61 = vmax.f32 %v1416_v42, %v1450_v28  ;;  %v1467_v8 = vmax.f32 %v1423_v57, %v1451_v41  ;;  %v1430_v62 = vrot.slane %v1372_v46, %v8142_v15  ;;  %v1437_v9 = vrot.slane %v1373_v2, %v8142_v15  ;;  %v6848_v2 = vld [vmem:[#allocation10 + $0x154] ss:$8 sps:$4 sm:$0xff]  }
 0x1b4   : > { %v1527_v27 = vcombine.low %v1512_v4, %v1513_v5 }
 0x1b5   : > { %v1506_v30 = vadd.f32 %v8134_v45, %v1466_v61  ;;  %v1507_v10 = vadd.f32 %v8146_v63, %v1467_v8  ;;  %v1452_v11 = vrot.slane %v1430_v62, 4  ;;  %v1453_v12 = vrot.slane %v1437_v9, 4 }
 0x1b6   : > { %v1541_v29 = vrot.slane %v1527_v27, %v8131_v7 }
 0x1b7   : > { %v1514_v32 = vmax.f32 %v1506_v30, 0.0  ;;  %v1515_v14 = vmax.f32 %v1507_v10, 0.0  ;;  %v1468_v31 = vmax.f32 %v1430_v62, %v1452_v11  ;;  %v1469_v34 = vmax.f32 %v1437_v9, %v1453_v12  ;;  %v6846_v9 = vld [vmem:[#allocation10 + $0x150] ss:$8 sps:$4 sm:$0xff]   ;;  %v6854_v10 = vld [vmem:[#allocation10 + $0x144] ss:$8 sps:$4 sm:$0xff]  }
 0x1b8   : > { %v1542_v44 = vcombine.low %v1534_v13, %v1541_v29  ;;  %v1543_v48 = vcombine.high %v1534_v13, %v1541_v29 }
 0x1b9   : > { %v1508_v49 = vadd.f32 %v8137_v52, %v1468_v31  ;;  %v1509_v45 = vadd.f32 %v8150_v22, %v1469_v34  ;;  %v1544_v16 = vcombine.low %v1514_v32, %v1515_v14  ;;  %v1601_v22 = vld [vmem:[#allocation3 + $0x8] sm:$0xff] }
 0x1ba   : > { %v6518_v53 = vpack.c.bf16 %v1543_v48, %v1542_v44  ;;  %v6852_v44 = vld [vmem:[#allocation10 + $0x140] ss:$8 sps:$4 sm:$0xff]  }
 0x1bb   : > { %v1516_v17 = vmax.f32 %v1508_v49, 0.0  ;;  %v1517_v0 = vmax.f32 %v1509_v45, 0.0  ;;  %v1552_v20 = vrot.slane %v1544_v16, %v8131_v7  ;;  %v6843_v49 = vld [vmem:[#allocation10 + $0x370] ss:$8 sps:$4 sm:$0xff]   ;;  %v6851_v16 = vld [vmem:[#allocation10 + $0x364] ss:$8 sps:$4 sm:$0xff]  }
 0x1bc   : > { %v1577_v51 = vshrl.u32 %v6518_v53, 16  ;;  %v1580_v52 = vshll.u32 %v6518_v53, 16 }
 0x1bd   : > { %v1545_v18 = vcombine.low %v1516_v17, %v1517_v0  ;;  %v6860_v17 = vld [vmem:[#allocation10 + $0x134] ss:$8 sps:$4 sm:$0xff]   ;;  %v6858_v0 = vld [vmem:[#allocation10 + $0x130] ss:$8 sps:$4 sm:$0xff]  }
 0x1be   : > { %v1579_v19 = vrot.slane %v1577_v51, 7  ;;  %v6849_v51 = vld [vmem:[#allocation10 + $0x360] ss:$8 sps:$4 sm:$0xff]  }
 0x1bf   : > { %v1559_v56 = vrot.slane %v1545_v18, %v8131_v7  ;;  %v6866_v18 = vld [vmem:[#allocation10 + $0x124] ss:$8 sps:$4 sm:$0xff]  }
 0x1c0   : > { %v1582_v21 = vor.u32 %v1580_v52, %v1579_v19  ;;  %v1583_v39 = vrot.slane %v1579_v19, 4  ;;  %v6857_v19 = vld [vmem:[#allocation10 + $0x354] ss:$8 sps:$4 sm:$0xff]   ;;  %v6864_v52 = vld [vmem:[#allocation10 + $0x120] ss:$8 sps:$4 sm:$0xff]  }
 0x1c1   : > { %v1560_v23 = vcombine.low %v1552_v20, %v1559_v56  ;;  %v1561_v33 = vcombine.high %v1552_v20, %v1559_v56  ;;  %v6872_v20 = vld [vmem:[#allocation10 + $0x114] ss:$8 sps:$4 sm:$0xff]   ;;  %v6863_v56 = vld [vmem:[#allocation10 + $0x344] ss:$8 sps:$4 sm:$0xff]  }
 0x1c2   : > { %v1602_v37 = vsel %vm1600_vm3, %v1582_v21, %v1601_v22  ;;  %v6855_v22 = vld [vmem:[#allocation10 + $0x350] ss:$8 sps:$4 sm:$0xff]  }
 0x1c3   : > { %1603 = vst [vmem:[#allocation3 + $0x8] sm:$0xff] %v1602_v37  ;;  %v6519_v58 = vpack.c.bf16 %v1561_v33, %v1560_v23  ;;  %v6870_v21 = vld [vmem:[#allocation10 + $0x110] ss:$8 sps:$4 sm:$0xff]   ;;  %v6861_v23 = vld [vmem:[#allocation10 + $0x340] ss:$8 sps:$4 sm:$0xff]  }
 0x1c4   : > { %v6878_v33 = vld [vmem:[#allocation10 + $0x104] ss:$8 sps:$4 sm:$0xff]  }
 0x1c5   : > { %v1585_v6 = vshrl.u32 %v6519_v58, 16  ;;  %v1588_v36 = vshll.u32 %v6519_v58, 16  ;;  %v6876_v58 = vld [vmem:[#allocation10 + $0x100] ss:$8 sps:$4 sm:$0xff]  }
 0x1c7   : > { %v1587_v35 = vrot.slane %v1585_v6, 7  ;;  %v6867_v6 = vld [vmem:[#allocation10 + $0x330] ss:$8 sps:$4 sm:$0xff]  }
 0x1c9   : > { %v1590_v38 = vor.u32 %v1588_v36, %v1587_v35  ;;  %v1592_v40 = vrot.slane %v1587_v35, 4  ;;  %v6884_v35 = vld [vmem:[#allocation10 + $0x1f4] ss:$8 sps:$4 sm:$0xff]   ;;  %v6875_v36 = vld [vmem:[#allocation10 + $0x324] ss:$8 sps:$4 sm:$0xff]  }
 0x1ca   : > { %v8213_v41 = vld [vmem:[#allocation3 + $0x8] sm:$0xee] }
 0x1cb   : > { %v8204_v42 = vsel %vm8006_vm6, %v1583_v39, %v1590_v38  ;;  %v1606_v57 = vsel %vm8079_vm4, %v1592_v40, %v1605_v24  ;;  %v6882_v24 = vld [vmem:[#allocation10 + $0x1f0] ss:$8 sps:$4 sm:$0xff]   ;;  %v6873_v39 = vld [vmem:[#allocation10 + $0x320] ss:$8 sps:$4 sm:$0xff]   ;;  %v6890_v38 = vld [vmem:[#allocation10 + $0x1e4] ss:$8 sps:$4 sm:$0xff]  }
 0x1cc   : > { %1607 = vst [vmem:[#allocation3] sm:$0x11] %v1606_v57  ;;  %v8209_v60 = vcombine.low %v1602_v37, %v8204_v42  ;;  %v5990_v1 = vcombine.high %v1602_v37, %v8204_v42  ;;  %v6121_v3 = vcombine.low %v8213_v41, %v8204_v42  ;;  %v6869_v37 = vld [vmem:[#allocation10 + $0x334] ss:$8 sps:$4 sm:$0xff]   ;;  %v6888_v57 = vld [vmem:[#allocation10 + $0x1e0] ss:$8 sps:$4 sm:$0xff]  }
 0x1cd   : > { %v6881_v40 = vld [vmem:[#allocation10 + $0x314] ss:$8 sps:$4 sm:$0xff]  }
 0x1ce   : > { %2145 = vmatprep.mubr.bf16.mxu1 %v5990_v1  ;;  %v1737_v28 = vshll.u32 %v5990_v1, 16  ;;  %v1725_v46 = vshll.u32 %v8209_v60, 16  ;;  %v1735_v27 = vshrl.u32 %v5990_v1, 16  ;;  %v1723_v30 = vshrl.u32 %v8209_v60, 16 }
 0x1cf   : > { %2146 = vmatmul.mubr.bf16.vlgmr.msra.gmra.mxu1 %v8209_v60  ;;  %v2634_v13 = vrot.slane %v6121_v3, 1  ;;  %v6900_v3 = vld [vmem:[#allocation10 + $0x1c0] ss:$8 sps:$4 sm:$0xff]  }
 0x1d0   : > { %2553 = vmatpush1.bf16.msra.mxu1 %v6832_v25  ;;  %2584 = vmatprep.mubr.bf16.mxu1 %v5990_v1  ;;  %v1739_v5 = vrot.slane %v1737_v28, 1  ;;  %v1727_v62 = vrot.slane %v1725_v46, 1  ;;  %v6879_v1 = vld [vmem:[#allocation10 + $0x310] ss:$8 sps:$4 sm:$0xff]   ;;  %v6896_v25 = vld [vmem:[#allocation10 + $0x1d4] ss:$8 sps:$4 sm:$0xff]  }
 0x1d1   : > { %2554 = vmatprep.subr.bf16.mxu1 %v6840_v26  ;;  %v6887_v26 = vld [vmem:[#allocation10 + $0x304] ss:$8 sps:$4 sm:$0xff]   ;;  %v6894_v28 = vld [vmem:[#allocation10 + $0x1d0] ss:$8 sps:$4 sm:$0xff]  }
 0x1d2   : > { %v1740_v32 = vor.u32 %v1739_v5, %v1735_v27  ;;  %v1728_v31 = vor.u32 %v1727_v62, %v1723_v30  ;;  %v6902_v46 = vld [vmem:[#allocation10 + $0x1c4] ss:$8 sps:$4 sm:$0xff]   ;;  %v6908_v5 = vld [vmem:[#allocation10 + $0x1b4] ss:$8 sps:$4 sm:$0xff]   ;;  %v6906_v62 = vld [vmem:[#allocation10 + $0x1b0] ss:$8 sps:$4 sm:$0xff]  }
 0x1d3   : > { %v1675_v4 = vld [vmem:[#allocation3] sm:$0x11]  ;;  %v6914_v27 = vld [vmem:[#allocation10 + $0x1a4] ss:$8 sps:$4 sm:$0xff]  }
 0x1d4   : > { %2555 = vmatpush1.bf16.msra.mxu1 %v6838_v43  ;;  %v5991_v61 = vcombine.low %v1675_v4, %v1675_v4  ;;  %v8218_v8 = vcombine.high %v1675_v4, %v1675_v4  ;;  %v6885_v43 = vld [vmem:[#allocation10 + $0x300] ss:$8 sps:$4 sm:$0xff]   ;;  %v6891_v4 = vld [vmem:[#allocation10 + $0x3f0] ss:$8 sps:$4 sm:$0xff]   ;;  %v6905_v30 = vld [vmem:[#allocation10 + $0x3d4] ss:$8 sps:$4 sm:$0xff]  }
 0x1d5   : > { %2556 = vmatprep.subr.bf16.mxu1 %v6848_v2  ;;  %v6893_v2 = vld [vmem:[#allocation10 + $0x3f4] ss:$8 sps:$4 sm:$0xff]  }
 0x1d6   : > { %v1742_v11 = vshll.u32 %v8218_v8, 16  ;;  %v1730_v12 = vshll.u32 %v5991_v61, 16  ;;  %v2635_v29 = vrot.slane %v5991_v61, 1  ;;  %v6899_v61 = vld [vmem:[#allocation10 + $0x3e4] ss:$8 sps:$4 sm:$0xff]  }
 0x1d8   : > { %v1744_v14 = vrot.slane %v1742_v11, 1  ;;  %v1732_v34 = vrot.slane %v1730_v12, 1  ;;  %2557 = vmatpush1.bf16.msra.mxu1 %v6846_v9  ;;  %v8223_v48 = vsel %vm1083_vm11, %v2634_v13, %v2635_v29  ;;  %v6897_v9 = vld [vmem:[#allocation10 + $0x3e0] ss:$8 sps:$4 sm:$0xff]   ;;  %v6903_v11 = vld [vmem:[#allocation10 + $0x3d0] ss:$8 sps:$4 sm:$0xff]  }
 0x1d9   : > { %2558 = vmatprep.subr.bf16.mxu1 %v6854_v10  ;;  %v6912_v10 = vld [vmem:[#allocation10 + $0x1a0] ss:$8 sps:$4 sm:$0xff]   ;;  %v6920_v12 = vld [vmem:[#allocation10 + $0x194] ss:$8 sps:$4 sm:$0xff]   ;;  %v6911_v13 = vld [vmem:[#allocation10 + $0x3c4] ss:$8 sps:$4 sm:$0xff]  }
 0x1da   : > { %v1745_v45 = vsel %vm569_vm10, %v1740_v32, %v1744_v14  ;;  %v8227_v53 = vsel %vm569_vm10, %v1728_v31, %v1732_v34  ;;  %v6918_v29 = vld [vmem:[#allocation10 + $0x190] ss:$8 sps:$4 sm:$0xff]   ;;  %v6909_v32 = vld [vmem:[#allocation10 + $0x3c0] ss:$8 sps:$4 sm:$0xff]   ;;  %v6926_v14 = vld [vmem:[#allocation10 + $0x184] ss:$8 sps:$4 sm:$0xff]  }
 0x1db   : > { %1940 = vmatprep.mubr.bf16.mxu0 %v1745_v45  ;;  %v6917_v31 = vld [vmem:[#allocation10 + $0x3b4] ss:$8 sps:$4 sm:$0xff]   ;;  %v6924_v34 = vld [vmem:[#allocation10 + $0x180] ss:$8 sps:$4 sm:$0xff]  }
 0x1dc   : > { %1941 = vmatmul.mubr.bf16.vlgmr.msra.gmra.mxu0 %v8227_v53  ;;  %2559 = vmatpush1.bf16.msra.mxu1 %v6852_v44  ;;  %v6915_v44 = vld [vmem:[#allocation10 + $0x3b0] ss:$8 sps:$4 sm:$0xff]  }
 0x1dd   : > { %2350 = vmatpush1.bf16.msra.mxu0 %v6843_v49  ;;  %2381 = vmatprep.mubr.bf16.mxu0 %v1745_v45  ;;  %v6932_v49 = vld [vmem:[#allocation10 + $0x574] ss:$8 sps:$4 sm:$0xff]   ;;  %v6122_v45 = vcombine.high %v8213_v41, %v8204_v42  ;;  %v6936_v42 = vld [vmem:[#allocation10 + $0x560] ss:$8 sps:$4 sm:$0xff]   ;;  %v6927_v41 = vld [vmem:[#allocation10 + $0x390] ss:$8 sps:$4 sm:$0xff]  }
 0x1de   : > { %2351 = vmatprep.subr.bf16.mxu0 %v6851_v16  ;;  %2560 = vmatprep.subr.bf16.mxu1 %v6860_v17  ;;  %v6923_v16 = vld [vmem:[#allocation10 + $0x3a4] ss:$8 sps:$4 sm:$0xff]   ;;  %v2638_v17 = vrot.slane %v8218_v8, 1  ;;  %v6944_v8 = vld [vmem:[#allocation10 + $0x554] ss:$8 sps:$4 sm:$0xff]  }
 0x1e0   : > { %2561 = vmatpush1.bf16.msra.mxu1 %v6858_v0  ;;  %v6930_v0 = vld [vmem:[#allocation10 + $0x570] ss:$8 sps:$4 sm:$0xff]  }
 0x1e1   : > { %2352 = vmatpush1.bf16.msra.mxu0 %v6849_v51  ;;  %2562 = vmatprep.subr.bf16.mxu1 %v6866_v18  ;;  %v6921_v51 = vld [vmem:[#allocation10 + $0x3a0] ss:$8 sps:$4 sm:$0xff]   ;;  %v2637_v18 = vrot.slane %v6122_v45, 1  ;;  %v7010_v45 = vld [vmem:[#allocation10 + $0x5a4] ss:$8 sps:$4 sm:$0xff]  }
 0x1e2   : > { %2353 = vmatprep.subr.bf16.mxu0 %v6857_v19  ;;  %v6938_v19 = vld [vmem:[#allocation10 + $0x564] ss:$8 sps:$4 sm:$0xff]  }
 0x1e4   : > { %2563 = vmatpush1.bf16.msra.mxu1 %v6864_v52  ;;  %v6929_v52 = vld [vmem:[#allocation10 + $0x394] ss:$8 sps:$4 sm:$0xff]  }
 0x1e5   : > { %2354 = vmatpush1.bf16.msra.mxu0 %v6855_v22  ;;  %2564 = vmatprep.subr.bf16.mxu1 %v6872_v20  ;;  %v2639_v22 = vsel %vm1083_vm11, %v2637_v18, %v2638_v17  ;;  %v6935_v20 = vld [vmem:[#allocation10 + $0x384] ss:$8 sps:$4 sm:$0xff]   ;;  %v7008_v17 = vld [vmem:[#allocation10 + $0x5a0] ss:$8 sps:$4 sm:$0xff]  }
 0x1e6   : > { %2355 = vmatprep.subr.bf16.mxu0 %v6863_v56  ;;  %v6942_v56 = vld [vmem:[#allocation10 + $0x550] ss:$8 sps:$4 sm:$0xff]   ;;  %v7007_v18 = vld [vmem:[#allocation10 + $0x4c4] ss:$8 sps:$4 sm:$0xff]  }
 0x1e8   : > { %2565 = vmatpush1.bf16.msra.mxu1 %v6870_v21  ;;  %v6933_v21 = vld [vmem:[#allocation10 + $0x380] ss:$8 sps:$4 sm:$0xff]  }
 0x1e9   : > { %2356 = vmatpush1.bf16.msra.mxu0 %v6861_v23  ;;  %2566 = vmatprep.subr.bf16.mxu1 %v6878_v33  ;;  %v6950_v23 = vld [vmem:[#allocation10 + $0x544] ss:$8 sps:$4 sm:$0xff]   ;;  %v6941_v33 = vld [vmem:[#allocation10 + $0x474] ss:$8 sps:$4 sm:$0xff]  }
 0x1ea   : > { %2357 = vmatprep.subr.bf16.mxu0 %v6869_v37  ;;  %v6939_v37 = vld [vmem:[#allocation10 + $0x470] ss:$8 sps:$4 sm:$0xff]  }
 0x1ec   : > { %2567 = vmatpush1.bf16.msra.mxu1 %v6876_v58  ;;  %v6947_v58 = vld [vmem:[#allocation10 + $0x464] ss:$8 sps:$4 sm:$0xff]  }
 0x1ed   : > { %2358 = vmatpush1.bf16.msra.mxu0 %v6867_v6  ;;  %2568 = vmatprep.subr.bf16.mxu1 %v6884_v35  ;;  %v6956_v6 = vld [vmem:[#allocation10 + $0x534] ss:$8 sps:$4 sm:$0xff]   ;;  %v6954_v35 = vld [vmem:[#allocation10 + $0x530] ss:$8 sps:$4 sm:$0xff]  }
 0x1ee   : > { %2359 = vmatprep.subr.bf16.mxu0 %v6875_v36  ;;  %v6945_v36 = vld [vmem:[#allocation10 + $0x460] ss:$8 sps:$4 sm:$0xff]  }
 0x1f0   : > { %2569 = vmatpush2.bf16.msra.mxu1 %v6882_v24  ;;  %v6962_v24 = vld [vmem:[#allocation10 + $0x524] ss:$8 sps:$4 sm:$0xff]  }
 0x1f1   : > { %2360 = vmatpush1.bf16.msra.mxu0 %v6873_v39  ;;  %2570 = vmatprep.subr.bf16.mxu1 %v6890_v38  ;;  %v6953_v39 = vld [vmem:[#allocation10 + $0x454] ss:$8 sps:$4 sm:$0xff]   ;;  %v6960_v38 = vld [vmem:[#allocation10 + $0x520] ss:$8 sps:$4 sm:$0xff]  }
 0x1f2   : > { %2361 = vmatprep.subr.bf16.mxu0 %v6881_v40  ;;  %v6951_v40 = vld [vmem:[#allocation10 + $0x450] ss:$8 sps:$4 sm:$0xff]  }
 0x1f4   : > { %2571 = vmatpush2.bf16.msra.mxu1 %v6888_v57  ;;  %v6968_v57 = vld [vmem:[#allocation10 + $0x514] ss:$8 sps:$4 sm:$0xff]  }
 0x1f5   : > { %2362 = vmatpush1.bf16.msra.mxu0 %v6879_v1  ;;  %2572 = vmatprep.subr.bf16.mxu1 %v6896_v25  ;;  %v6959_v1 = vld [vmem:[#allocation10 + $0x444] ss:$8 sps:$4 sm:$0xff]   ;;  %v6966_v25 = vld [vmem:[#allocation10 + $0x510] ss:$8 sps:$4 sm:$0xff]  }
 0x1f6   : > { %2363 = vmatprep.subr.bf16.mxu0 %v6887_v26  ;;  %v6974_v26 = vld [vmem:[#allocation10 + $0x504] ss:$8 sps:$4 sm:$0xff]  }
 0x1f8   : > { %2573 = vmatpush2.bf16.msra.mxu1 %v6894_v28  ;;  %v6965_v28 = vld [vmem:[#allocation10 + $0x434] ss:$8 sps:$4 sm:$0xff]  }
 0x1f9   : > { %2364 = vmatpush1.bf16.msra.mxu0 %v6885_v43  ;;  %2574 = vmatprep.subr.bf16.mxu1 %v6902_v46  ;;  %v6972_v43 = vld [vmem:[#allocation10 + $0x500] ss:$8 sps:$4 sm:$0xff]   ;;  %v6963_v46 = vld [vmem:[#allocation10 + $0x430] ss:$8 sps:$4 sm:$0xff]  }
 0x1fa   : > { %2365 = vmatprep.subr.bf16.mxu0 %v6893_v2  ;;  %v6980_v2 = vld [vmem:[#allocation10 + $0x5f4] ss:$8 sps:$4 sm:$0xff]  }
 0x1fc   : > { %2575 = vmatpush2.bf16.msra.mxu1 %v6900_v3  ;;  %v6971_v3 = vld [vmem:[#allocation10 + $0x424] ss:$8 sps:$4 sm:$0xff]  }
 0x1fd   : > { %2366 = vmatpush2.bf16.msra.mxu0 %v6891_v4  ;;  %2576 = vmatprep.subr.bf16.mxu1 %v6908_v5  ;;  %v6978_v4 = vld [vmem:[#allocation10 + $0x5f0] ss:$8 sps:$4 sm:$0xff]   ;;  %v6969_v5 = vld [vmem:[#allocation10 + $0x420] ss:$8 sps:$4 sm:$0xff]  }
 0x1fe   : > { %2367 = vmatprep.subr.bf16.mxu0 %v6899_v61  ;;  %v6986_v61 = vld [vmem:[#allocation10 + $0x5e4] ss:$8 sps:$4 sm:$0xff]  }
 0x200   : > { %2577 = vmatpush2.bf16.msra.mxu1 %v6906_v62  ;;  %v6977_v62 = vld [vmem:[#allocation10 + $0x414] ss:$8 sps:$4 sm:$0xff]  }
 0x201   : > { %2368 = vmatpush2.bf16.msra.mxu0 %v6897_v9  ;;  %2578 = vmatprep.subr.bf16.mxu1 %v6914_v27  ;;  %v6984_v9 = vld [vmem:[#allocation10 + $0x5e0] ss:$8 sps:$4 sm:$0xff]   ;;  %v6975_v27 = vld [vmem:[#allocation10 + $0x410] ss:$8 sps:$4 sm:$0xff]  }
 0x202   : > { %2369 = vmatprep.subr.bf16.mxu0 %v6905_v30  ;;  %v6992_v30 = vld [vmem:[#allocation10 + $0x5d4] ss:$8 sps:$4 sm:$0xff]  }
 0x204   : > { %2579 = vmatpush2.bf16.msra.mxu1 %v6912_v10  ;;  %v6983_v10 = vld [vmem:[#allocation10 + $0x404] ss:$8 sps:$4 sm:$0xff]  }
 0x205   : > { %2370 = vmatpush2.bf16.msra.mxu0 %v6903_v11  ;;  %2580 = vmatprep.subr.bf16.mxu1 %v6920_v12  ;;  %v6990_v11 = vld [vmem:[#allocation10 + $0x5d0] ss:$8 sps:$4 sm:$0xff]   ;;  %v6981_v12 = vld [vmem:[#allocation10 + $0x400] ss:$8 sps:$4 sm:$0xff]  }
 0x206   : > { %2371 = vmatprep.subr.bf16.mxu0 %v6911_v13  ;;  %v6998_v13 = vld [vmem:[#allocation10 + $0x5c4] ss:$8 sps:$4 sm:$0xff]  }
 0x208   : > { %2581 = vmatpush2.bf16.msra.mxu1 %v6918_v29  ;;  %v6989_v29 = vld [vmem:[#allocation10 + $0x4f4] ss:$8 sps:$4 sm:$0xff]  }
 0x209   : > { %2372 = vmatpush2.bf16.msra.mxu0 %v6909_v32  ;;  %2582 = vmatprep.subr.bf16.mxu1 %v6926_v14  ;;  %v6996_v32 = vld [vmem:[#allocation10 + $0x5c0] ss:$8 sps:$4 sm:$0xff]   ;;  %v6987_v14 = vld [vmem:[#allocation10 + $0x4f0] ss:$8 sps:$4 sm:$0xff]  }
 0x20a   : > { %2373 = vmatprep.subr.bf16.mxu0 %v6917_v31  ;;  %v7004_v31 = vld [vmem:[#allocation10 + $0x5b4] ss:$8 sps:$4 sm:$0xff]  }
 0x20c   : > { %2583 = vmatpush2.bf16.msra.mxu1 %v6924_v34  ;;  %v6995_v34 = vld [vmem:[#allocation10 + $0x4e4] ss:$8 sps:$4 sm:$0xff]  }
 0x20d   : > { %2374 = vmatpush2.bf16.msra.mxu0 %v6915_v44  ;;  %3042 = vmatprep.subr.bf16.mxu1 %v6932_v49  ;;  %v7002_v44 = vld [vmem:[#allocation10 + $0x5b0] ss:$8 sps:$4 sm:$0xff]   ;;  %v6993_v49 = vld [vmem:[#allocation10 + $0x4e0] ss:$8 sps:$4 sm:$0xff]  }
 0x20e   : > { %2375 = vmatprep.subr.bf16.mxu0 %v6923_v16  ;;  %v7001_v16 = vld [vmem:[#allocation10 + $0x4d4] ss:$8 sps:$4 sm:$0xff]  }
 0x20f   : > { %2585 = vmatmul.mubr.bf16.vlgmr.msra.gmra.mxu1 %v8209_v60  ;;  %v6948_v60 = vld [vmem:[#allocation10 + $0x540] ss:$8 sps:$4 sm:$0xff]  }
 0x210   : > { %3043 = vmatpush1.bf16.msra.mxu1 %v6930_v0  ;;  %3074 = vmatprep.mubr.bf16.mxu1 %v2639_v22  ;;  %v6999_v0 = vld [vmem:[#allocation10 + $0x4d0] ss:$8 sps:$4 sm:$0xff]  }
 0x211   : > { %2376 = vmatpush2.bf16.msra.mxu0 %v6921_v51  ;;  %3044 = vmatprep.subr.bf16.mxu1 %v6938_v19  ;;  %v7016_v51 = vld [vmem:[#allocation10 + $0x594] ss:$8 sps:$4 sm:$0xff]   ;;  %v7014_v19 = vld [vmem:[#allocation10 + $0x590] ss:$8 sps:$4 sm:$0xff]  }
 0x212   : > { %2377 = vmatprep.subr.bf16.mxu0 %v6929_v52  ;;  %v7005_v52 = vld [vmem:[#allocation10 + $0x4c0] ss:$8 sps:$4 sm:$0xff]  }
 0x214   : > { %3045 = vmatpush1.bf16.msra.mxu1 %v6936_v42  ;;  %v7013_v42 = vld [vmem:[#allocation10 + $0x4b4] ss:$8 sps:$4 sm:$0xff]  }
 0x215   : > { %2378 = vmatpush2.bf16.msra.mxu0 %v6927_v41  ;;  %3046 = vmatprep.subr.bf16.mxu1 %v6944_v8  ;;  %v7020_v41 = vld [vmem:[#allocation10 + $0x580] ss:$8 sps:$4 sm:$0xff]   ;;  %v7011_v8 = vld [vmem:[#allocation10 + $0x4b0] ss:$8 sps:$4 sm:$0xff]  }
 0x216   : > { %2379 = vmatprep.subr.bf16.mxu0 %v6935_v20  ;;  %v7019_v20 = vld [vmem:[#allocation10 + $0x4a4] ss:$8 sps:$4 sm:$0xff]  }
 0x218   : > { %3047 = vmatpush1.bf16.msra.mxu1 %v6942_v56  ;;  %v7017_v56 = vld [vmem:[#allocation10 + $0x4a0] ss:$8 sps:$4 sm:$0xff]  }
 0x219   : > { %2380 = vmatpush2.bf16.msra.mxu0 %v6933_v21  ;;  %3048 = vmatprep.subr.bf16.mxu1 %v6950_v23  ;;  %v7025_v21 = vld [vmem:[#allocation10 + $0x494] ss:$8 sps:$4 sm:$0xff]   ;;  %v7023_v23 = vld [vmem:[#allocation10 + $0x490] ss:$8 sps:$4 sm:$0xff]  }
 0x21a   : > { %2802 = vmatprep.subr.bf16.mxu0 %v6941_v33  ;;  %v7028_v33 = vld [vmem:[#allocation10 + $0x484] ss:$8 sps:$4 sm:$0xff]  }
 0x21c   : > { %2382 = vmatmul.mubr.bf16.vlgmr.msra.gmra.mxu0 %v8227_v53  ;;  %3049 = vmatpush1.bf16.msra.mxu1 %v6948_v60  ;;  %v6957_v53 = vld [vmem:[#allocation10 + $0x440] ss:$8 sps:$4 sm:$0xff]  }
 0x21d   : > { %2803 = vmatpush1.bf16.msra.mxu0 %v6939_v37  ;;  %2834 = vmatprep.mubr.bf16.mxu0 %v2639_v22  ;;  %v7022_v22 = vld [vmem:[#allocation10 + $0x584] ss:$8 sps:$4 sm:$0xff]   ;;  %v7026_v60 = vld [vmem:[#allocation10 + $0x480] ss:$8 sps:$4 sm:$0xff]  }
 0x21e   : > { %2804 = vmatprep.subr.bf16.mxu0 %v6947_v58  ;;  %3050 = vmatprep.subr.bf16.mxu1 %v6956_v6  ;;  %v7029_v37 = vld [vmem:[#allocation13 + $0x2e0] ss:$16 sps:$4 sm:$0xff]   ;;  %v7031_v58 = vld [vmem:[#allocation13 + $0x2e4] ss:$16 sps:$4 sm:$0xff]   ;;  %v7032_v6 = vld [vmem:[#allocation13 + $0x2e8] ss:$16 sps:$4 sm:$0xff]  }
 0x220   : > { %3051 = vmatpush1.bf16.msra.mxu1 %v6954_v35  ;;  %v7034_v35 = vld [vmem:[#allocation13 + $0x2ec] ss:$16 sps:$4 sm:$0xff]  }
 0x221   : > { %2805 = vmatpush1.bf16.msra.mxu0 %v6945_v36  ;;  %3052 = vmatprep.subr.bf16.mxu1 %v6962_v24  ;;  %v7035_v36 = vld [vmem:[#allocation13 + $0x2c0] ss:$16 sps:$4 sm:$0xff]   ;;  %v7037_v24 = vld [vmem:[#allocation13 + $0x2c4] ss:$16 sps:$4 sm:$0xff]  }
 0x222   : > { %2806 = vmatprep.subr.bf16.mxu0 %v6953_v39  ;;  %v7038_v39 = vld [vmem:[#allocation13 + $0x2c8] ss:$16 sps:$4 sm:$0xff]  }
 0x224   : > { %3053 = vmatpush1.bf16.msra.mxu1 %v6960_v38  ;;  %v7040_v38 = vld [vmem:[#allocation13 + $0x2cc] ss:$16 sps:$4 sm:$0xff]  }
 0x225   : > { %2807 = vmatpush1.bf16.msra.mxu0 %v6951_v40  ;;  %3054 = vmatprep.subr.bf16.mxu1 %v6968_v57  ;;  %v7041_v40 = vld [vmem:[#allocation13 + $0x2a0] ss:$16 sps:$4 sm:$0xff]   ;;  %v7043_v57 = vld [vmem:[#allocation13 + $0x2a4] ss:$16 sps:$4 sm:$0xff]  }
 0x226   : > { %2808 = vmatprep.subr.bf16.mxu0 %v6959_v1  ;;  %v7044_v1 = vld [vmem:[#allocation13 + $0x2a8] ss:$16 sps:$4 sm:$0xff]  }
 0x228   : > { %3055 = vmatpush1.bf16.msra.mxu1 %v6966_v25  ;;  %v7049_v25 = vld [vmem:[#allocation13 + $0x284] ss:$16 sps:$4 sm:$0xff]  }
 0x229   : > { %2809 = vmatpush1.bf16.msra.mxu0 %v6957_v53  ;;  %3056 = vmatprep.subr.bf16.mxu1 %v6974_v26  ;;  %v7052_v53 = vld [vmem:[#allocation13 + $0x28c] ss:$16 sps:$4 sm:$0xff]   ;;  %v7047_v26 = vld [vmem:[#allocation13 + $0x280] ss:$16 sps:$4 sm:$0xff]  }
 0x22a   : > { %2810 = vmatprep.subr.bf16.mxu0 %v6965_v28  ;;  %v7050_v28 = vld [vmem:[#allocation13 + $0x288] ss:$16 sps:$4 sm:$0xff]  }
 0x22c   : > { %3057 = vmatpush1.bf16.msra.mxu1 %v6972_v43  ;;  %v7055_v43 = vld [vmem:[#allocation13 + $0x264] ss:$16 sps:$4 sm:$0xff]  }
 0x22d   : > { %2811 = vmatpush1.bf16.msra.mxu0 %v6963_v46  ;;  %3058 = vmatprep.subr.bf16.mxu1 %v6980_v2  ;;  %v7058_v46 = vld [vmem:[#allocation13 + $0x26c] ss:$16 sps:$4 sm:$0xff]   ;;  %v7053_v2 = vld [vmem:[#allocation13 + $0x260] ss:$16 sps:$4 sm:$0xff]  }
 0x22e   : > { %2812 = vmatprep.subr.bf16.mxu0 %v6971_v3  ;;  %v7056_v3 = vld [vmem:[#allocation13 + $0x268] ss:$16 sps:$4 sm:$0xff]  }
 0x230   : > { %3059 = vmatpush2.bf16.msra.mxu1 %v6978_v4  ;;  %v7061_v4 = vld [vmem:[#allocation13 + $0x244] ss:$16 sps:$4 sm:$0xff]  }
 0x231   : > { %2813 = vmatpush1.bf16.msra.mxu0 %v6969_v5  ;;  %3060 = vmatprep.subr.bf16.mxu1 %v6986_v61  ;;  %v7064_v5 = vld [vmem:[#allocation13 + $0x24c] ss:$16 sps:$4 sm:$0xff]   ;;  %v7059_v61 = vld [vmem:[#allocation13 + $0x240] ss:$16 sps:$4 sm:$0xff]  }
 0x232   : > { %2814 = vmatprep.subr.bf16.mxu0 %v6977_v62  ;;  %v7062_v62 = vld [vmem:[#allocation13 + $0x248] ss:$16 sps:$4 sm:$0xff]  }
 0x234   : > { %3061 = vmatpush2.bf16.msra.mxu1 %v6984_v9  ;;  %v7067_v9 = vld [vmem:[#allocation13 + $0x224] ss:$16 sps:$4 sm:$0xff]  }
 0x235   : > { %2815 = vmatpush1.bf16.msra.mxu0 %v6975_v27  ;;  %3062 = vmatprep.subr.bf16.mxu1 %v6992_v30  ;;  %v7070_v27 = vld [vmem:[#allocation13 + $0x22c] ss:$16 sps:$4 sm:$0xff]   ;;  %v7065_v30 = vld [vmem:[#allocation13 + $0x220] ss:$16 sps:$4 sm:$0xff]  }
 0x236   : > { %2816 = vmatprep.subr.bf16.mxu0 %v6983_v10  ;;  %v7068_v10 = vld [vmem:[#allocation13 + $0x228] ss:$16 sps:$4 sm:$0xff]  }
 0x238   : > { %3063 = vmatpush2.bf16.msra.mxu1 %v6990_v11  ;;  %v7073_v11 = vld [vmem:[#allocation13 + $0x204] ss:$16 sps:$4 sm:$0xff]  }
 0x239   : > { %2817 = vmatpush1.bf16.msra.mxu0 %v6981_v12  ;;  %3064 = vmatprep.subr.bf16.mxu1 %v6998_v13  ;;  %v7076_v12 = vld [vmem:[#allocation13 + $0x20c] ss:$16 sps:$4 sm:$0xff]   ;;  %v7071_v13 = vld [vmem:[#allocation13 + $0x200] ss:$16 sps:$4 sm:$0xff]  }
 0x23a   : > { %2818 = vmatprep.subr.bf16.mxu0 %v6989_v29  ;;  %v7074_v29 = vld [vmem:[#allocation13 + $0x208] ss:$16 sps:$4 sm:$0xff]  }
 0x23c   : > { %3065 = vmatpush2.bf16.msra.mxu1 %v6996_v32  ;;  %v7079_v32 = vld [vmem:[#allocation13 + $0x3e4] ss:$16 sps:$4 sm:$0xff]  }
 0x23d   : > { %2819 = vmatpush2.bf16.msra.mxu0 %v6987_v14  ;;  %3066 = vmatprep.subr.bf16.mxu1 %v7004_v31  ;;  %v7082_v14 = vld [vmem:[#allocation13 + $0x3ec] ss:$16 sps:$4 sm:$0xff]   ;;  %v7077_v31 = vld [vmem:[#allocation13 + $0x3e0] ss:$16 sps:$4 sm:$0xff]  }
 0x23e   : > { %2820 = vmatprep.subr.bf16.mxu0 %v6995_v34  ;;  %v7080_v34 = vld [vmem:[#allocation13 + $0x3e8] ss:$16 sps:$4 sm:$0xff]  }
 0x240   : > { %3067 = vmatpush2.bf16.msra.mxu1 %v7002_v44  ;;  %v7085_v44 = vld [vmem:[#allocation13 + $0x3c4] ss:$16 sps:$4 sm:$0xff]  }
 0x241   : > { %2821 = vmatpush2.bf16.msra.mxu0 %v6993_v49  ;;  %3068 = vmatprep.subr.bf16.mxu1 %v7010_v45  ;;  %v7088_v49 = vld [vmem:[#allocation13 + $0x3cc] ss:$16 sps:$4 sm:$0xff]   ;;  %v7083_v45 = vld [vmem:[#allocation13 + $0x3c0] ss:$16 sps:$4 sm:$0xff]  }
 0x242   : > { %2822 = vmatprep.subr.bf16.mxu0 %v7001_v16  ;;  %v7086_v16 = vld [vmem:[#allocation13 + $0x3c8] ss:$16 sps:$4 sm:$0xff]  }
 0x244   : > { %3069 = vmatpush2.bf16.msra.mxu1 %v7008_v17  ;;  %v7091_v17 = vld [vmem:[#allocation13 + $0x3a4] ss:$16 sps:$4 sm:$0xff]  }
 0x245   : > { %2823 = vmatpush2.bf16.msra.mxu0 %v6999_v0  ;;  %3070 = vmatprep.subr.bf16.mxu1 %v7016_v51  ;;  %v7094_v0 = vld [vmem:[#allocation13 + $0x3ac] ss:$16 sps:$4 sm:$0xff]   ;;  %v7089_v51 = vld [vmem:[#allocation13 + $0x3a0] ss:$16 sps:$4 sm:$0xff]  }
 0x246   : > { %2824 = vmatprep.subr.bf16.mxu0 %v7007_v18  ;;  %v7092_v18 = vld [vmem:[#allocation13 + $0x3a8] ss:$16 sps:$4 sm:$0xff]  }
 0x248   : > { %3071 = vmatpush2.bf16.msra.mxu1 %v7014_v19  ;;  %v7097_v19 = vld [vmem:[#allocation13 + $0x384] ss:$16 sps:$4 sm:$0xff]  }
 0x249   : > { %2825 = vmatpush2.bf16.msra.mxu0 %v7005_v52  ;;  %3072 = vmatprep.subr.bf16.mxu1 %v7022_v22  ;;  %v7100_v52 = vld [vmem:[#allocation13 + $0x38c] ss:$16 sps:$4 sm:$0xff]   ;;  %v7095_v22 = vld [vmem:[#allocation13 + $0x380] ss:$16 sps:$4 sm:$0xff]  }
 0x24a   : > { %2826 = vmatprep.subr.bf16.mxu0 %v7013_v42  ;;  %v7098_v42 = vld [vmem:[#allocation13 + $0x388] ss:$16 sps:$4 sm:$0xff]  }
 0x24c   : > { %3073 = vmatpush2.bf16.msra.mxu1 %v7020_v41  ;;  %v7103_v41 = vld [vmem:[#allocation13 + $0x364] ss:$16 sps:$4 sm:$0xff]  }
 0x24d   : > { %2827 = vmatpush2.bf16.msra.mxu0 %v7011_v8  ;;  %3752 = vmatprep.subr.bf16.mxu1 %v7034_v35  ;;  %v7106_v8 = vld [vmem:[#allocation13 + $0x36c] ss:$16 sps:$4 sm:$0xff]   ;;  %v7116_v35 = vld [vmem:[#allocation13 + $0x328] ss:$16 sps:$4 sm:$0xff]  }
 0x24e   : > { %2828 = vmatprep.subr.bf16.mxu0 %v7019_v20  ;;  %v7101_v20 = vld [vmem:[#allocation13 + $0x360] ss:$16 sps:$4 sm:$0xff]  }
 0x24f   : > { %3075 = vmatmul.mubr.bf16.vlgmr.msra.gmra.mxu1 %v8223_v48 }
 0x250   : > { %3753 = vmatpush1.bf16.msra.mxu1 %v7032_v6  ;;  %v7113_v6 = vld [vmem:[#allocation13 + $0x320] ss:$16 sps:$4 sm:$0xff]  }
 0x251   : > { %2829 = vmatpush2.bf16.msra.mxu0 %v7017_v56  ;;  %3754 = vmatprep.subr.bf16.mxu1 %v7040_v38  ;;  %v7104_v56 = vld [vmem:[#allocation13 + $0x368] ss:$16 sps:$4 sm:$0xff]  }
 0x252   : > { %2830 = vmatprep.subr.bf16.mxu0 %v7025_v21  ;;  %v7109_v21 = vld [vmem:[#allocation13 + $0x344] ss:$16 sps:$4 sm:$0xff]   ;;  %v7122_v38 = vld [vmem:[#allocation13 + $0x308] ss:$16 sps:$4 sm:$0xff]  }
 0x254   : > { %3755 = vmatpush1.bf16.msra.mxu1 %v7038_v39  ;;  %v7119_v39 = vld [vmem:[#allocation13 + $0x300] ss:$16 sps:$4 sm:$0xff]  }
 0x255   : > { %2831 = vmatpush2.bf16.msra.mxu0 %v7023_v23  ;;  %v7107_v23 = vld [vmem:[#allocation13 + $0x340] ss:$16 sps:$4 sm:$0xff]  }
 0x256   : > { %2832 = vmatprep.subr.bf16.mxu0 %v7028_v33  ;;  %v7110_v33 = vld [vmem:[#allocation13 + $0x348] ss:$16 sps:$4 sm:$0xff]  }
 0x259   : > { %2833 = vmatpush2.bf16.msra.mxu0 %v7026_v60  ;;  %v7112_v60 = vld [vmem:[#allocation13 + $0x34c] ss:$16 sps:$4 sm:$0xff]  }
 0x25a   : > { %3711 = vmatprep.subr.bf16.mxu0 %v7031_v58  ;;  %v7118_v58 = vld [vmem:[#allocation13 + $0x32c] ss:$16 sps:$4 sm:$0xff]  }
 0x25c   : > { %2835 = vmatmul.mubr.bf16.vlgmr.msra.gmra.mxu0 %v8223_v48  ;;  %v7046_v48 = vld [vmem:[#allocation13 + $0x2ac] ss:$16 sps:$4 sm:$0xff]  }
 0x25d   : > { %3712 = vmatpush1.bf16.msra.mxu0 %v7029_v37  ;;  %3756 = vmatprep.subr.bf16.mxu1 %v7046_v48  ;;  %v7115_v37 = vld [vmem:[#allocation13 + $0x324] ss:$16 sps:$4 sm:$0xff]  }
 0x25e   : > { %3713 = vmatprep.subr.bf16.mxu0 %v7037_v24  ;;  %3757 = vmatpush1.bf16.msra.mxu1 %v7044_v1  ;;  %v7124_v24 = vld [vmem:[#allocation13 + $0x30c] ss:$16 sps:$4 sm:$0xff]  }
 0x25f   : > { %3758 = vmatprep.subr.bf16.mxu1 %v7052_v53 }
 0x261   : > { %3714 = vmatpush1.bf16.msra.mxu0 %v7035_v36  ;;  %v7121_v36 = vld [vmem:[#allocation13 + $0x304] ss:$16 sps:$4 sm:$0xff]  }
 0x262   : > { %3715 = vmatprep.subr.bf16.mxu0 %v7043_v57  ;;  %3759 = vmatpush1.bf16.msra.mxu1 %v7050_v28  ;;  %v7130_v57 = vld [vmem:[#allocation13 + $0xec] ss:$16 sps:$4 sm:$0xff]  }
 0x263   : > { %3760 = vmatprep.subr.bf16.mxu1 %v7058_v46 }
 0x265   : > { %3716 = vmatpush1.bf16.msra.mxu0 %v7041_v40  ;;  %v7127_v40 = vld [vmem:[#allocation13 + $0xe4] ss:$16 sps:$4 sm:$0xff]  }
 0x266   : > { %3717 = vmatprep.subr.bf16.mxu0 %v7049_v25  ;;  %3761 = vmatpush1.bf16.msra.mxu1 %v7056_v3 }
 0x267   : > { %3762 = vmatprep.subr.bf16.mxu1 %v7064_v5 }
 0x269   : > { %3718 = vmatpush1.bf16.msra.mxu0 %v7047_v26 }
 0x26a   : > { %3719 = vmatprep.subr.bf16.mxu0 %v7055_v43  ;;  %3763 = vmatpush1.bf16.msra.mxu1 %v7062_v62 }
 0x26b   : > { %3764 = vmatprep.subr.bf16.mxu1 %v7070_v27 }
 0x26d   : > { %3720 = vmatpush1.bf16.msra.mxu0 %v7053_v2 }
 0x26e   : > { %3721 = vmatprep.subr.bf16.mxu0 %v7061_v4  ;;  %3765 = vmatpush1.bf16.msra.mxu1 %v7068_v10 }
 0x26f   : > { %3766 = vmatprep.subr.bf16.mxu1 %v7076_v12 }
 0x271   : > { %3722 = vmatpush1.bf16.msra.mxu0 %v7059_v61 }
 0x272   : > { %3723 = vmatprep.subr.bf16.mxu0 %v7067_v9  ;;  %3767 = vmatpush1.bf16.msra.mxu1 %v7074_v29 }
 0x273   : > { %3768 = vmatprep.subr.bf16.mxu1 %v7082_v14 }
 0x275   : > { %3724 = vmatpush1.bf16.msra.mxu0 %v7065_v30  ;;  %v3149_v30 = vld [vmem:[#allocation11] sm:$0x3] }
 0x276   : > { %3725 = vmatprep.subr.bf16.mxu0 %v7073_v11  ;;  %3769 = vmatpush2.bf16.msra.mxu1 %v7080_v34  ;;  %v3154_v12 = vrot.slane %v3149_v30, %v8121_v54 }
 0x277   : > { %3770 = vmatprep.subr.bf16.mxu1 %v7088_v49 }
 0x279   : > { %3726 = vmatpush1.bf16.msra.mxu0 %v7071_v13  ;;  %v3158_v13 = vrot.slane %v3149_v30, %v8124_v55 }
 0x27a   : > { %3727 = vmatprep.subr.bf16.mxu0 %v7079_v32  ;;  %3771 = vmatpush2.bf16.msra.mxu1 %v7086_v16 }
 0x27b   : > { %3772 = vmatprep.subr.bf16.mxu1 %v7094_v0  ;;  %v3159_v16 = vcombine.low %v3154_v12, %v3158_v13 }
 0x27d   : > { %3728 = vmatpush2.bf16.msra.mxu0 %v7077_v31 }
 0x27e   : > { %3729 = vmatprep.subr.bf16.mxu0 %v7085_v44  ;;  %3773 = vmatpush2.bf16.msra.mxu1 %v7092_v18 }
 0x27f   : > { %3774 = vmatprep.subr.bf16.mxu1 %v7100_v52 }
 0x281   : > { %3730 = vmatpush2.bf16.msra.mxu0 %v7083_v45 }
 0x282   : > { %3731 = vmatprep.subr.bf16.mxu0 %v7091_v17  ;;  %3775 = vmatpush2.bf16.msra.mxu1 %v7098_v42 }
 0x283   : > { %3776 = vmatprep.subr.bf16.mxu1 %v7106_v8 }
 0x285   : > { %3732 = vmatpush2.bf16.msra.mxu0 %v7089_v51 }
 0x286   : > { %3733 = vmatprep.subr.bf16.mxu0 %v7097_v19  ;;  %3777 = vmatpush2.bf16.msra.mxu1 %v7104_v56 }
 0x287   : > { %3778 = vmatprep.subr.bf16.mxu1 %v7112_v60  ;;  %v3160_v60 = vcombine.high %v3154_v12, %v3158_v13 }
 0x289   : > { %3734 = vmatpush2.bf16.msra.mxu0 %v7095_v22 }
 0x28a   : > { %3735 = vmatprep.subr.bf16.mxu0 %v7103_v41  ;;  %3779 = vmatpush2.bf16.msra.mxu1 %v7110_v33 }
 0x28b   : > { %3780 = vmatprep.subr.bf16.mxu1 %v7118_v58 }
 0x28d   : > { %3736 = vmatpush2.bf16.msra.mxu0 %v7101_v20 }
 0x28e   : > { %3737 = vmatprep.subr.bf16.mxu0 %v7109_v21  ;;  %3781 = vmatpush2.bf16.msra.mxu1 %v7116_v35 }
 0x28f   : > { %3782 = vmatprep.subr.bf16.mxu1 %v7124_v24  ;;  %v2147_v1 = vpop.f32.mrf.mxu1 }
 0x291   : > { %3738 = vmatpush2.bf16.msra.mxu0 %v7107_v23  ;;  %v2149_v48 = vpop.f32.mrf.mxu1  ;;  %v3167_v23 = vrot.slane %v3159_v16, %v8131_v7 }
 0x292   : > { %3739 = vmatprep.subr.bf16.mxu0 %v7115_v37  ;;  %3783 = vmatpush2.bf16.msra.mxu1 %v7122_v38 }
 0x293   : > { %4158 = vmatprep.subr.bf16.mxu1 %v7130_v57  ;;  %v2151_v25 = vpop.f32.mrf.mxu1  ;;  %v3174_v57 = vrot.slane %v3160_v60, %v8131_v7 }
 0x295   : > { %3740 = vmatpush2.bf16.msra.mxu0 %v7113_v6  ;;  %v2153_v26 = vpop.f32.mrf.mxu1 }
 0x296   : > { %3741 = vmatprep.subr.bf16.mxu0 %v7121_v36 }
 0x299   : > { %3742 = vmatpush2.bf16.msra.mxu0 %v7119_v39 }
 0x29a   : > { %4117 = vmatprep.subr.bf16.mxu0 %v7127_v40  ;;  %v3175_v40 = vcombine.high %v3167_v23, %v3167_v23 }
 0x29c   : > { %v1942_v53 = vpop.f32.mrf.mxu0 }
 0x29d   : > { %v2148_v29 = vadd.f32 %v2147_v1, %v1942_v53 }
 0x29e   : > { %v1944_v28 = vpop.f32.mrf.mxu0 }
 0x29f   : > { %v2150_v31 = vadd.f32 %v2149_v48, %v1944_v28 }
 0x2a0   : > { %v1946_v46 = vpop.f32.mrf.mxu0 }
 0x2a1   : > { %v2152_v17 = vadd.f32 %v2151_v25, %v1946_v46 }
 0x2a2   : > { %v1948_v3 = vpop.f32.mrf.mxu0 }
 0x2a3   : > { %v2154_v19 = vadd.f32 %v2153_v26, %v1948_v3 }
 0x2cf   : > { %v2586_v43 = vpop.f32.mrf.mxu1 }
 0x2d1   : > { %v2588_v2 = vpop.f32.mrf.mxu1 }
 0x2d3   : > { %v2590_v4 = vpop.f32.mrf.mxu1 }
 0x2d5   : > { %v2592_v61 = vpop.f32.mrf.mxu1 }
 0x2dc   : > { %v2383_v5 = vpop.f32.mrf.mxu0 }
 0x2dd   : > { %v2587_v34 = vadd.f32 %v2586_v43, %v2383_v5 }
 0x2de   : > { %v2385_v62 = vpop.f32.mrf.mxu0 }
 0x2df   : > { %v2589_v44 = vadd.f32 %v2588_v2, %v2385_v62  ;;  %v3176_v2 = vcombine.high %v3174_v57, %v3174_v57 }
 0x2e0   : > { %v2387_v27 = vpop.f32.mrf.mxu0 }
 0x2e1   : > { %v2591_v52 = vadd.f32 %v2590_v4, %v2387_v27 }
 0x2e2   : > { %v2389_v11 = vpop.f32.mrf.mxu0 }
 0x2e3   : > { %v2593_v41 = vadd.f32 %v2592_v61, %v2389_v11 }
 0x30f   : > { %v3076_v9 = vpop.f32.mrf.mxu1 }
 0x310   : > { %v3085_v0 = vadd.f32 %v3076_v9, %v2587_v34 }
 0x311   : > { %v3078_v10 = vpop.f32.mrf.mxu1 }
 0x312   : > { %v3086_v51 = vadd.f32 %v3078_v10, %v2589_v44 }
 0x313   : > { %v3080_v32 = vpop.f32.mrf.mxu1 }
 0x314   : > { %v3087_v21 = vadd.f32 %v3080_v32, %v2591_v52 }
 0x315   : > { %v3082_v22 = vpop.f32.mrf.mxu1 }
 0x316   : > { %v3088_v37 = vadd.f32 %v3082_v22, %v2593_v41 }
 0x31c   : > { %v2836_v14 = vpop.f32.mrf.mxu0 }
 0x31d   : > { %v2845_v49 = vadd.f32 %v2836_v14, %v2148_v29 }
 0x31e   : > { %v2838_v45 = vpop.f32.mrf.mxu0 }
 0x31f   : > { %v2846_v18 = vadd.f32 %v2838_v45, %v2150_v31  ;;  %v3089_v8 = vmax.f32 %v2845_v49, %v3085_v0  ;;  %v3230_v0 = vld [vmem:[#allocation4 + $0x8] sm:$0xff] }
 0x320   : > { %v2840_v42 = vpop.f32.mrf.mxu0 }
 0x321   : > { %v3090_v20 = vmax.f32 %v2846_v18, %v3086_v51  ;;  %v2847_v56 = vadd.f32 %v2840_v42, %v2152_v17  ;;  %v3233_v51 = vld [vmem:[#allocation4] sm:$0x11] }
 0x322   : > { %v2842_v33 = vpop.f32.mrf.mxu0 }
 0x323   : > { %v3097_v58 = vcombine.low %v3089_v8, %v3090_v20  ;;  %v3098_v6 = vcombine.high %v3089_v8, %v3090_v20  ;;  %v2848_v35 = vadd.f32 %v2842_v33, %v2154_v19  ;;  %v3091_v39 = vmax.f32 %v2847_v56, %v3087_v21  ;;  %v7128_v33 = vld [vmem:[#allocation13 + $0xe8] ss:$16 sps:$4 sm:$0xff]  }
 0x325   : > { %v3111_v36 = vrot.slane %v3097_v58, %v8142_v15  ;;  %v3118_v24 = vrot.slane %v3098_v6, %v8142_v15  ;;  %v3092_v38 = vmax.f32 %v2848_v35, %v3088_v37  ;;  %v7133_v37 = vld [vmem:[#allocation13 + $0xc4] ss:$16 sps:$4 sm:$0xff]   ;;  %v7136_v58 = vld [vmem:[#allocation13 + $0xcc] ss:$16 sps:$4 sm:$0xff]   ;;  %v7131_v35 = vld [vmem:[#allocation13 + $0xc0] ss:$16 sps:$4 sm:$0xff]  }
 0x327   : > { %v3137_v1 = vrot.slane %v3111_v36, 4  ;;  %v3138_v48 = vrot.slane %v3118_v24, 4  ;;  %v3099_v25 = vcombine.low %v3091_v39, %v3092_v38  ;;  %v3100_v53 = vcombine.high %v3091_v39, %v3092_v38  ;;  %v7142_v39 = vld [vmem:[#allocation13 + $0xac] ss:$16 sps:$4 sm:$0xff]   ;;  %v7137_v38 = vld [vmem:[#allocation13 + $0xa0] ss:$16 sps:$4 sm:$0xff]  }
 0x329   : > { %v3145_v26 = vmax.f32 %v3111_v36, %v3137_v1  ;;  %v3146_v28 = vmax.f32 %v3118_v24, %v3138_v48  ;;  %v3125_v43 = vrot.slane %v3099_v25, %v8142_v15  ;;  %v3132_v46 = vrot.slane %v3100_v53, %v8142_v15  ;;  %v7134_v36 = vld [vmem:[#allocation13 + $0xc8] ss:$16 sps:$4 sm:$0xff]   ;;  %v7139_v24 = vld [vmem:[#allocation13 + $0xa4] ss:$16 sps:$4 sm:$0xff]   ;;  %v7148_v1 = vld [vmem:[#allocation13 + $0x8c] ss:$16 sps:$4 sm:$0xff]  }
 0x32a   : > { %v7143_v48 = vld [vmem:[#allocation13 + $0x80] ss:$16 sps:$4 sm:$0xff]   ;;  %v7146_v25 = vld [vmem:[#allocation13 + $0x88] ss:$16 sps:$4 sm:$0xff]   ;;  %v7151_v53 = vld [vmem:[#allocation13 + $0x64] ss:$16 sps:$4 sm:$0xff]  }
 0x32b   : > { %v3181_v3 = vadd.f32 %v3167_v23, %v3145_v26  ;;  %v3182_v4 = vadd.f32 %v3175_v40, %v3146_v28  ;;  %v3139_v5 = vrot.slane %v3125_v43, 4  ;;  %v3140_v61 = vrot.slane %v3132_v46, 4  ;;  %v7140_v40 = vld [vmem:[#allocation13 + $0xa8] ss:$16 sps:$4 sm:$0xff]   ;;  %v7154_v26 = vld [vmem:[#allocation13 + $0x6c] ss:$16 sps:$4 sm:$0xff]  }
 0x32c   : > { %v7149_v28 = vld [vmem:[#allocation13 + $0x60] ss:$16 sps:$4 sm:$0xff]  }
 0x32d   : > { %v3185_v62 = vmax.f32 %v3181_v3, 0.0  ;;  %v3186_v9 = vmax.f32 %v3182_v4, 0.0  ;;  %v3147_v27 = vmax.f32 %v3125_v43, %v3139_v5  ;;  %v3148_v30 = vmax.f32 %v3132_v46, %v3140_v61  ;;  %v7152_v43 = vld [vmem:[#allocation13 + $0x68] ss:$16 sps:$4 sm:$0xff]   ;;  %v7157_v46 = vld [vmem:[#allocation13 + $0x44] ss:$16 sps:$4 sm:$0xff]  }
 0x32e   : > { %v7155_v3 = vld [vmem:[#allocation13 + $0x40] ss:$16 sps:$4 sm:$0xff]   ;;  %v7158_v4 = vld [vmem:[#allocation13 + $0x48] ss:$16 sps:$4 sm:$0xff]   ;;  %v7163_v5 = vld [vmem:[#allocation13 + $0x24] ss:$16 sps:$4 sm:$0xff]  }
 0x32f   : > { %v3183_v10 = vadd.f32 %v3174_v57, %v3147_v27  ;;  %v3184_v11 = vadd.f32 %v3176_v2, %v3148_v30  ;;  %v3193_v12 = vcombine.low %v3185_v62, %v3186_v9  ;;  %v7145_v57 = vld [vmem:[#allocation13 + $0x84] ss:$16 sps:$4 sm:$0xff]   ;;  %v7160_v2 = vld [vmem:[#allocation13 + $0x4c] ss:$16 sps:$4 sm:$0xff]   ;;  %v7161_v62 = vld [vmem:[#allocation13 + $0x20] ss:$16 sps:$4 sm:$0xff]  }
 0x330   : > { %v7166_v61 = vld [vmem:[#allocation13 + $0x2c] ss:$16 sps:$4 sm:$0xff]   ;;  %v7164_v9 = vld [vmem:[#allocation13 + $0x28] ss:$16 sps:$4 sm:$0xff]   ;;  %v7169_v27 = vld [vmem:[#allocation13 + $0x4] ss:$16 sps:$4 sm:$0xff]  }
 0x331   : > { %v3187_v13 = vmax.f32 %v3183_v10, 0.0  ;;  %v3188_v29 = vmax.f32 %v3184_v11, 0.0  ;;  %v3201_v14 = vrot.slane %v3193_v12, %v8131_v7  ;;  %v7172_v30 = vld [vmem:[#allocation13 + $0xc] ss:$16 sps:$4 sm:$0xff]   ;;  %v7167_v10 = vld [vmem:[#allocation13] ss:$16 sps:$4 sm:$0xff]  }
 0x332   : > { %v7170_v11 = vld [vmem:[#allocation13 + $0x8] ss:$16 sps:$4 sm:$0xff]   ;;  %v7175_v12 = vld [vmem:[#allocation13 + $0x1e4] ss:$16 sps:$4 sm:$0xff]  }
 0x333   : > { %v3194_v32 = vcombine.low %v3187_v13, %v3188_v29  ;;  %v7178_v13 = vld [vmem:[#allocation13 + $0x1ec] ss:$16 sps:$4 sm:$0xff]   ;;  %v7173_v29 = vld [vmem:[#allocation13 + $0x1e0] ss:$16 sps:$4 sm:$0xff]  }
 0x335   : > { %v3208_v31 = vrot.slane %v3194_v32, %v8131_v7  ;;  %v7176_v32 = vld [vmem:[#allocation13 + $0x1e8] ss:$16 sps:$4 sm:$0xff]  }
 0x337   : > { %v3209_v34 = vcombine.low %v3201_v14, %v3208_v31  ;;  %v3210_v44 = vcombine.high %v3201_v14, %v3208_v31  ;;  %v7181_v14 = vld [vmem:[#allocation13 + $0x1c4] ss:$16 sps:$4 sm:$0xff]   ;;  %v7184_v31 = vld [vmem:[#allocation13 + $0x1cc] ss:$16 sps:$4 sm:$0xff]  }
 0x339   : > { %v6520_v49 = vpack.c.bf16 %v3210_v44, %v3209_v34  ;;  %v7179_v34 = vld [vmem:[#allocation13 + $0x1c0] ss:$16 sps:$4 sm:$0xff]   ;;  %v7182_v44 = vld [vmem:[#allocation13 + $0x1c8] ss:$16 sps:$4 sm:$0xff]  }
 0x33b   : > { %v3221_v45 = vshrl.u32 %v6520_v49, 16  ;;  %v3224_v17 = vshll.u32 %v6520_v49, 16  ;;  %v7187_v49 = vld [vmem:[#allocation13 + $0x1a4] ss:$16 sps:$4 sm:$0xff]  }
 0x33d   : > { %v3223_v16 = vrot.slane %v3221_v45, 7  ;;  %v7190_v45 = vld [vmem:[#allocation13 + $0x1ac] ss:$16 sps:$4 sm:$0xff]  }
 0x33f   : > { %v3226_v18 = vor.u32 %v3224_v17, %v3223_v16  ;;  %v3227_v19 = vrot.slane %v3223_v16, 4  ;;  %v7185_v16 = vld [vmem:[#allocation13 + $0x1a0] ss:$16 sps:$4 sm:$0xff]   ;;  %v7188_v17 = vld [vmem:[#allocation13 + $0x1a8] ss:$16 sps:$4 sm:$0xff]  }
 0x341   : > { %v8253_v52 = vsel %vm1600_vm3, %v3226_v18, %v3230_v0  ;;  %v3234_v7 = vsel %vm8079_vm4, %v3227_v19, %v3233_v51  ;;  %v7193_v0 = vld [vmem:[#allocation13 + $0x184] ss:$16 sps:$4 sm:$0xff]   ;;  %v7196_v51 = vld [vmem:[#allocation13 + $0x18c] ss:$16 sps:$4 sm:$0xff]   ;;  %v7191_v18 = vld [vmem:[#allocation13 + $0x180] ss:$16 sps:$4 sm:$0xff]  }
 0x342   : > { %3232 = vst [vmem:[#allocation4 + $0x8] sm:$0xff] %v8253_v52  ;;  %3235 = vst [vmem:[#allocation4] sm:$0x11] %v3234_v7  ;;  %v6255_v6 = vcombine.high %v8253_v52, %v8253_v52  ;;  %v7194_v19 = vld [vmem:[#allocation13 + $0x188] ss:$16 sps:$4 sm:$0xff]  }
 0x343   : > { %v7199_v7 = vld [vmem:[#allocation13 + $0x164] ss:$16 sps:$4 sm:$0xff]  }
 0x349   : > { %v8258_v22 = vld [vmem:[#allocation4] sm:$0x11] }
 0x34a   : > { %v6189_v42 = vcombine.high %v8253_v52, %v8258_v22  ;;  %v6188_v41 = vcombine.low %v8253_v52, %v8258_v22 }
 0x34c   : > { %v3385_v59 = vshll.u32 %v6189_v42, 16  ;;  %v3378_v8 = vshll.u32 %v6188_v41, 16  ;;  %v3383_v63 = vshrl.u32 %v6189_v42, 16  ;;  %v3376_v56 = vshrl.u32 %v6188_v41, 16  ;;  %v7202_v42 = vld [vmem:[#allocation13 + $0x16c] ss:$16 sps:$4 sm:$0xff]  }
 0x34d   : > { %v7197_v41 = vld [vmem:[#allocation13 + $0x160] ss:$16 sps:$4 sm:$0xff]  }
 0x34e   : > { %v3387_v20 = vrot.slane %v3385_v59, 1  ;;  %v3380_v21 = vrot.slane %v3378_v8, 1  ;;  %v7200_v59 = vld [vmem:[#allocation13 + $0x168] ss:$16 sps:$4 sm:$0xff]   ;;  %v7205_v8 = vld [vmem:[#allocation13 + $0x144] ss:$16 sps:$4 sm:$0xff]  }
 0x350   : > { %v3388_v23 = vor.u32 %v3387_v20, %v3383_v63  ;;  %v3381_v60 = vor.u32 %v3380_v21, %v3376_v56  ;;  %v7208_v63 = vld [vmem:[#allocation13 + $0x14c] ss:$16 sps:$4 sm:$0xff]   ;;  %v7203_v20 = vld [vmem:[#allocation13 + $0x140] ss:$16 sps:$4 sm:$0xff]   ;;  %v7206_v56 = vld [vmem:[#allocation13 + $0x148] ss:$16 sps:$4 sm:$0xff]  }
 0x351   : > { %v7211_v21 = vld [vmem:[#allocation13 + $0x124] ss:$16 sps:$4 sm:$0xff]  }
 0x352   : > { %3743 = vmatprep.mubr.bf16.mxu0 %v3388_v23  ;;  %3784 = vmatprep.mubr.bf16.mxu1 %v3388_v23  ;;  %v7214_v23 = vld [vmem:[#allocation13 + $0x12c] ss:$16 sps:$4 sm:$0xff]  }
 0x353   : > { %3744 = vmatmul.mubr.bf16.vlgmr.msra.gmra.mxu0 %v3381_v60  ;;  %3785 = vmatmul.mubr.bf16.vlgmr.msra.gmra.mxu1 %v3381_v60  ;;  %v7217_v60 = vld [vmem:[#allocation13 + $0x104] ss:$16 sps:$4 sm:$0xff]  }
 0x354   : > { %4118 = vmatpush1.bf16.msra.mxu0 %v7125_v47  ;;  %4159 = vmatpush1.bf16.msra.mxu1 %v7128_v33  ;;  %v7209_v47 = vld [vmem:[#allocation13 + $0x120] ss:$16 sps:$4 sm:$0xff]   ;;  %v7212_v33 = vld [vmem:[#allocation13 + $0x128] ss:$16 sps:$4 sm:$0xff]  }
 0x355   : > { %4149 = vmatprep.mubr.bf16.mxu0 %v6255_v6  ;;  %4190 = vmatprep.mubr.bf16.mxu1 %v6255_v6  ;;  %v7215_v6 = vld [vmem:[#allocation13 + $0x100] ss:$16 sps:$4 sm:$0xff]  }
 0x356   : > { %4119 = vmatprep.subr.bf16.mxu0 %v7133_v37  ;;  %4160 = vmatprep.subr.bf16.mxu1 %v7136_v58  ;;  %v7220_v37 = vld [vmem:[#allocation13 + $0x10c] ss:$16 sps:$4 sm:$0xff]  }
 0x357   : > { %v8266_v58 = vld [vmem:[#allocation4 + $0x8] sm:$0xee] }
 0x358   : > { %4120 = vmatpush1.bf16.msra.mxu0 %v7131_v35  ;;  %4161 = vmatpush1.bf16.msra.mxu1 %v7134_v36  ;;  %v7218_v35 = vld [vmem:[#allocation13 + $0x108] ss:$16 sps:$4 sm:$0xff]   ;;  %v7223_v36 = vld [vmem:[#allocation13 + $0x4e4] ss:$16 sps:$4 sm:$0xff]  }
 0x359   : > { %4121 = vmatprep.subr.bf16.mxu0 %v7139_v24  ;;  %4162 = vmatprep.subr.bf16.mxu1 %v7142_v39  ;;  %v7226_v24 = vld [vmem:[#allocation13 + $0x4ec] ss:$16 sps:$4 sm:$0xff]   ;;  %v6321_v39 = vcombine.high %v8266_v58, %v8258_v22 }
 0x35c   : > { %4122 = vmatpush1.bf16.msra.mxu0 %v7137_v38  ;;  %4163 = vmatpush1.bf16.msra.mxu1 %v7140_v40  ;;  %v7221_v38 = vld [vmem:[#allocation13 + $0x4e0] ss:$16 sps:$4 sm:$0xff]   ;;  %v6254_v40 = vcombine.low %v8253_v52, %v8253_v52 }
 0x35d   : > { %4123 = vmatprep.subr.bf16.mxu0 %v7145_v57  ;;  %4164 = vmatprep.subr.bf16.mxu1 %v7148_v1  ;;  %v7224_v57 = vld [vmem:[#allocation13 + $0x4e8] ss:$16 sps:$4 sm:$0xff]   ;;  %v4271_v1 = vrot.slane %v6321_v39, 1  ;;  %v7235_v52 = vld [vmem:[#allocation13 + $0x4a0] ss:$16 sps:$4 sm:$0xff]  }
 0x35e   : > { %v7312_v39 = vld [vmem:[#allocation13 + $0x52c] ss:$16 sps:$4 sm:$0xff]  }
 0x360   : > { %4124 = vmatpush1.bf16.msra.mxu0 %v7143_v48  ;;  %4165 = vmatpush1.bf16.msra.mxu1 %v7146_v25  ;;  %v7231_v48 = vld [vmem:[#allocation13 + $0x4c4] ss:$16 sps:$4 sm:$0xff]   ;;  %v7234_v25 = vld [vmem:[#allocation13 + $0x4cc] ss:$16 sps:$4 sm:$0xff]  }
 0x361   : > { %4125 = vmatprep.subr.bf16.mxu0 %v7151_v53  ;;  %4166 = vmatprep.subr.bf16.mxu1 %v7154_v26  ;;  %v7229_v53 = vld [vmem:[#allocation13 + $0x4c0] ss:$16 sps:$4 sm:$0xff]   ;;  %v7232_v26 = vld [vmem:[#allocation13 + $0x4c8] ss:$16 sps:$4 sm:$0xff]  }
 0x364   : > { %4126 = vmatpush1.bf16.msra.mxu0 %v7149_v28  ;;  %4167 = vmatpush1.bf16.msra.mxu1 %v7152_v43  ;;  %v7237_v28 = vld [vmem:[#allocation13 + $0x4a4] ss:$16 sps:$4 sm:$0xff]   ;;  %v7240_v43 = vld [vmem:[#allocation13 + $0x4ac] ss:$16 sps:$4 sm:$0xff]  }
 0x365   : > { %4127 = vmatprep.subr.bf16.mxu0 %v7157_v46  ;;  %4168 = vmatprep.subr.bf16.mxu1 %v7160_v2  ;;  %v7238_v46 = vld [vmem:[#allocation13 + $0x4a8] ss:$16 sps:$4 sm:$0xff]   ;;  %v7243_v2 = vld [vmem:[#allocation13 + $0x484] ss:$16 sps:$4 sm:$0xff]  }
 0x368   : > { %4128 = vmatpush1.bf16.msra.mxu0 %v7155_v3  ;;  %4169 = vmatpush1.bf16.msra.mxu1 %v7158_v4  ;;  %v7246_v3 = vld [vmem:[#allocation13 + $0x48c] ss:$16 sps:$4 sm:$0xff]   ;;  %v7241_v4 = vld [vmem:[#allocation13 + $0x480] ss:$16 sps:$4 sm:$0xff]  }
 0x369   : > { %4129 = vmatprep.subr.bf16.mxu0 %v7163_v5  ;;  %4170 = vmatprep.subr.bf16.mxu1 %v7166_v61  ;;  %v7244_v5 = vld [vmem:[#allocation13 + $0x488] ss:$16 sps:$4 sm:$0xff]   ;;  %v7249_v61 = vld [vmem:[#allocation13 + $0x464] ss:$16 sps:$4 sm:$0xff]  }
 0x36c   : > { %4130 = vmatpush1.bf16.msra.mxu0 %v7161_v62  ;;  %4171 = vmatpush1.bf16.msra.mxu1 %v7164_v9  ;;  %v7252_v62 = vld [vmem:[#allocation13 + $0x46c] ss:$16 sps:$4 sm:$0xff]   ;;  %v7247_v9 = vld [vmem:[#allocation13 + $0x460] ss:$16 sps:$4 sm:$0xff]  }
 0x36d   : > { %4131 = vmatprep.subr.bf16.mxu0 %v7169_v27  ;;  %4172 = vmatprep.subr.bf16.mxu1 %v7172_v30  ;;  %v7250_v27 = vld [vmem:[#allocation13 + $0x468] ss:$16 sps:$4 sm:$0xff]   ;;  %v7255_v30 = vld [vmem:[#allocation13 + $0x444] ss:$16 sps:$4 sm:$0xff]  }
 0x370   : > { %4132 = vmatpush1.bf16.msra.mxu0 %v7167_v10  ;;  %4173 = vmatpush1.bf16.msra.mxu1 %v7170_v11  ;;  %v7258_v10 = vld [vmem:[#allocation13 + $0x44c] ss:$16 sps:$4 sm:$0xff]   ;;  %v7253_v11 = vld [vmem:[#allocation13 + $0x440] ss:$16 sps:$4 sm:$0xff]  }
 0x371   : > { %4133 = vmatprep.subr.bf16.mxu0 %v7175_v12  ;;  %4174 = vmatprep.subr.bf16.mxu1 %v7178_v13  ;;  %v7256_v12 = vld [vmem:[#allocation13 + $0x448] ss:$16 sps:$4 sm:$0xff]   ;;  %v7261_v13 = vld [vmem:[#allocation13 + $0x424] ss:$16 sps:$4 sm:$0xff]  }
 0x374   : > { %4134 = vmatpush2.bf16.msra.mxu0 %v7173_v29  ;;  %4175 = vmatpush2.bf16.msra.mxu1 %v7176_v32  ;;  %v7264_v29 = vld [vmem:[#allocation13 + $0x42c] ss:$16 sps:$4 sm:$0xff]   ;;  %v7259_v32 = vld [vmem:[#allocation13 + $0x420] ss:$16 sps:$4 sm:$0xff]  }
 0x375   : > { %4135 = vmatprep.subr.bf16.mxu0 %v7181_v14  ;;  %4176 = vmatprep.subr.bf16.mxu1 %v7184_v31  ;;  %v7262_v14 = vld [vmem:[#allocation13 + $0x428] ss:$16 sps:$4 sm:$0xff]   ;;  %v7267_v31 = vld [vmem:[#allocation13 + $0x404] ss:$16 sps:$4 sm:$0xff]  }
 0x378   : > { %4136 = vmatpush2.bf16.msra.mxu0 %v7179_v34  ;;  %4177 = vmatpush2.bf16.msra.mxu1 %v7182_v44  ;;  %v7270_v34 = vld [vmem:[#allocation13 + $0x40c] ss:$16 sps:$4 sm:$0xff]   ;;  %v7265_v44 = vld [vmem:[#allocation13 + $0x400] ss:$16 sps:$4 sm:$0xff]  }
 0x379   : > { %4137 = vmatprep.subr.bf16.mxu0 %v7187_v49  ;;  %4178 = vmatprep.subr.bf16.mxu1 %v7190_v45  ;;  %v7268_v49 = vld [vmem:[#allocation13 + $0x408] ss:$16 sps:$4 sm:$0xff]   ;;  %v7273_v45 = vld [vmem:[#allocation13 + $0x5e4] ss:$16 sps:$4 sm:$0xff]  }
 0x37c   : > { %4138 = vmatpush2.bf16.msra.mxu0 %v7185_v16  ;;  %4179 = vmatpush2.bf16.msra.mxu1 %v7188_v17  ;;  %v7276_v16 = vld [vmem:[#allocation13 + $0x5ec] ss:$16 sps:$4 sm:$0xff]   ;;  %v7271_v17 = vld [vmem:[#allocation13 + $0x5e0] ss:$16 sps:$4 sm:$0xff]  }
 0x37d   : > { %4139 = vmatprep.subr.bf16.mxu0 %v7193_v0  ;;  %4180 = vmatprep.subr.bf16.mxu1 %v7196_v51  ;;  %v7274_v0 = vld [vmem:[#allocation13 + $0x5e8] ss:$16 sps:$4 sm:$0xff]   ;;  %v7279_v51 = vld [vmem:[#allocation13 + $0x5c4] ss:$16 sps:$4 sm:$0xff]  }
 0x380   : > { %4140 = vmatpush2.bf16.msra.mxu0 %v7191_v18  ;;  %4181 = vmatpush2.bf16.msra.mxu1 %v7194_v19  ;;  %v7282_v18 = vld [vmem:[#allocation13 + $0x5cc] ss:$16 sps:$4 sm:$0xff]   ;;  %v7277_v19 = vld [vmem:[#allocation13 + $0x5c0] ss:$16 sps:$4 sm:$0xff]  }
 0x381   : > { %4141 = vmatprep.subr.bf16.mxu0 %v7199_v7  ;;  %4182 = vmatprep.subr.bf16.mxu1 %v7202_v42  ;;  %v7280_v7 = vld [vmem:[#allocation13 + $0x5c8] ss:$16 sps:$4 sm:$0xff]   ;;  %v7285_v42 = vld [vmem:[#allocation13 + $0x5a4] ss:$16 sps:$4 sm:$0xff]  }
 0x384   : > { %4142 = vmatpush2.bf16.msra.mxu0 %v7197_v41  ;;  %4183 = vmatpush2.bf16.msra.mxu1 %v7200_v59  ;;  %v7288_v41 = vld [vmem:[#allocation13 + $0x5ac] ss:$16 sps:$4 sm:$0xff]   ;;  %v7283_v59 = vld [vmem:[#allocation13 + $0x5a0] ss:$16 sps:$4 sm:$0xff]  }
 0x385   : > { %4143 = vmatprep.subr.bf16.mxu0 %v7205_v8  ;;  %4184 = vmatprep.subr.bf16.mxu1 %v7208_v63  ;;  %v7286_v8 = vld [vmem:[#allocation13 + $0x5a8] ss:$16 sps:$4 sm:$0xff]   ;;  %v7291_v63 = vld [vmem:[#allocation13 + $0x584] ss:$16 sps:$4 sm:$0xff]  }
 0x388   : > { %4144 = vmatpush2.bf16.msra.mxu0 %v7203_v20  ;;  %4185 = vmatpush2.bf16.msra.mxu1 %v7206_v56  ;;  %v7294_v20 = vld [vmem:[#allocation13 + $0x58c] ss:$16 sps:$4 sm:$0xff]   ;;  %v7289_v56 = vld [vmem:[#allocation13 + $0x580] ss:$16 sps:$4 sm:$0xff]  }
 0x389   : > { %4145 = vmatprep.subr.bf16.mxu0 %v7211_v21  ;;  %4186 = vmatprep.subr.bf16.mxu1 %v7214_v23  ;;  %v7292_v21 = vld [vmem:[#allocation13 + $0x588] ss:$16 sps:$4 sm:$0xff]   ;;  %v7297_v23 = vld [vmem:[#allocation13 + $0x564] ss:$16 sps:$4 sm:$0xff]  }
 0x38c   : > { %4146 = vmatpush2.bf16.msra.mxu0 %v7209_v47  ;;  %4187 = vmatpush2.bf16.msra.mxu1 %v7212_v33  ;;  %v7300_v47 = vld [vmem:[#allocation13 + $0x56c] ss:$16 sps:$4 sm:$0xff]   ;;  %v7295_v33 = vld [vmem:[#allocation13 + $0x560] ss:$16 sps:$4 sm:$0xff]  }
 0x38d   : > { %4147 = vmatprep.subr.bf16.mxu0 %v7217_v60  ;;  %4188 = vmatprep.subr.bf16.mxu1 %v7220_v37  ;;  %v7298_v60 = vld [vmem:[#allocation13 + $0x568] ss:$16 sps:$4 sm:$0xff]   ;;  %v7303_v37 = vld [vmem:[#allocation13 + $0x544] ss:$16 sps:$4 sm:$0xff]  }
 0x390   : > { %4148 = vmatpush2.bf16.msra.mxu0 %v7215_v6  ;;  %4189 = vmatpush2.bf16.msra.mxu1 %v7218_v35  ;;  %v7306_v6 = vld [vmem:[#allocation13 + $0x54c] ss:$16 sps:$4 sm:$0xff]   ;;  %v7301_v35 = vld [vmem:[#allocation13 + $0x540] ss:$16 sps:$4 sm:$0xff]  }
 0x391   : > { %4594 = vmatprep.subr.bf16.mxu0 %v7223_v36  ;;  %4635 = vmatprep.subr.bf16.mxu1 %v7226_v24  ;;  %v7304_v36 = vld [vmem:[#allocation13 + $0x548] ss:$16 sps:$4 sm:$0xff]   ;;  %v7309_v24 = vld [vmem:[#allocation13 + $0x524] ss:$16 sps:$4 sm:$0xff]  }
 0x393   : > { %4150 = vmatmul.mubr.bf16.vlgmr.msra.gmra.mxu0 %v6254_v40  ;;  %4191 = vmatmul.mubr.bf16.vlgmr.msra.gmra.mxu1 %v6254_v40  ;;  %v7310_v40 = vld [vmem:[#allocation13 + $0x528] ss:$16 sps:$4 sm:$0xff]  }
 0x394   : > { %4595 = vmatpush1.bf16.msra.mxu0 %v7221_v38  ;;  %4626 = vmatprep.mubr.bf16.mxu0 %v4271_v1  ;;  %v7307_v38 = vld [vmem:[#allocation13 + $0x520] ss:$16 sps:$4 sm:$0xff]  }
 0x395   : > { %4636 = vmatpush1.bf16.msra.mxu1 %v7224_v57  ;;  %4667 = vmatprep.mubr.bf16.mxu1 %v4271_v1  ;;  %v7315_v57 = vld [vmem:[#allocation13 + $0x504] ss:$16 sps:$4 sm:$0xff]   ;;  %v7318_v1 = vld [vmem:[#allocation13 + $0x50c] ss:$16 sps:$4 sm:$0xff]  }
 0x396   : > { %4596 = vmatprep.subr.bf16.mxu0 %v7231_v48  ;;  %4637 = vmatprep.subr.bf16.mxu1 %v7234_v25  ;;  %v7313_v48 = vld [vmem:[#allocation13 + $0x500] ss:$16 sps:$4 sm:$0xff]   ;;  %v6320_v25 = vcombine.low %v8266_v58, %v8258_v22  ;;  %v7333_v58 = vld [vmem:[#allocation14 + $0xa4] ss:$16 sps:$4 sm:$0xff]  }
 0x397   : > { %v7328_v22 = vld [vmem:[#allocation14 + $0x2c0] ss:$16 sps:$4 sm:$0xff]  }
 0x398   : > { %4597 = vmatpush1.bf16.msra.mxu0 %v7229_v53  ;;  %v7316_v53 = vld [vmem:[#allocation13 + $0x508] ss:$16 sps:$4 sm:$0xff]  }
 0x399   : > { %4638 = vmatpush1.bf16.msra.mxu1 %v7232_v26  ;;  %4598 = vmatprep.subr.bf16.mxu0 %v7237_v28  ;;  %v4270_v26 = vrot.slane %v6320_v25, 1  ;;  %v7319_v28 = vld [vmem:[#allocation14 + $0xe0] ss:$16 sps:$4 sm:$0xff]  }
 0x39a   : > { %4639 = vmatprep.subr.bf16.mxu1 %v7240_v43  ;;  %v7321_v43 = vld [vmem:[#allocation14 + $0xe4] ss:$16 sps:$4 sm:$0xff]  }
 0x39c   : > { %4599 = vmatpush1.bf16.msra.mxu0 %v7235_v52  ;;  %v7322_v52 = vld [vmem:[#allocation14 + $0x2e0] ss:$16 sps:$4 sm:$0xff]  }
 0x39d   : > { %4640 = vmatpush1.bf16.msra.mxu1 %v7238_v46  ;;  %4600 = vmatprep.subr.bf16.mxu0 %v7243_v2  ;;  %v7324_v46 = vld [vmem:[#allocation14 + $0x2e4] ss:$16 sps:$4 sm:$0xff]  }
 0x39e   : > { %4641 = vmatprep.subr.bf16.mxu1 %v7246_v3  ;;  %v7327_v2 = vld [vmem:[#allocation14 + $0xc4] ss:$16 sps:$4 sm:$0xff]  }
 0x39f   : > { %v7330_v3 = vld [vmem:[#allocation14 + $0x2c4] ss:$16 sps:$4 sm:$0xff]  }
 0x3a0   : > { %4601 = vmatpush1.bf16.msra.mxu0 %v7241_v4  ;;  %v7325_v4 = vld [vmem:[#allocation14 + $0xc0] ss:$16 sps:$4 sm:$0xff]  }
 0x3a1   : > { %4642 = vmatpush1.bf16.msra.mxu1 %v7244_v5  ;;  %4602 = vmatprep.subr.bf16.mxu0 %v7249_v61  ;;  %v7336_v5 = vld [vmem:[#allocation14 + $0x2a4] ss:$16 sps:$4 sm:$0xff]   ;;  %v7331_v61 = vld [vmem:[#allocation14 + $0xa0] ss:$16 sps:$4 sm:$0xff]  }
 0x3a2   : > { %4643 = vmatprep.subr.bf16.mxu1 %v7252_v62  ;;  %v7334_v62 = vld [vmem:[#allocation14 + $0x2a0] ss:$16 sps:$4 sm:$0xff]  }
 0x3a4   : > { %4603 = vmatpush1.bf16.msra.mxu0 %v7247_v9  ;;  %v7339_v9 = vld [vmem:[#allocation14 + $0x84] ss:$16 sps:$4 sm:$0xff]  }
 0x3a5   : > { %4644 = vmatpush1.bf16.msra.mxu1 %v7250_v27  ;;  %4604 = vmatprep.subr.bf16.mxu0 %v7255_v30  ;;  %v7342_v27 = vld [vmem:[#allocation14 + $0x284] ss:$16 sps:$4 sm:$0xff]   ;;  %v7337_v30 = vld [vmem:[#allocation14 + $0x80] ss:$16 sps:$4 sm:$0xff]  }
 0x3a6   : > { %4645 = vmatprep.subr.bf16.mxu1 %v7258_v10  ;;  %v7340_v10 = vld [vmem:[#allocation14 + $0x280] ss:$16 sps:$4 sm:$0xff]  }
 0x3a8   : > { %4605 = vmatpush1.bf16.msra.mxu0 %v7253_v11  ;;  %v7345_v11 = vld [vmem:[#allocation14 + $0x64] ss:$16 sps:$4 sm:$0xff]  }
 0x3a9   : > { %4646 = vmatpush1.bf16.msra.mxu1 %v7256_v12  ;;  %4606 = vmatprep.subr.bf16.mxu0 %v7261_v13  ;;  %v7348_v12 = vld [vmem:[#allocation14 + $0x264] ss:$16 sps:$4 sm:$0xff]   ;;  %v7343_v13 = vld [vmem:[#allocation14 + $0x60] ss:$16 sps:$4 sm:$0xff]  }
 0x3aa   : > { %4647 = vmatprep.subr.bf16.mxu1 %v7264_v29  ;;  %v7346_v29 = vld [vmem:[#allocation14 + $0x260] ss:$16 sps:$4 sm:$0xff]  }
 0x3ac   : > { %4607 = vmatpush1.bf16.msra.mxu0 %v7259_v32  ;;  %v7351_v32 = vld [vmem:[#allocation14 + $0x44] ss:$16 sps:$4 sm:$0xff]  }
 0x3ad   : > { %4648 = vmatpush1.bf16.msra.mxu1 %v7262_v14  ;;  %4608 = vmatprep.subr.bf16.mxu0 %v7267_v31  ;;  %v7354_v14 = vld [vmem:[#allocation14 + $0x244] ss:$16 sps:$4 sm:$0xff]   ;;  %v7349_v31 = vld [vmem:[#allocation14 + $0x40] ss:$16 sps:$4 sm:$0xff]  }
 0x3ae   : > { %4649 = vmatprep.subr.bf16.mxu1 %v7270_v34  ;;  %v7352_v34 = vld [vmem:[#allocation14 + $0x240] ss:$16 sps:$4 sm:$0xff]  }
 0x3b0   : > { %4609 = vmatpush1.bf16.msra.mxu0 %v7265_v44  ;;  %v7357_v44 = vld [vmem:[#allocation14 + $0x24] ss:$16 sps:$4 sm:$0xff]  }
 0x3b1   : > { %4650 = vmatpush1.bf16.msra.mxu1 %v7268_v49  ;;  %4610 = vmatprep.subr.bf16.mxu0 %v7273_v45  ;;  %v7360_v49 = vld [vmem:[#allocation14 + $0x224] ss:$16 sps:$4 sm:$0xff]   ;;  %v7355_v45 = vld [vmem:[#allocation14 + $0x20] ss:$16 sps:$4 sm:$0xff]  }
 0x3b2   : > { %4651 = vmatprep.subr.bf16.mxu1 %v7276_v16  ;;  %v7358_v16 = vld [vmem:[#allocation14 + $0x220] ss:$16 sps:$4 sm:$0xff]  }
 0x3b4   : > { %4611 = vmatpush2.bf16.msra.mxu0 %v7271_v17  ;;  %v7363_v17 = vld [vmem:[#allocation14 + $0x4] ss:$16 sps:$4 sm:$0xff]  }
 0x3b5   : > { %4652 = vmatpush2.bf16.msra.mxu1 %v7274_v0  ;;  %4612 = vmatprep.subr.bf16.mxu0 %v7279_v51  ;;  %v7366_v0 = vld [vmem:[#allocation14 + $0x204] ss:$16 sps:$4 sm:$0xff]   ;;  %v7361_v51 = vld [vmem:[#allocation14] ss:$16 sps:$4 sm:$0xff]  }
 0x3b6   : > { %4653 = vmatprep.subr.bf16.mxu1 %v7282_v18  ;;  %v7364_v18 = vld [vmem:[#allocation14 + $0x200] ss:$16 sps:$4 sm:$0xff]  }
 0x3b8   : > { %4613 = vmatpush2.bf16.msra.mxu0 %v7277_v19  ;;  %v7369_v19 = vld [vmem:[#allocation14 + $0x1e4] ss:$16 sps:$4 sm:$0xff]  }
 0x3b9   : > { %4654 = vmatpush2.bf16.msra.mxu1 %v7280_v7  ;;  %4614 = vmatprep.subr.bf16.mxu0 %v7285_v42  ;;  %v7372_v7 = vld [vmem:[#allocation14 + $0x3e4] ss:$16 sps:$4 sm:$0xff]   ;;  %v7367_v42 = vld [vmem:[#allocation14 + $0x1e0] ss:$16 sps:$4 sm:$0xff]  }
 0x3ba   : > { %4655 = vmatprep.subr.bf16.mxu1 %v7288_v41  ;;  %v7370_v41 = vld [vmem:[#allocation14 + $0x3e0] ss:$16 sps:$4 sm:$0xff]  }
 0x3bc   : > { %4615 = vmatpush2.bf16.msra.mxu0 %v7283_v59  ;;  %v7375_v59 = vld [vmem:[#allocation14 + $0x1c4] ss:$16 sps:$4 sm:$0xff]  }
 0x3bd   : > { %4656 = vmatpush2.bf16.msra.mxu1 %v7286_v8  ;;  %4616 = vmatprep.subr.bf16.mxu0 %v7291_v63  ;;  %v7378_v8 = vld [vmem:[#allocation14 + $0x3c4] ss:$16 sps:$4 sm:$0xff]   ;;  %v7373_v63 = vld [vmem:[#allocation14 + $0x1c0] ss:$16 sps:$4 sm:$0xff]  }
 0x3be   : > { %4657 = vmatprep.subr.bf16.mxu1 %v7294_v20  ;;  %v7376_v20 = vld [vmem:[#allocation14 + $0x3c0] ss:$16 sps:$4 sm:$0xff]  }
 0x3c0   : > { %4617 = vmatpush2.bf16.msra.mxu0 %v7289_v56  ;;  %v7381_v56 = vld [vmem:[#allocation14 + $0x1a4] ss:$16 sps:$4 sm:$0xff]  }
 0x3c1   : > { %4658 = vmatpush2.bf16.msra.mxu1 %v7292_v21  ;;  %4618 = vmatprep.subr.bf16.mxu0 %v7297_v23  ;;  %v7384_v21 = vld [vmem:[#allocation14 + $0x3a4] ss:$16 sps:$4 sm:$0xff]   ;;  %v7379_v23 = vld [vmem:[#allocation14 + $0x1a0] ss:$16 sps:$4 sm:$0xff]  }
 0x3c2   : > { %4659 = vmatprep.subr.bf16.mxu1 %v7300_v47  ;;  %v7382_v47 = vld [vmem:[#allocation14 + $0x3a0] ss:$16 sps:$4 sm:$0xff]  }
 0x3c4   : > { %4619 = vmatpush2.bf16.msra.mxu0 %v7295_v33  ;;  %v7387_v33 = vld [vmem:[#allocation14 + $0x184] ss:$16 sps:$4 sm:$0xff]  }
 0x3c5   : > { %4660 = vmatpush2.bf16.msra.mxu1 %v7298_v60  ;;  %4620 = vmatprep.subr.bf16.mxu0 %v7303_v37  ;;  %v7390_v60 = vld [vmem:[#allocation14 + $0x384] ss:$16 sps:$4 sm:$0xff]   ;;  %v7385_v37 = vld [vmem:[#allocation14 + $0x180] ss:$16 sps:$4 sm:$0xff]  }
 0x3c6   : > { %4661 = vmatprep.subr.bf16.mxu1 %v7306_v6  ;;  %v7388_v6 = vld [vmem:[#allocation14 + $0x380] ss:$16 sps:$4 sm:$0xff]  }
 0x3c8   : > { %4621 = vmatpush2.bf16.msra.mxu0 %v7301_v35  ;;  %v7393_v35 = vld [vmem:[#allocation14 + $0x164] ss:$16 sps:$4 sm:$0xff]  }
 0x3c9   : > { %4662 = vmatpush2.bf16.msra.mxu1 %v7304_v36  ;;  %4622 = vmatprep.subr.bf16.mxu0 %v7309_v24  ;;  %v7396_v36 = vld [vmem:[#allocation14 + $0x364] ss:$16 sps:$4 sm:$0xff]   ;;  %v7391_v24 = vld [vmem:[#allocation14 + $0x160] ss:$16 sps:$4 sm:$0xff]  }
 0x3ca   : > { %4663 = vmatprep.subr.bf16.mxu1 %v7312_v39  ;;  %v7394_v39 = vld [vmem:[#allocation14 + $0x360] ss:$16 sps:$4 sm:$0xff]  }
 0x3cc   : > { %4623 = vmatpush2.bf16.msra.mxu0 %v7307_v38  ;;  %v7399_v38 = vld [vmem:[#allocation14 + $0x144] ss:$16 sps:$4 sm:$0xff]  }
 0x3cd   : > { %4664 = vmatpush2.bf16.msra.mxu1 %v7310_v40  ;;  %4624 = vmatprep.subr.bf16.mxu0 %v7315_v57  ;;  %v7402_v40 = vld [vmem:[#allocation14 + $0x344] ss:$16 sps:$4 sm:$0xff]   ;;  %v7397_v57 = vld [vmem:[#allocation14 + $0x140] ss:$16 sps:$4 sm:$0xff]  }
 0x3ce   : > { %4665 = vmatprep.subr.bf16.mxu1 %v7318_v1  ;;  %v7400_v1 = vld [vmem:[#allocation14 + $0x340] ss:$16 sps:$4 sm:$0xff]  }
 0x3d0   : > { %4625 = vmatpush2.bf16.msra.mxu0 %v7313_v48 }
 0x3d1   : > { %4666 = vmatpush2.bf16.msra.mxu1 %v7316_v53  ;;  %5482 = vmatprep.subr.bf16.mxu0 %v7321_v43  ;;  %v7408_v43 = vld [vmem:[#allocation14 + $0x324] ss:$16 sps:$4 sm:$0xff]  }
 0x3d2   : > { %5523 = vmatprep.subr.bf16.mxu1 %v7324_v46  ;;  %v7406_v46 = vld [vmem:[#allocation14 + $0x320] ss:$16 sps:$4 sm:$0xff]  }
 0x3d3   : > { %4627 = vmatmul.mubr.bf16.vlgmr.msra.gmra.mxu0 %v4270_v26 }
 0x3d4   : > { %4668 = vmatmul.mubr.bf16.vlgmr.msra.gmra.mxu1 %v4270_v26  ;;  %5483 = vmatpush1.bf16.msra.mxu0 %v7319_v28  ;;  %v7405_v28 = vld [vmem:[#allocation14 + $0x124] ss:$16 sps:$4 sm:$0xff]  }
 0x3d5   : > { %5524 = vmatpush1.bf16.msra.mxu1 %v7322_v52  ;;  %5484 = vmatprep.subr.bf16.mxu0 %v7327_v2  ;;  %v7403_v52 = vld [vmem:[#allocation14 + $0x120] ss:$16 sps:$4 sm:$0xff]  }
 0x3d6   : > { %5525 = vmatprep.subr.bf16.mxu1 %v7330_v3 }
 0x3d8   : > { %5485 = vmatpush1.bf16.msra.mxu0 %v7325_v4 }
 0x3d9   : > { %5526 = vmatpush1.bf16.msra.mxu1 %v7328_v22  ;;  %5486 = vmatprep.subr.bf16.mxu0 %v7333_v58  ;;  %v7411_v58 = vld [vmem:[#allocation14 + $0x104] ss:$16 sps:$4 sm:$0xff]  }
 0x3da   : > { %5527 = vmatprep.subr.bf16.mxu1 %v7336_v5  ;;  %v7414_v5 = vld [vmem:[#allocation14 + $0x304] ss:$16 sps:$4 sm:$0xff]  }
 0x3dc   : > { %5487 = vmatpush1.bf16.msra.mxu0 %v7331_v61  ;;  %v7409_v61 = vld [vmem:[#allocation14 + $0x100] ss:$16 sps:$4 sm:$0xff]  }
 0x3dd   : > { %5528 = vmatpush1.bf16.msra.mxu1 %v7334_v62  ;;  %5488 = vmatprep.subr.bf16.mxu0 %v7339_v9  ;;  %v7412_v62 = vld [vmem:[#allocation14 + $0x300] ss:$16 sps:$4 sm:$0xff]   ;;  %v7417_v9 = vld [vmem:[#allocation14 + $0xec] ss:$16 sps:$4 sm:$0xff]  }
 0x3de   : > { %5529 = vmatprep.subr.bf16.mxu1 %v7342_v27  ;;  %v7420_v27 = vld [vmem:[#allocation14 + $0x2ec] ss:$16 sps:$4 sm:$0xff]  }
 0x3e0   : > { %5489 = vmatpush1.bf16.msra.mxu0 %v7337_v30 }
 0x3e1   : > { %5530 = vmatpush1.bf16.msra.mxu1 %v7340_v10  ;;  %5490 = vmatprep.subr.bf16.mxu0 %v7345_v11 }
 0x3e2   : > { %5531 = vmatprep.subr.bf16.mxu1 %v7348_v12 }
 0x3e4   : > { %5491 = vmatpush1.bf16.msra.mxu0 %v7343_v13 }
 0x3e5   : > { %5532 = vmatpush1.bf16.msra.mxu1 %v7346_v29  ;;  %5492 = vmatprep.subr.bf16.mxu0 %v7351_v32 }
 0x3e6   : > { %5533 = vmatprep.subr.bf16.mxu1 %v7354_v14 }
 0x3e8   : > { %5493 = vmatpush1.bf16.msra.mxu0 %v7349_v31 }
 0x3e9   : > { %5534 = vmatpush1.bf16.msra.mxu1 %v7352_v34  ;;  %5494 = vmatprep.subr.bf16.mxu0 %v7357_v44  ;;  %v4680_v44 = vld [vmem:[%s8345_s6] sm:$0xf] }
 0x3ea   : > { %5535 = vmatprep.subr.bf16.mxu1 %v7360_v49  ;;  %v4692_v49 = vsub.s32 2, %v8113_v50 }
 0x3ec   : > { %5495 = vmatpush1.bf16.msra.mxu0 %v7355_v45  ;;  %v4696_v45 = vsub.s32 3, %v8113_v50 }
 0x3ed   : > { %5536 = vmatpush1.bf16.msra.mxu1 %v7358_v16  ;;  %5496 = vmatprep.subr.bf16.mxu0 %v7363_v17  ;;  %v4685_v16 = vrot.slane %v4680_v44, %v8121_v54 }
 0x3ee   : > { %5537 = vmatprep.subr.bf16.mxu1 %v7366_v0  ;;  %v4693_v0 = vrot.slane %v4680_v44, %v4692_v49  ;;  %v7468_v49 = vld [vmem:[#allocation14 + $0x3ec] ss:$16 sps:$4 sm:$0xff]  }
 0x3f0   : > { %5497 = vmatpush1.bf16.msra.mxu0 %v7361_v51 }
 0x3f1   : > { %5538 = vmatpush1.bf16.msra.mxu1 %v7364_v18  ;;  %5498 = vmatprep.subr.bf16.mxu0 %v7369_v19 }
 0x3f2   : > { %5539 = vmatprep.subr.bf16.mxu1 %v7372_v7  ;;  %v4689_v7 = vrot.slane %v4680_v44, %v8124_v55 }
 0x3f4   : > { %5499 = vmatpush2.bf16.msra.mxu0 %v7367_v42 }
 0x3f5   : > { %5540 = vmatpush2.bf16.msra.mxu1 %v7370_v41  ;;  %5500 = vmatprep.subr.bf16.mxu0 %v7375_v59 }
 0x3f6   : > { %5541 = vmatprep.subr.bf16.mxu1 %v7378_v8  ;;  %v4697_v8 = vrot.slane %v4680_v44, %v4696_v45  ;;  %v7465_v44 = vld [vmem:[#allocation14 + $0x1ec] ss:$16 sps:$4 sm:$0xff]   ;;  %v7463_v45 = vld [vmem:[#allocation14 + $0x1e8] ss:$16 sps:$4 sm:$0xff]  }
 0x3f8   : > { %5501 = vmatpush2.bf16.msra.mxu0 %v7373_v63 }
 0x3f9   : > { %5542 = vmatpush2.bf16.msra.mxu1 %v7376_v20  ;;  %5502 = vmatprep.subr.bf16.mxu0 %v7381_v56 }
 0x3fa   : > { %5543 = vmatprep.subr.bf16.mxu1 %v7384_v21 }
 0x3fc   : > { %5503 = vmatpush2.bf16.msra.mxu0 %v7379_v23 }
 0x3fd   : > { %5544 = vmatpush2.bf16.msra.mxu1 %v7382_v47  ;;  %5504 = vmatprep.subr.bf16.mxu0 %v7387_v33 }
 0x3fe   : > { %5545 = vmatprep.subr.bf16.mxu1 %v7390_v60 }
 0x400   : > { %5505 = vmatpush2.bf16.msra.mxu0 %v7385_v37 }
 0x401   : > { %5546 = vmatpush2.bf16.msra.mxu1 %v7388_v6  ;;  %5506 = vmatprep.subr.bf16.mxu0 %v7393_v35 }
 0x402   : > { %5547 = vmatprep.subr.bf16.mxu1 %v7396_v36 }
 0x404   : > { %5507 = vmatpush2.bf16.msra.mxu0 %v7391_v24 }
 0x405   : > { %5548 = vmatpush2.bf16.msra.mxu1 %v7394_v39  ;;  %5508 = vmatprep.subr.bf16.mxu0 %v7399_v38  ;;  %v7415_v39 = vld [vmem:[#allocation14 + $0xe8] ss:$16 sps:$4 sm:$0xff]  }
 0x406   : > { %5549 = vmatprep.subr.bf16.mxu1 %v7402_v40 }
 0x408   : > { %5509 = vmatpush2.bf16.msra.mxu0 %v7397_v57  ;;  %v7418_v57 = vld [vmem:[#allocation14 + $0x2e8] ss:$16 sps:$4 sm:$0xff]  }
 0x409   : > { %5550 = vmatpush2.bf16.msra.mxu1 %v7400_v1  ;;  %5510 = vmatprep.subr.bf16.mxu0 %v7405_v28  ;;  %v7429_v28 = vld [vmem:[#allocation14 + $0xac] ss:$16 sps:$4 sm:$0xff]  }
 0x40a   : > { %5551 = vmatprep.subr.bf16.mxu1 %v7408_v43  ;;  %v7432_v43 = vld [vmem:[#allocation14 + $0x2ac] ss:$16 sps:$4 sm:$0xff]  }
 0x40c   : > { %5511 = vmatpush2.bf16.msra.mxu0 %v7403_v52  ;;  %v7427_v52 = vld [vmem:[#allocation14 + $0xa8] ss:$16 sps:$4 sm:$0xff]  }
 0x40d   : > { %5552 = vmatpush2.bf16.msra.mxu1 %v7406_v46  ;;  %5512 = vmatprep.subr.bf16.mxu0 %v7411_v58  ;;  %v7430_v46 = vld [vmem:[#allocation14 + $0x2a8] ss:$16 sps:$4 sm:$0xff]   ;;  %v7441_v58 = vld [vmem:[#allocation14 + $0x6c] ss:$16 sps:$4 sm:$0xff]  }
 0x40e   : > { %5553 = vmatprep.subr.bf16.mxu1 %v7414_v5  ;;  %v7444_v5 = vld [vmem:[#allocation14 + $0x26c] ss:$16 sps:$4 sm:$0xff]  }
 0x410   : > { %5513 = vmatpush2.bf16.msra.mxu0 %v7409_v61  ;;  %v7439_v61 = vld [vmem:[#allocation14 + $0x68] ss:$16 sps:$4 sm:$0xff]  }
 0x411   : > { %5554 = vmatpush2.bf16.msra.mxu1 %v7412_v62  ;;  %5564 = vmatprep.subr.bf16.mxu0 %v7417_v9  ;;  %v7442_v62 = vld [vmem:[#allocation14 + $0x268] ss:$16 sps:$4 sm:$0xff]   ;;  %v7447_v9 = vld [vmem:[#allocation14 + $0x4c] ss:$16 sps:$4 sm:$0xff]  }
 0x412   : > { %5605 = vmatprep.subr.bf16.mxu1 %v7420_v27  ;;  %v7450_v27 = vld [vmem:[#allocation14 + $0x24c] ss:$16 sps:$4 sm:$0xff]  }
 0x413   : > { %v3745_v48 = vpop.f32.mrf.mxu0  ;;  %v3786_v25 = vpop.f32.mrf.mxu1 }
 0x415   : > { %v3747_v53 = vpop.f32.mrf.mxu0  ;;  %v3788_v26 = vpop.f32.mrf.mxu1 }
 0x417   : > { %v3749_v2 = vpop.f32.mrf.mxu0  ;;  %v3790_v3 = vpop.f32.mrf.mxu1 }
 0x418   : > { %v7435_v2 = vld [vmem:[#allocation14 + $0x8c] ss:$16 sps:$4 sm:$0xff]  }
 0x419   : > { %v3750_v4 = vpop.f32.mrf.mxu0  ;;  %v3791_v22 = vpop.f32.mrf.mxu1  ;;  %v7438_v3 = vld [vmem:[#allocation14 + $0x28c] ss:$16 sps:$4 sm:$0xff]  }
 0x41a   : > { %v7433_v4 = vld [vmem:[#allocation14 + $0x88] ss:$16 sps:$4 sm:$0xff]  }
 0x41b   : > { %v7436_v22 = vld [vmem:[#allocation14 + $0x288] ss:$16 sps:$4 sm:$0xff]  }
 0x453   : > { %v4151_v30 = vpop.f32.mrf.mxu0  ;;  %v4192_v10 = vpop.f32.mrf.mxu1 }
 0x454   : > { %v4152_v11 = vadd.f32 %v4151_v30, %v3745_v48  ;;  %v4193_v12 = vadd.f32 %v4192_v10, %v3786_v25  ;;  %v7423_v48 = vld [vmem:[#allocation14 + $0xcc] ss:$16 sps:$4 sm:$0xff]   ;;  %v7445_v30 = vld [vmem:[#allocation14 + $0x48] ss:$16 sps:$4 sm:$0xff]  }
 0x455   : > { %v4153_v13 = vpop.f32.mrf.mxu0  ;;  %v4194_v29 = vpop.f32.mrf.mxu1  ;;  %v7426_v25 = vld [vmem:[#allocation14 + $0x2cc] ss:$16 sps:$4 sm:$0xff]   ;;  %v7448_v10 = vld [vmem:[#allocation14 + $0x248] ss:$16 sps:$4 sm:$0xff]  }
 0x456   : > { %v4154_v51 = vadd.f32 %v4153_v13, %v3747_v53  ;;  %v4195_v42 = vadd.f32 %v4194_v29, %v3788_v26  ;;  %v7421_v53 = vld [vmem:[#allocation14 + $0xc8] ss:$16 sps:$4 sm:$0xff]  }
 0x457   : > { %v4155_v32 = vpop.f32.mrf.mxu0  ;;  %v4196_v14 = vpop.f32.mrf.mxu1  ;;  %v7424_v26 = vld [vmem:[#allocation14 + $0x2c8] ss:$16 sps:$4 sm:$0xff]  }
 0x458   : > { %v7451_v13 = vld [vmem:[#allocation14 + $0x28] ss:$16 sps:$4 sm:$0xff]   ;;  %v7459_v32 = vld [vmem:[#allocation14 + $0xc] ss:$16 sps:$4 sm:$0xff]  }
 0x459   : > { %v4156_v31 = vpop.f32.mrf.mxu0  ;;  %v4197_v34 = vpop.f32.mrf.mxu1  ;;  %v7454_v29 = vld [vmem:[#allocation14 + $0x228] ss:$16 sps:$4 sm:$0xff]   ;;  %v7462_v14 = vld [vmem:[#allocation14 + $0x20c] ss:$16 sps:$4 sm:$0xff]  }
 0x45a   : > { %v7457_v31 = vld [vmem:[#allocation14 + $0x8] ss:$16 sps:$4 sm:$0xff]  }
 0x45b   : > { %v7460_v34 = vld [vmem:[#allocation14 + $0x208] ss:$16 sps:$4 sm:$0xff]  }
 0x493   : > { %v4628_v17 = vpop.f32.mrf.mxu0 }
 0x494   : > { %v4676_v18 = vadd.f32 %v4628_v17, %v4152_v11  ;;  %v4669_v19 = vpop.f32.mrf.mxu1  ;;  %v7453_v11 = vld [vmem:[#allocation14 + $0x2c] ss:$16 sps:$4 sm:$0xff]  }
 0x495   : > { %v4678_v41 = vadd.f32 %v4669_v19, %v4193_v12  ;;  %v4630_v59 = vpop.f32.mrf.mxu0  ;;  %v7456_v12 = vld [vmem:[#allocation14 + $0x22c] ss:$16 sps:$4 sm:$0xff]  }
 0x496   : > { %v4702_v63 = vadd.f32 %v4685_v16, %v4676_v18  ;;  %v4677_v20 = vadd.f32 %v4630_v59, %v4154_v51  ;;  %v4671_v56 = vpop.f32.mrf.mxu1  ;;  %v7466_v16 = vld [vmem:[#allocation14 + $0x3e8] ss:$16 sps:$4 sm:$0xff]   ;;  %v7471_v17 = vld [vmem:[#allocation14 + $0x1cc] ss:$16 sps:$4 sm:$0xff]  }
 0x497   : > { %v4704_v21 = vadd.f32 %v4693_v0, %v4678_v41  ;;  %v4679_v23 = vadd.f32 %v4671_v56, %v4195_v42  ;;  %v4632_v47 = vpop.f32.mrf.mxu0  ;;  %v7474_v0 = vld [vmem:[#allocation14 + $0x3cc] ss:$16 sps:$4 sm:$0xff]   ;;  %v7469_v51 = vld [vmem:[#allocation14 + $0x1c8] ss:$16 sps:$4 sm:$0xff]  }
 0x498   : > { %v4703_v50 = vadd.f32 %v4689_v7, %v4677_v20  ;;  %v4673_v33 = vpop.f32.mrf.mxu1  ;;  %v4706_v54 = vmax.f32 %v4702_v63, 0.0  ;;  %v7472_v18 = vld [vmem:[#allocation14 + $0x3c8] ss:$16 sps:$4 sm:$0xff]   ;;  %v7477_v19 = vld [vmem:[#allocation14 + $0x1ac] ss:$16 sps:$4 sm:$0xff]  }
 0x499   : > { %v4705_v60 = vadd.f32 %v4697_v8, %v4679_v23  ;;  %v4633_v37 = vpop.f32.mrf.mxu0  ;;  %v4708_v6 = vmax.f32 %v4704_v21, 0.0  ;;  %v7480_v7 = vld [vmem:[#allocation14 + $0x3ac] ss:$16 sps:$4 sm:$0xff]   ;;  %v7475_v42 = vld [vmem:[#allocation14 + $0x1a8] ss:$16 sps:$4 sm:$0xff]  }
 0x49a   : > { %v4707_v35 = vmax.f32 %v4703_v50, 0.0  ;;  %v4674_v36 = vpop.f32.mrf.mxu1  ;;  %v8281_v38 = vpack.c.bf16 %v4706_v54, %v4706_v54  ;;  %v7478_v41 = vld [vmem:[#allocation14 + $0x3a8] ss:$16 sps:$4 sm:$0xff]   ;;  %v7483_v59 = vld [vmem:[#allocation14 + $0x18c] ss:$16 sps:$4 sm:$0xff]  }
 0x49b   : > { %v4709_v24 = vmax.f32 %v4705_v60, 0.0  ;;  %v8283_v1 = vpack.c.bf16 %v4708_v6, %v4708_v6  ;;  %v7486_v8 = vld [vmem:[#allocation14 + $0x38c] ss:$16 sps:$4 sm:$0xff]   ;;  %v7481_v63 = vld [vmem:[#allocation14 + $0x188] ss:$16 sps:$4 sm:$0xff]  }
 0x49c   : > { %v4711_v55 = vpack.c.bf16 %v4707_v35, %v4707_v35  ;;  %v7484_v20 = vld [vmem:[#allocation14 + $0x388] ss:$16 sps:$4 sm:$0xff]   ;;  %v7489_v56 = vld [vmem:[#allocation14 + $0x16c] ss:$16 sps:$4 sm:$0xff]  }
 0x49d   : > { %v4713_v40 = vpack.c.bf16 %v4709_v24, %v4709_v24  ;;  %v7492_v21 = vld [vmem:[#allocation14 + $0x36c] ss:$16 sps:$4 sm:$0xff]   ;;  %v7487_v23 = vld [vmem:[#allocation14 + $0x168] ss:$16 sps:$4 sm:$0xff]  }
 0x49e   : > { %5514 = vmatprep.mubr.bf16.mxu0 %v4711_v55  ;;  %v7490_v47 = vld [vmem:[#allocation14 + $0x368] ss:$16 sps:$4 sm:$0xff]   ;;  %v7495_v50 = vld [vmem:[#allocation14 + $0x14c] ss:$16 sps:$4 sm:$0xff]  }
 0x49f   : > { %5555 = vmatprep.mubr.bf16.mxu1 %v4713_v40  ;;  %5515 = vmatmul.mubr.bf16.vlgmr.msra.gmra.mxu0 %v8281_v38  ;;  %v7498_v33 = vld [vmem:[#allocation14 + $0x34c] ss:$16 sps:$4 sm:$0xff]   ;;  %v7493_v54 = vld [vmem:[#allocation14 + $0x148] ss:$16 sps:$4 sm:$0xff]  }
 0x4a0   : > { %5556 = vmatmul.mubr.bf16.vlgmr.msra.gmra.mxu1 %v8283_v1  ;;  %5565 = vmatpush1.bf16.msra.mxu0 %v7415_v39  ;;  %v7496_v60 = vld [vmem:[#allocation14 + $0x348] ss:$16 sps:$4 sm:$0xff]   ;;  %v7501_v37 = vld [vmem:[#allocation14 + $0x12c] ss:$16 sps:$4 sm:$0xff]  }
 0x4a1   : > { %5606 = vmatpush1.bf16.msra.mxu1 %v7418_v57  ;;  %5596 = vmatprep.mubr.bf16.mxu0 %v4711_v55  ;;  %v7504_v6 = vld [vmem:[#allocation14 + $0x32c] ss:$16 sps:$4 sm:$0xff]   ;;  %v7499_v35 = vld [vmem:[#allocation14 + $0x128] ss:$16 sps:$4 sm:$0xff]  }
 0x4a2   : > { %5637 = vmatprep.mubr.bf16.mxu1 %v4713_v40  ;;  %5566 = vmatprep.subr.bf16.mxu0 %v7423_v48  ;;  %v7502_v36 = vld [vmem:[#allocation14 + $0x328] ss:$16 sps:$4 sm:$0xff]   ;;  %v7507_v24 = vld [vmem:[#allocation14 + $0x10c] ss:$16 sps:$4 sm:$0xff]  }
 0x4a3   : > { %5607 = vmatprep.subr.bf16.mxu1 %v7426_v25  ;;  %v7510_v55 = vld [vmem:[#allocation14 + $0x30c] ss:$16 sps:$4 sm:$0xff]   ;;  %v7505_v39 = vld [vmem:[#allocation14 + $0x108] ss:$16 sps:$4 sm:$0xff]  }
 0x4a4   : > { %5567 = vmatpush1.bf16.msra.mxu0 %v7421_v53  ;;  %v7508_v40 = vld [vmem:[#allocation14 + $0x308] ss:$16 sps:$4 sm:$0xff]  }
 0x4a5   : > { %5608 = vmatpush1.bf16.msra.mxu1 %v7424_v26  ;;  %5568 = vmatprep.subr.bf16.mxu0 %v7429_v28 }
 0x4a6   : > { %5609 = vmatprep.subr.bf16.mxu1 %v7432_v43 }
 0x4a8   : > { %5569 = vmatpush1.bf16.msra.mxu0 %v7427_v52 }
 0x4a9   : > { %5610 = vmatpush1.bf16.msra.mxu1 %v7430_v46  ;;  %5570 = vmatprep.subr.bf16.mxu0 %v7435_v2 }
 0x4aa   : > { %5611 = vmatprep.subr.bf16.mxu1 %v7438_v3 }
 0x4ac   : > { %5571 = vmatpush1.bf16.msra.mxu0 %v7433_v4 }
 0x4ad   : > { %5612 = vmatpush1.bf16.msra.mxu1 %v7436_v22  ;;  %5572 = vmatprep.subr.bf16.mxu0 %v7441_v58 }
 0x4ae   : > { %5613 = vmatprep.subr.bf16.mxu1 %v7444_v5 }
 0x4b0   : > { %5573 = vmatpush1.bf16.msra.mxu0 %v7439_v61 }
 0x4b1   : > { %5614 = vmatpush1.bf16.msra.mxu1 %v7442_v62  ;;  %5574 = vmatprep.subr.bf16.mxu0 %v7447_v9 }
 0x4b2   : > { %5615 = vmatprep.subr.bf16.mxu1 %v7450_v27 }
 0x4b4   : > { %5575 = vmatpush1.bf16.msra.mxu0 %v7445_v30 }
 0x4b5   : > { %5616 = vmatpush1.bf16.msra.mxu1 %v7448_v10  ;;  %5576 = vmatprep.subr.bf16.mxu0 %v7453_v11 }
 0x4b6   : > { %5617 = vmatprep.subr.bf16.mxu1 %v7456_v12 }
 0x4b8   : > { %5577 = vmatpush1.bf16.msra.mxu0 %v7451_v13 }
 0x4b9   : > { %5618 = vmatpush1.bf16.msra.mxu1 %v7454_v29  ;;  %5578 = vmatprep.subr.bf16.mxu0 %v7459_v32 }
 0x4ba   : > { %5619 = vmatprep.subr.bf16.mxu1 %v7462_v14 }
 0x4bc   : > { %5579 = vmatpush1.bf16.msra.mxu0 %v7457_v31 }
 0x4bd   : > { %5620 = vmatpush1.bf16.msra.mxu1 %v7460_v34  ;;  %5580 = vmatprep.subr.bf16.mxu0 %v7465_v44 }
 0x4be   : > { %5621 = vmatprep.subr.bf16.mxu1 %v7468_v49 }
 0x4c0   : > { %5581 = vmatpush2.bf16.msra.mxu0 %v7463_v45 }
 0x4c1   : > { %5622 = vmatpush2.bf16.msra.mxu1 %v7466_v16  ;;  %5582 = vmatprep.subr.bf16.mxu0 %v7471_v17 }
 0x4c2   : > { %5623 = vmatprep.subr.bf16.mxu1 %v7474_v0 }
 0x4c4   : > { %5583 = vmatpush2.bf16.msra.mxu0 %v7469_v51 }
 0x4c5   : > { %5624 = vmatpush2.bf16.msra.mxu1 %v7472_v18  ;;  %5584 = vmatprep.subr.bf16.mxu0 %v7477_v19 }
 0x4c6   : > { %5625 = vmatprep.subr.bf16.mxu1 %v7480_v7 }
 0x4c8   : > { %5585 = vmatpush2.bf16.msra.mxu0 %v7475_v42 }
 0x4c9   : > { %5626 = vmatpush2.bf16.msra.mxu1 %v7478_v41  ;;  %5586 = vmatprep.subr.bf16.mxu0 %v7483_v59 }
 0x4ca   : > { %5627 = vmatprep.subr.bf16.mxu1 %v7486_v8 }
 0x4cc   : > { %5587 = vmatpush2.bf16.msra.mxu0 %v7481_v63 }
 0x4cd   : > { %5628 = vmatpush2.bf16.msra.mxu1 %v7484_v20  ;;  %5588 = vmatprep.subr.bf16.mxu0 %v7489_v56 }
 0x4ce   : > { %5629 = vmatprep.subr.bf16.mxu1 %v7492_v21 }
 0x4d0   : > { %5589 = vmatpush2.bf16.msra.mxu0 %v7487_v23 }
 0x4d1   : > { %5630 = vmatpush2.bf16.msra.mxu1 %v7490_v47  ;;  %5590 = vmatprep.subr.bf16.mxu0 %v7495_v50 }
 0x4d2   : > { %5631 = vmatprep.subr.bf16.mxu1 %v7498_v33 }
 0x4d4   : > { %5591 = vmatpush2.bf16.msra.mxu0 %v7493_v54 }
 0x4d5   : > { %5632 = vmatpush2.bf16.msra.mxu1 %v7496_v60  ;;  %5592 = vmatprep.subr.bf16.mxu0 %v7501_v37 }
 0x4d6   : > { %5633 = vmatprep.subr.bf16.mxu1 %v7504_v6 }
 0x4d8   : > { %5593 = vmatpush2.bf16.msra.mxu0 %v7499_v35 }
 0x4d9   : > { %5634 = vmatpush2.bf16.msra.mxu1 %v7502_v36  ;;  %5594 = vmatprep.subr.bf16.mxu0 %v7507_v24 }
 0x4da   : > { %5635 = vmatprep.subr.bf16.mxu1 %v7510_v55 }
 0x4dc   : > { %5595 = vmatpush2.bf16.msra.mxu0 %v7505_v39 }
 0x4dd   : > { %5636 = vmatpush2.bf16.msra.mxu1 %v7508_v40 }
 0x4df   : > { %5597 = vmatmul.mubr.bf16.vlgmr.msra.gmra.mxu0 %v8281_v38  ;;  %v5646_v38 = vld [vmem:[%s8347_s8] sm:$0x1] }
 0x4e0   : > { %5638 = vmatmul.mubr.bf16.vlgmr.msra.gmra.mxu1 %v8283_v1 }
 0x55f   : > { %v5516_v57 = vpop.f32.mrf.mxu0 }
 0x560   : > { %v5557_v48 = vpop.f32.mrf.mxu1 }
 0x561   : > { %v5518_v25 = vpop.f32.mrf.mxu0  ;;  %v5558_v46 = vadd.f32 %v5557_v48, %v5516_v57 }
 0x562   : > { %v5559_v53 = vpop.f32.mrf.mxu1 }
 0x563   : > { %v5520_v26 = vpop.f32.mrf.mxu0  ;;  %v5655_v2 = vrot.slane %v5558_v46, %v8142_v15  ;;  %v5560_v3 = vadd.f32 %v5559_v53, %v5518_v25  ;;  %v5647_v61 = vadd.f32 %v5646_v38, %v5558_v46 }
 0x564   : > { %v5561_v28 = vpop.f32.mrf.mxu1 }
 0x565   : > { %v5521_v43 = vpop.f32.mrf.mxu0  ;;  %v5656_v4 = vcombine.high %v5655_v2, %v5655_v2  ;;  %v5673_v22 = vrot.slane %v5560_v3, %v8142_v15 }
 0x566   : > { %v5562_v52 = vpop.f32.mrf.mxu1 }
 0x567   : > { %v5663_v1 = vrot.slane %v5656_v4, %v8142_v15  ;;  %v5680_v58 = vrot.slane %v5673_v22, %v8142_v15  ;;  %v5684_v5 = vcombine.high %v5673_v22, %v5673_v22 }
 0x569   : > { %v5665_v62 = vadd.f32 %v5663_v1, %v5647_v61  ;;  %v5681_v9 = vcombine.high %v5680_v58, %v5680_v58  ;;  %v5691_v27 = vrot.slane %v5684_v5, %v8142_v15 }
 0x56b   : > { %v5683_v29 = vadd.f32 %v5681_v9, %v5665_v62  ;;  %v5692_v32 = vcombine.high %v5691_v27, %v5691_v27 }
 0x56d   : > { %v5694_v0 = vadd.f32 %v5692_v32, %v5683_v29 }
 0x59f   : > { %v5598_v30 = vpop.f32.mrf.mxu0 }
 0x5a0   : > { %v5639_v10 = vpop.f32.mrf.mxu1 }
 0x5a1   : > { %v5640_v11 = vadd.f32 %v5639_v10, %v5598_v30  ;;  %v5600_v12 = vpop.f32.mrf.mxu0 }
 0x5a2   : > { %v5641_v13 = vpop.f32.mrf.mxu1 }
 0x5a3   : > { %v5696_v14 = vcombine.high %v5640_v11, %v5640_v11  ;;  %v5642_v31 = vadd.f32 %v5641_v13, %v5600_v12  ;;  %v5602_v34 = vpop.f32.mrf.mxu0 }
 0x5a4   : > { %v5643_v44 = vpop.f32.mrf.mxu1 }
 0x5a5   : > { %v5703_v49 = vrot.slane %v5696_v14, %v8142_v15  ;;  %v5724_v45 = vcombine.high %v5642_v31, %v5642_v31  ;;  %v5603_v16 = vpop.f32.mrf.mxu0 }
 0x5a6   : > { %v5644_v17 = vpop.f32.mrf.mxu1 }
 0x5a7   : > { %v5710_v51 = vrot.slane %v5703_v49, %v8142_v15  ;;  %v5713_v18 = vcombine.high %v5703_v49, %v5703_v49  ;;  %v5731_v19 = vrot.slane %v5724_v45, %v8142_v15 }
 0x5a9   : > { %v5712_v7 = vadd.f32 %v5710_v51, %v5694_v0  ;;  %v5720_v42 = vrot.slane %v5713_v18, %v8142_v15  ;;  %v5738_v41 = vrot.slane %v5731_v19, %v8142_v15  ;;  %v5742_v59 = vcombine.high %v5731_v19, %v5731_v19 }
 0x5ab   : > { %v5722_v8 = vadd.f32 %v5720_v42, %v5712_v7  ;;  %v5739_v63 = vcombine.high %v5738_v41, %v5738_v41  ;;  %v5749_v20 = vrot.slane %v5742_v59, %v8142_v15 }
 0x5ad   : > { %v5741_v56 = vadd.f32 %v5739_v63, %v5722_v8  ;;  %v5750_v21 = vcombine.high %v5749_v20, %v5749_v20 }
 0x5af   : > { %v5752_v23 = vadd.f32 %v5750_v21, %v5741_v56 }
 0x5b1   : > { %5753 = vst [vmem:[%s420_s28] sm:$0x1] %v5752_v23 }
 0x5b2   : > { %7682 = shalt.err (!%p7679_p3)
}
 0x5b3   : > { %s7683_s14 = scalar_lea.hbm %s5765_s4, 16  ;;  %s7687_s22 = scalar_lea.hbm %s8348_s9, 32 }
 0x5b4   : > { %p7684_p1 = scmp.ne.s32.totalorder %s5765_s4, %s7683_s14  ;;  %p7688_p9 = scmp.lt.s32.totalorder %s5765_s4, %s8348_s9 }
 0x5b5   : > { %p7689_p12 = scmp.lt.s32.totalorder %s7687_s22, %s7683_s14 }
 0x5b6   : > { %p7685_p6 = pnand %p7684_p1, %p8385_p4 }
 0x5b7   : > { %p7690_p13 = por %p7689_p12, %p7688_p9 }
 0x5b8   : > { %p7686_p8 = pneg %p7685_p6 }
 0x5ba   : > { %p7691_p0 = pnand %p7690_p13, %p7686_p8 }
 0x5bc   : > { %7694 = shalt.err (!%p7691_p0)
}
 0x5bd   : > { %6543 = dma.vmem_to_hbm [thread:$0]  (%p8385_p4), %s5768_s24, 16, %s5765_s4, %s5755_s21  }
 0x5be PF: > { %s5779_s28 = sand.u32 1, %s7733_s30   ;;  %p8386_p2 = scmp.ne.s32.totalorder %s8365_s29, 0 }
 0x5bf   : > { %p8387_p5 = scmp.ge.s32.totalorder %s7745_s12, 2  ;;  %s5780_s1 = scalar_lea.sflag [#allocation7], %s5779_s28 }
 0x5c1   : > { %p6566_p7 = pnand %p8387_p5, %p8386_p2 }
 0x5c3   : > { %p6567_p10 = pneg %p6566_p7 }
 0x5c5   : > { %7728 = dma.done.wait (%p6567_p10), %s5780_s1, 16  }
 0x5c6   : > { %7730 = vsyncadd (%p6567_p10), %s5780_s1, 4294967280  ;;  %p25_p11 = scmp.ge.s32.totalorder %s7902_s19, 4   ;;  %s8388_s30 = smov %s7737_s10 }
 0x5c7   : > { %s8389_s10 = smov %s7741_s11  ;;  %s8390_s11 = smov %s7914_s23 }
 0x5c8   : > { %s8391_s12 = smov %s7902_s19  ;;  %27 = sbr.rel (!%p25_p11) target bundleno = 12 (0xc), region = 133 }
 0x5cd   :  { %5784 = vsyncpa [#allocation6], 1 }
 0x5ce   :  { %5786 = vsyncpa [#allocation6 + $0x1], 1 }
 0x5cf   :  { %5787 = vsyncpa [#allocation9], 1 }
 0x5d0   :  { %5788 = vsyncpa [#allocation12], 1 }
 0x5d1   :  { %5789 = vsyncpa [#allocation15], 1 }
 0x5d2   :  { %5790 = vsyncpa [#allocation7], 1 }
 0x5d3   :  { %5792 = vsyncpa [#allocation7 + $0x1], 1 }

</bundles_post_ra>
